<compile_context>
chip_gen: v7x
topology: tpu7x:2x2x1
jax: 0.10.0
libtpu: 0.0.40
codegen_flags: <defaults>
</compile_context>

<pallas_src>
import math
import functools

import jax
import jax.numpy as jnp
from jax.experimental import pallas as pl
from jax.experimental.pallas import tpu as pltpu

_BF16 = jnp.bfloat16
_F32 = jnp.float32


# ----------------------------- in-kernel helpers ----------------------------

def _mm(a_f32, w_bf16):
    """MXU matmul: bf16 operands, f32 accumulation."""
    return jnp.dot(a_f32.astype(_BF16), w_bf16, preferred_element_type=_F32)


def _ln(x, g, b, eps=1e-5):
    """Row-wise LayerNorm, f32 math only (v5e-friendly)."""
    mean = jnp.mean(x, axis=-1, keepdims=True)
    c = x - mean
    var = jnp.mean(c * c, axis=-1, keepdims=True)
    return c * jax.lax.rsqrt(var + eps) * g + b


def _ffn(x, w1, bf1, w2, bf2):
    h = jnp.maximum(_mm(x, w1) + bf1, 0.0)
    return _mm(h, w2) + bf2


def _attn_core(q, k, v, mask, scale):
    """One (batch, head) attention core: q (Tq, Dh), k/v (Tk, Dh), f32 in/out."""
    s = jax.lax.dot_general((q * scale).astype(_BF16), k.astype(_BF16),
                            (((1,), (1,)), ((), ())),
                            preferred_element_type=_F32)            # (Tq, Tk)
    if mask is not None:
        s = s + mask
    s = s - jnp.max(s, axis=-1, keepdims=True)                      # before exp (mask safe)
    e = jnp.exp(s)
    p = e * pl.reciprocal(jnp.sum(e, axis=-1, keepdims=True), approx=True)
    return jnp.dot(p.astype(_BF16), v.astype(_BF16),
                   preferred_element_type=_F32)                     # (Tq, Dh)


def _self_attn(x2d, wqkv, bqkv, wo, bo, N, L, H, Dh, scale, mask):
    """Batch-folded multi-head self-attention.

    x2d: (N*L, E) f32. wqkv: (E, 3*H*Dh) bf16 fused Q|K|V (head-major columns).
    bqkv: (1, 3*H*Dh) f32. wo: (H*Dh, E) bf16. bo: (1, E) f32.
    """
    HD = H * Dh
    qkv = _mm(x2d, wqkv) + bqkv                                     # ONE fused QKV matmul
    outs = []
    for n in range(N):                                              # tiny static batch loop
        blk = qkv[n * L:(n + 1) * L]                                # (L, 3*HD)
        heads = []
        for h in range(H):
            q = blk[:, h * Dh:(h + 1) * Dh]
            k = blk[:, HD + h * Dh:HD + (h + 1) * Dh]
            v = blk[:, 2 * HD + h * Dh:2 * HD + (h + 1) * Dh]
            heads.append(_attn_core(q, k, v, mask, scale))
        outs.append(jnp.concatenate(heads, axis=-1))                # (L, HD)
    ocat = jnp.concatenate(outs, axis=0)                            # (N*L, HD)
    return _mm(ocat, wo) + bo                                       # ONE output projection


def _cross_attn(y2d, mem2d, wq, bq, wkv, bkv, wo, bo, N, T, S, H, Dh, scale):
    """Batch-folded cross-attention: queries from y2d, keys/values from mem2d."""
    HD = H * Dh
    q_all = _mm(y2d, wq) + bq                                       # (N*T, HD)
    kv_all = _mm(mem2d, wkv) + bkv                                  # (N*S, 2*HD) fused K|V
    outs = []
    for n in range(N):
        qb = q_all[n * T:(n + 1) * T]
        kvb = kv_all[n * S:(n + 1) * S]
        heads = []
        for h in range(H):
            q = qb[:, h * Dh:(h + 1) * Dh]
            k = kvb[:, h * Dh:(h + 1) * Dh]
            v = kvb[:, HD + h * Dh:HD + (h + 1) * Dh]
            heads.append(_attn_core(q, k, v, None, scale))          # zero src mask skipped
        outs.append(jnp.concatenate(heads, axis=-1))
    ocat = jnp.concatenate(outs, axis=0)                            # (N*T, HD)
    return _mm(ocat, wo) + bo


# ------------------------------ single fused kernel ---------------------------

def _transformer_kernel(x_ref, y_ref,
                        e_wqkv_ref, e_wo_ref, e_w1_ref, e_w2_ref, e_vec_ref,
                        d_swqkv_ref, d_swo_ref, d_cwq_ref, d_cwkv_ref, d_cwo_ref,
                        d_w1_ref, d_w2_ref, d_vec_ref,
                        norms_ref, fc_w_ref, fc_b_ref,
                        o_ref,
                        *, N, S, T, E, H, Dh, F, nel, ndl, scale):
    HD = H * Dh
    x = x_ref[...]                                   # (N*S, E) f32 (batch folded to rows)
    y = y_ref[...]                                   # (N*T, E) f32
    nrm = norms_ref[...]                             # (4, E)  f32: enc_g, enc_b, dec_g, dec_b

    # Causal target mask built in-kernel (no HBM input / DMA for an (T,T) operand).
    row = jax.lax.broadcasted_iota(jnp.int32, (T, T), 0)
    col = jax.lax.broadcasted_iota(jnp.int32, (T, T), 1)
    causal = jnp.where(col > row, -1e9, 0.0).astype(_F32)

    # ---------------- encoder stack (post-norm layers) ----------------
    for l in range(nel):                             # static loop over stacked layer weights
        ev = e_vec_ref[l]                            # (8, W) packed f32 biases / LN params
        bqkv, bo = ev[0:1, :3 * HD], ev[1:2, :E]
        g1, b1 = ev[2:3, :E], ev[3:4, :E]
        bf1, bf2 = ev[4:5, :F], ev[5:6, :E]
        g2, b2 = ev[6:7, :E], ev[7:8, :E]

        attn = _self_attn(x, e_wqkv_ref[l], bqkv, e_wo_ref[l], bo,
                          N, S, H, Dh, scale, None)  # zero src key-padding mask skipped
        x = _ln(x + attn, g1, b1)
        x = _ln(x + _ffn(x, e_w1_ref[l], bf1, e_w2_ref[l], bf2), g2, b2)

    mem = _ln(x, nrm[0:1, :], nrm[1:2, :])           # encoder final LayerNorm (VMEM-resident)

    # ---------------- decoder stack ----------------
    for l in range(ndl):
        dv = d_vec_ref[l]                            # (13, W) packed f32 biases / LN params
        s_bqkv, s_bo = dv[0:1, :3 * HD], dv[1:2, :E]
        g1, b1 = dv[2:3, :E], dv[3:4, :E]
        c_bq, c_bkv, c_bo = dv[4:5, :HD], dv[5:6, :2 * HD], dv[6:7, :E]
        g2, b2 = dv[7:8, :E], dv[8:9, :E]
        bf1, bf2 = dv[9:10, :F], dv[10:11, :E]
        g3, b3 = dv[11:12, :E], dv[12:13, :E]

        sa = _self_attn(y, d_swqkv_ref[l], s_bqkv, d_swo_ref[l], s_bo,
                        N, T, H, Dh, scale, causal)
        y = _ln(y + sa, g1, b1)
        ca = _cross_attn(y, mem, d_cwq_ref[l], c_bq, d_cwkv_ref[l], c_bkv,
                         d_cwo_ref[l], c_bo, N, T, S, H, Dh, scale)
        y = _ln(y + ca, g2, b2)
        y = _ln(y + _ffn(y, d_w1_ref[l], bf1, d_w2_ref[l], bf2), g3, b3)

    y = _ln(y, nrm[2:3, :], nrm[3:4, :])             # decoder final LayerNorm

    # ------- output head: fc_out (lane-dense, padded V) + softmax over dim 0 (time) -------
    logits = _mm(y, fc_w_ref[...]) + fc_b_ref[...]   # (N*T, Vp), Vp multiple of 128
    outs = []
    for n in range(N):
        blk = logits[n * T:(n + 1) * T]              # (T, Vp)
        m = jnp.max(blk, axis=0, keepdims=True)
        e = jnp.exp(blk - m)
        outs.append(e / jnp.sum(e, axis=0, keepdims=True))   # exact divide for final output
    o_ref[...] = jnp.concatenate(outs, axis=0)       # single full-lane (N*T, Vp) store


# ------------------------------ params ---------------------------------------

def make_pos_embedding(E, maxlen):
    den = jnp.exp(-jnp.arange(0, E, 2, dtype=_F32) * (math.log(10000.0) / E))
    pos = jnp.arange(maxlen, dtype=_F32).reshape(maxlen, 1)
    pe = jnp.zeros((maxlen, E), _F32)
    pe = pe.at[:, 0::2].set(jnp.sin(pos * den))
    pe = pe.at[:, 1::2].set(jnp.cos(pos * den))
    return pe[:, None, :]                                  # (maxlen, 1, E)


def init_params(key, E, H, nel, ndl, F, V, maxlen):
    """Weights created directly in the fused layouts (fused QKV, packed vectors)."""
    Dh = E // H
    HD = H * Dh
    W = max(3 * HD, 2 * HD, F, E)                          # packed-vector lane width
    keys = iter(jax.random.split(key, 256))

    def nrm(shape, dtype=_F32, scale=0.02):
        return (scale * jax.random.normal(next(keys), shape, _F32)).astype(dtype)

    def pad_row(v):
        v = jnp.asarray(v, _F32).reshape(-1)
        return jnp.pad(v, (0, W - v.shape[0]))

    ones_e = jnp.ones((E,), _F32)
    zeros_e = jnp.zeros((E,), _F32)

    def enc_layer():
        wqkv = nrm((E, 3 * HD), _BF16)                     # fused Q|K|V projection
        wo = nrm((HD, E), _BF16)                           # fused output projection
        w1, w2 = nrm((E, F), _BF16), nrm((F, E), _BF16)
        vec = jnp.stack([pad_row(r) for r in [
            nrm((3 * HD,)), nrm((E,)),                     # bqkv, bo
            ones_e, zeros_e,                               # g1, b1
            nrm((F,)), nrm((E,)),                          # bf1, bf2
            ones_e, zeros_e,                               # g2, b2
        ]])                                                # (8, W)
        return wqkv, wo, w1, w2, vec

    def dec_layer():
        swqkv = nrm((E, 3 * HD), _BF16)
        swo = nrm((HD, E), _BF16)
        cwq = nrm((E, HD), _BF16)                          # cross-attn Q
        cwkv = nrm((E, 2 * HD), _BF16)                     # cross-attn fused K|V
        cwo = nrm((HD, E), _BF16)
        w1, w2 = nrm((E, F), _BF16), nrm((F, E), _BF16)
        vec = jnp.stack([pad_row(r) for r in [
            nrm((3 * HD,)), nrm((E,)),                     # s_bqkv, s_bo
            ones_e, zeros_e,                               # g1, b1
            nrm((HD,)), nrm((2 * HD,)), nrm((E,)),         # c_bq, c_bkv, c_bo
            ones_e, zeros_e,                               # g2, b2
            nrm((F,)), nrm((E,)),                          # bf1, bf2
            ones_e, zeros_e,                               # g3, b3
        ]])                                                # (13, W)
        return swqkv, swo, cwq, cwkv, cwo, w1, w2, vec

    enc = [enc_layer() for _ in range(nel)]
    dec = [dec_layer() for _ in range(ndl)]

    Vp = ((V + 127) // 128) * 128                          # lane-dense padded vocab width
    fc_w = jnp.pad(nrm((E, V), _BF16), ((0, 0), (0, Vp - V)))
    fc_b = jnp.pad(nrm((1, V)), ((0, 0), (0, Vp - V)))

    return dict(
        trg_emb=nrm((V, E), scale=1.0),
        pe=make_pos_embedding(E, maxlen),
        e_wqkv=jnp.stack([t[0] for t in enc]),
        e_wo=jnp.stack([t[1] for t in enc]),
        e_w1=jnp.stack([t[2] for t in enc]),
        e_w2=jnp.stack([t[3] for t in enc]),
        e_vec=jnp.stack([t[4] for t in enc]),
        d_swqkv=jnp.stack([t[0] for t in dec]),
        d_swo=jnp.stack([t[1] for t in dec]),
        d_cwq=jnp.stack([t[2] for t in dec]),
        d_cwkv=jnp.stack([t[3] for t in dec]),
        d_cwo=jnp.stack([t[4] for t in dec]),
        d_w1=jnp.stack([t[5] for t in dec]),
        d_w2=jnp.stack([t[6] for t in dec]),
        d_vec=jnp.stack([t[7] for t in dec]),
        norms=jnp.stack([ones_e, zeros_e, ones_e, zeros_e]),   # enc_g, enc_b, dec_g, dec_b
        fc_w=fc_w,
        fc_b=fc_b,
        vocab=V,
    )


# ------------------------------ forward ---------------------------------------

def transformer_forward(params, src, trg, *, num_heads):
    # src: (S, N, E) float (already embedded), trg: (T, N) int token ids
    S, N, E = src.shape
    T = trg.shape[0]
    Dh = E // num_heads
    V = params["trg_emb"].shape[0]
    Vp = params["fc_w"].shape[-1]
    F = params["e_w1"].shape[-1]
    nel = params["e_wqkv"].shape[0]
    ndl = params["d_swqkv"].shape[0]

    # TODO(synk): target word-embedding gather + positional-encoding add stay in JAX glue
    # (tiny one-time ops; no tiling win from a Pallas gather at this size).
    embed_trg = params["trg_emb"][trg]                      # (T, N, E)
    embed_src = src + params["pe"][:S]
    embed_trg = embed_trg + params["pe"][:T]
    # dropout == identity (eval mode)

    # layout plumbing in the wrapper: batch-major and batch folded into rows
    x2d = jnp.transpose(embed_src, (1, 0, 2)).reshape(N * S, E)     # (N*S, E)
    y2d = jnp.transpose(embed_trg, (1, 0, 2)).reshape(N * T, E)     # (N*T, E)

    kern = functools.partial(_transformer_kernel, N=N, S=S, T=T, E=E, H=num_heads,
                             Dh=Dh, F=F, nel=nel, ndl=ndl,
                             scale=1.0 / math.sqrt(Dh))
    args = (x2d, y2d,
            params["e_wqkv"], params["e_wo"], params["e_w1"], params["e_w2"], params["e_vec"],
            params["d_swqkv"], params["d_swo"], params["d_cwq"], params["d_cwkv"],
            params["d_cwo"], params["d_w1"], params["d_w2"], params["d_vec"],
            params["norms"], params["fc_w"], params["fc_b"])

    out2d = pl.pallas_call(                                  # ONE fused call per forward
        kern,
        out_shape=jax.ShapeDtypeStruct((N * T, Vp), _F32),
        in_specs=[pl.BlockSpec(memory_space=pltpu.MemorySpace.VMEM)] * len(args),
        out_specs=pl.BlockSpec(memory_space=pltpu.MemorySpace.VMEM),
    )(*args)

    out = out2d.reshape(N, T, Vp)[:, :, :V]                  # drop lane padding
    return jnp.transpose(out, (1, 0, 2))                     # (T, N, V)


# ---------------------------------- main --------------------------------------

if __name__ == "__main__":
    embedding_size = 32
    num_heads = 2
    num_encoder_layers = 2
    num_decoder_layers = 2
    forward_expansion = 64        # nn.Transformer dim_feedforward
    trg_vocab_size = 50
    max_length = 64
    # src_vocab_size / src_pad_idx are unused by the reference forward pass.

    S, T, N = 10, 8, 2            # src len, trg len, batch

    key = jax.random.PRNGKey(0)
    kp, ks, kt = jax.random.split(key, 3)
    params = init_params(kp, embedding_size, num_heads, num_encoder_layers,
                         num_decoder_layers, forward_expansion,
                         trg_vocab_size, max_length)
    src = jax.random.normal(ks, (S, N, embedding_size), _F32)     # (S, N, E)
    trg = jax.random.randint(kt, (T, N), 0, trg_vocab_size)       # (T, N) ids

    fwd = jax.jit(functools.partial(transformer_forward, num_heads=num_heads))
    out = jax.block_until_ready(fwd(params, src, trg))
    assert out.shape == (T, N, trg_vocab_size)
    assert bool(jnp.all(jnp.isfinite(out)))
    print("KERNEL_OK")
</pallas_src>

<mosaic_0001>
module attributes {stable_mosaic.version = 11 : i64} {
  func.func @_transformer_kernel(%arg0: memref<20x32xf32, #tpu.memory_space<vmem>>, %arg1: memref<16x32xf32, #tpu.memory_space<vmem>>, %arg2: memref<2x32x96xbf16, #tpu.memory_space<vmem>>, %arg3: memref<2x32x32xbf16, #tpu.memory_space<vmem>>, %arg4: memref<2x32x64xbf16, #tpu.memory_space<vmem>>, %arg5: memref<2x64x32xbf16, #tpu.memory_space<vmem>>, %arg6: memref<2x8x96xf32, #tpu.memory_space<vmem>>, %arg7: memref<2x32x96xbf16, #tpu.memory_space<vmem>>, %arg8: memref<2x32x32xbf16, #tpu.memory_space<vmem>>, %arg9: memref<2x32x32xbf16, #tpu.memory_space<vmem>>, %arg10: memref<2x32x64xbf16, #tpu.memory_space<vmem>>, %arg11: memref<2x32x32xbf16, #tpu.memory_space<vmem>>, %arg12: memref<2x32x64xbf16, #tpu.memory_space<vmem>>, %arg13: memref<2x64x32xbf16, #tpu.memory_space<vmem>>, %arg14: memref<2x13x96xf32, #tpu.memory_space<vmem>>, %arg15: memref<4x32xf32, #tpu.memory_space<vmem>>, %arg16: memref<32x128xbf16, #tpu.memory_space<vmem>>, %arg17: memref<1x128xf32, #tpu.memory_space<vmem>>, %arg18: memref<16x128xf32, #tpu.memory_space<vmem>>) attributes {dimension_semantics = [], scalar_prefetch = 0 : i64, scratch_operands = 0 : i64, tpu.core_type = #tpu.core_type<tc>} {
    %c0 = arith.constant 0 : index
    %c0_0 = arith.constant 0 : index
    %0 = vector.load %arg0[%c0, %c0_0] : memref<20x32xf32, #tpu.memory_space<vmem>>, vector<20x32xf32>
    %c0_1 = arith.constant 0 : index
    %c0_2 = arith.constant 0 : index
    %1 = vector.load %arg1[%c0_1, %c0_2] : memref<16x32xf32, #tpu.memory_space<vmem>>, vector<16x32xf32>
    %c0_3 = arith.constant 0 : index
    %c0_4 = arith.constant 0 : index
    %2 = vector.load %arg15[%c0_3, %c0_4] : memref<4x32xf32, #tpu.memory_space<vmem>>, vector<4x32xf32>
    %3 = tpu.iota {dimensions = array<i32: 0>} : vector<8x8xi32>
    %4 = tpu.iota {dimensions = array<i32: 1>} : vector<8x8xi32>
    %5 = arith.cmpi sgt, %4, %3 : vector<8x8xi32>
    %cst = arith.constant -1.000000e+09 : f32
    %cst_5 = arith.constant 0.000000e+00 : f32
    %6 = vector.broadcast %cst : f32 to vector<8x8xf32>
    %7 = vector.broadcast %cst_5 : f32 to vector<8x8xf32>
    %8 = arith.select %5, %6, %7 : vector<8x8xi1>, vector<8x8xf32>
    %c0_6 = arith.constant 0 : index
    %c0_7 = arith.constant 0 : index
    %c0_8 = arith.constant 0 : index
    %9 = vector.load %arg6[%c0_6, %c0_7, %c0_8] : memref<2x8x96xf32, #tpu.memory_space<vmem>>, vector<1x8x96xf32>
    %10 = vector.shape_cast %9 : vector<1x8x96xf32> to vector<8x96xf32>
    %11 = vector.extract_strided_slice %10 {offsets = [0, 0], sizes = [1, 96], strides = [1, 1]} : vector<8x96xf32> to vector<1x96xf32>
    %12 = vector.extract_strided_slice %10 {offsets = [1, 0], sizes = [1, 32], strides = [1, 1]} : vector<8x96xf32> to vector<1x32xf32>
    %13 = vector.extract_strided_slice %10 {offsets = [2, 0], sizes = [1, 32], strides = [1, 1]} : vector<8x96xf32> to vector<1x32xf32>
    %14 = vector.extract_strided_slice %10 {offsets = [3, 0], sizes = [1, 32], strides = [1, 1]} : vector<8x96xf32> to vector<1x32xf32>
    %15 = vector.extract_strided_slice %10 {offsets = [4, 0], sizes = [1, 64], strides = [1, 1]} : vector<8x96xf32> to vector<1x64xf32>
    %16 = vector.extract_strided_slice %10 {offsets = [5, 0], sizes = [1, 32], strides = [1, 1]} : vector<8x96xf32> to vector<1x32xf32>
    %17 = vector.extract_strided_slice %10 {offsets = [6, 0], sizes = [1, 32], strides = [1, 1]} : vector<8x96xf32> to vector<1x32xf32>
    %18 = vector.extract_strided_slice %10 {offsets = [7, 0], sizes = [1, 32], strides = [1, 1]} : vector<8x96xf32> to vector<1x32xf32>
    %c0_9 = arith.constant 0 : index
    %c0_10 = arith.constant 0 : index
    %c0_11 = arith.constant 0 : index
    %19 = vector.load %arg2[%c0_9, %c0_10, %c0_11] : memref<2x32x96xbf16, #tpu.memory_space<vmem>>, vector<1x32x96xbf16>
    %20 = vector.shape_cast %19 : vector<1x32x96xbf16> to vector<32x96xbf16>
    %c0_12 = arith.constant 0 : index
    %c0_13 = arith.constant 0 : index
    %c0_14 = arith.constant 0 : index
    %21 = vector.load %arg3[%c0_12, %c0_13, %c0_14] : memref<2x32x32xbf16, #tpu.memory_space<vmem>>, vector<1x32x32xbf16>
    %22 = vector.shape_cast %21 : vector<1x32x32xbf16> to vector<32x32xbf16>
    %23 = arith.truncf %0 : vector<20x32xf32> to vector<20x32xbf16>
    %cst_15 = arith.constant dense<0.000000e+00> : vector<20x96xf32>
    %24 = tpu.matmul %23, %20, %cst_15 {dimension_numbers = #tpu.dot_dimension_numbers<[1], [0], [0], [1], [0, 0, 1, 1], [], []>} : vector<20x32xbf16>, vector<32x96xbf16>, vector<20x96xf32> -> vector<20x96xf32>
    %25 = vector.broadcast %11 : vector<1x96xf32> to vector<20x96xf32>
    %26 = arith.addf %24, %25 : vector<20x96xf32>
    %27 = vector.extract_strided_slice %26 {offsets = [0, 0], sizes = [10, 96], strides = [1, 1]} : vector<20x96xf32> to vector<10x96xf32>
    %28 = vector.extract_strided_slice %27 {offsets = [0, 0], sizes = [10, 16], strides = [1, 1]} : vector<10x96xf32> to vector<10x16xf32>
    %29 = vector.extract_strided_slice %27 {offsets = [0, 32], sizes = [10, 16], strides = [1, 1]} : vector<10x96xf32> to vector<10x16xf32>
    %30 = vector.extract_strided_slice %27 {offsets = [0, 64], sizes = [10, 16], strides = [1, 1]} : vector<10x96xf32> to vector<10x16xf32>
    %cst_16 = arith.constant 2.500000e-01 : f32
    %31 = vector.broadcast %cst_16 : f32 to vector<10x16xf32>
    %32 = arith.mulf %28, %31 : vector<10x16xf32>
    %33 = arith.truncf %32 : vector<10x16xf32> to vector<10x16xbf16>
    %34 = arith.truncf %29 : vector<10x16xf32> to vector<10x16xbf16>
    %cst_17 = arith.constant dense<0.000000e+00> : vector<10x10xf32>
    %35 = tpu.matmul %33, %34, %cst_17 {dimension_numbers = #tpu.dot_dimension_numbers<[1], [1], [0], [0], [0, 0, 1, 0], [], []>} : vector<10x16xbf16>, vector<10x16xbf16>, vector<10x10xf32> -> vector<10x10xf32>
    %cst_18 = arith.constant dense<0xFF800000> : vector<10xf32>
    %36 = vector.multi_reduction <maximumf>, %35, %cst_18 [1] : vector<10x10xf32> to vector<10xf32>
    %37 = vector.shape_cast %36 : vector<10xf32> to vector<10x1xf32>
    %38 = vector.broadcast %37 : vector<10x1xf32> to vector<10x10xf32>
    %39 = arith.subf %35, %38 : vector<10x10xf32>
    %40 = math.exp %39 : vector<10x10xf32>
    %cst_19 = arith.constant dense<0.000000e+00> : vector<10xf32>
    %41 = vector.multi_reduction <add>, %40, %cst_19 [1] : vector<10x10xf32> to vector<10xf32>
    %42 = vector.shape_cast %41 : vector<10xf32> to vector<10x1xf32>
    %43 = tpu.reciprocal %42 {approx = true} : vector<10x1xf32> -> vector<10x1xf32>
    %44 = vector.broadcast %43 : vector<10x1xf32> to vector<10x10xf32>
    %45 = arith.mulf %40, %44 : vector<10x10xf32>
    %46 = arith.truncf %45 : vector<10x10xf32> to vector<10x10xbf16>
    %47 = arith.truncf %30 : vector<10x16xf32> to vector<10x16xbf16>
    %cst_20 = arith.constant dense<0.000000e+00> : vector<10x16xf32>
    %48 = tpu.matmul %46, %47, %cst_20 {dimension_numbers = #tpu.dot_dimension_numbers<[1], [0], [0], [1], [0, 0, 1, 1], [], []>} : vector<10x10xbf16>, vector<10x16xbf16>, vector<10x16xf32> -> vector<10x16xf32>
    %49 = vector.extract_strided_slice %27 {offsets = [0, 16], sizes = [10, 16], strides = [1, 1]} : vector<10x96xf32> to vector<10x16xf32>
    %50 = vector.extract_strided_slice %27 {offsets = [0, 48], sizes = [10, 16], strides = [1, 1]} : vector<10x96xf32> to vector<10x16xf32>
    %51 = vector.extract_strided_slice %27 {offsets = [0, 80], sizes = [10, 16], strides = [1, 1]} : vector<10x96xf32> to vector<10x16xf32>
    %cst_21 = arith.constant 2.500000e-01 : f32
    %52 = vector.broadcast %cst_21 : f32 to vector<10x16xf32>
    %53 = arith.mulf %49, %52 : vector<10x16xf32>
    %54 = arith.truncf %53 : vector<10x16xf32> to vector<10x16xbf16>
    %55 = arith.truncf %50 : vector<10x16xf32> to vector<10x16xbf16>
    %cst_22 = arith.constant dense<0.000000e+00> : vector<10x10xf32>
    %56 = tpu.matmul %54, %55, %cst_22 {dimension_numbers = #tpu.dot_dimension_numbers<[1], [1], [0], [0], [0, 0, 1, 0], [], []>} : vector<10x16xbf16>, vector<10x16xbf16>, vector<10x10xf32> -> vector<10x10xf32>
    %cst_23 = arith.constant dense<0xFF800000> : vector<10xf32>
    %57 = vector.multi_reduction <maximumf>, %56, %cst_23 [1] : vector<10x10xf32> to vector<10xf32>
    %58 = vector.shape_cast %57 : vector<10xf32> to vector<10x1xf32>
    %59 = vector.broadcast %58 : vector<10x1xf32> to vector<10x10xf32>
    %60 = arith.subf %56, %59 : vector<10x10xf32>
    %61 = math.exp %60 : vector<10x10xf32>
    %cst_24 = arith.constant dense<0.000000e+00> : vector<10xf32>
    %62 = vector.multi_reduction <add>, %61, %cst_24 [1] : vector<10x10xf32> to vector<10xf32>
    %63 = vector.shape_cast %62 : vector<10xf32> to vector<10x1xf32>
    %64 = tpu.reciprocal %63 {approx = true} : vector<10x1xf32> -> vector<10x1xf32>
    %65 = vector.broadcast %64 : vector<10x1xf32> to vector<10x10xf32>
    %66 = arith.mulf %61, %65 : vector<10x10xf32>
    %67 = arith.truncf %66 : vector<10x10xf32> to vector<10x10xbf16>
    %68 = arith.truncf %51 : vector<10x16xf32> to vector<10x16xbf16>
    %cst_25 = arith.constant dense<0.000000e+00> : vector<10x16xf32>
    %69 = tpu.matmul %67, %68, %cst_25 {dimension_numbers = #tpu.dot_dimension_numbers<[1], [0], [0], [1], [0, 0, 1, 1], [], []>} : vector<10x10xbf16>, vector<10x16xbf16>, vector<10x16xf32> -> vector<10x16xf32>
    %70 = tpu.concatenate %48, %69 in 1 : vector<10x16xf32>, vector<10x16xf32> -> vector<10x32xf32>
    %71 = vector.extract_strided_slice %26 {offsets = [10, 0], sizes = [10, 96], strides = [1, 1]} : vector<20x96xf32> to vector<10x96xf32>
    %72 = vector.extract_strided_slice %71 {offsets = [0, 0], sizes = [10, 16], strides = [1, 1]} : vector<10x96xf32> to vector<10x16xf32>
    %73 = vector.extract_strided_slice %71 {offsets = [0, 32], sizes = [10, 16], strides = [1, 1]} : vector<10x96xf32> to vector<10x16xf32>
    %74 = vector.extract_strided_slice %71 {offsets = [0, 64], sizes = [10, 16], strides = [1, 1]} : vector<10x96xf32> to vector<10x16xf32>
    %cst_26 = arith.constant 2.500000e-01 : f32
    %75 = vector.broadcast %cst_26 : f32 to vector<10x16xf32>
    %76 = arith.mulf %72, %75 : vector<10x16xf32>
    %77 = arith.truncf %76 : vector<10x16xf32> to vector<10x16xbf16>
    %78 = arith.truncf %73 : vector<10x16xf32> to vector<10x16xbf16>
    %cst_27 = arith.constant dense<0.000000e+00> : vector<10x10xf32>
    %79 = tpu.matmul %77, %78, %cst_27 {dimension_numbers = #tpu.dot_dimension_numbers<[1], [1], [0], [0], [0, 0, 1, 0], [], []>} : vector<10x16xbf16>, vector<10x16xbf16>, vector<10x10xf32> -> vector<10x10xf32>
    %cst_28 = arith.constant dense<0xFF800000> : vector<10xf32>
    %80 = vector.multi_reduction <maximumf>, %79, %cst_28 [1] : vector<10x10xf32> to vector<10xf32>
    %81 = vector.shape_cast %80 : vector<10xf32> to vector<10x1xf32>
    %82 = vector.broadcast %81 : vector<10x1xf32> to vector<10x10xf32>
    %83 = arith.subf %79, %82 : vector<10x10xf32>
    %84 = math.exp %83 : vector<10x10xf32>
    %cst_29 = arith.constant dense<0.000000e+00> : vector<10xf32>
    %85 = vector.multi_reduction <add>, %84, %cst_29 [1] : vector<10x10xf32> to vector<10xf32>
    %86 = vector.shape_cast %85 : vector<10xf32> to vector<10x1xf32>
    %87 = tpu.reciprocal %86 {approx = true} : vector<10x1xf32> -> vector<10x1xf32>
    %88 = vector.broadcast %87 : vector<10x1xf32> to vector<10x10xf32>
    %89 = arith.mulf %84, %88 : vector<10x10xf32>
    %90 = arith.truncf %89 : vector<10x10xf32> to vector<10x10xbf16>
    %91 = arith.truncf %74 : vector<10x16xf32> to vector<10x16xbf16>
    %cst_30 = arith.constant dense<0.000000e+00> : vector<10x16xf32>
    %92 = tpu.matmul %90, %91, %cst_30 {dimension_numbers = #tpu.dot_dimension_numbers<[1], [0], [0], [1], [0, 0, 1, 1], [], []>} : vector<10x10xbf16>, vector<10x16xbf16>, vector<10x16xf32> -> vector<10x16xf32>
    %93 = vector.extract_strided_slice %71 {offsets = [0, 16], sizes = [10, 16], strides = [1, 1]} : vector<10x96xf32> to vector<10x16xf32>
    %94 = vector.extract_strided_slice %71 {offsets = [0, 48], sizes = [10, 16], strides = [1, 1]} : vector<10x96xf32> to vector<10x16xf32>
    %95 = vector.extract_strided_slice %71 {offsets = [0, 80], sizes = [10, 16], strides = [1, 1]} : vector<10x96xf32> to vector<10x16xf32>
    %cst_31 = arith.constant 2.500000e-01 : f32
    %96 = vector.broadcast %cst_31 : f32 to vector<10x16xf32>
    %97 = arith.mulf %93, %96 : vector<10x16xf32>
    %98 = arith.truncf %97 : vector<10x16xf32> to vector<10x16xbf16>
    %99 = arith.truncf %94 : vector<10x16xf32> to vector<10x16xbf16>
    %cst_32 = arith.constant dense<0.000000e+00> : vector<10x10xf32>
    %100 = tpu.matmul %98, %99, %cst_32 {dimension_numbers = #tpu.dot_dimension_numbers<[1], [1], [0], [0], [0, 0, 1, 0], [], []>} : vector<10x16xbf16>, vector<10x16xbf16>, vector<10x10xf32> -> vector<10x10xf32>
    %cst_33 = arith.constant dense<0xFF800000> : vector<10xf32>
    %101 = vector.multi_reduction <maximumf>, %100, %cst_33 [1] : vector<10x10xf32> to vector<10xf32>
    %102 = vector.shape_cast %101 : vector<10xf32> to vector<10x1xf32>
    %103 = vector.broadcast %102 : vector<10x1xf32> to vector<10x10xf32>
    %104 = arith.subf %100, %103 : vector<10x10xf32>
    %105 = math.exp %104 : vector<10x10xf32>
    %cst_34 = arith.constant dense<0.000000e+00> : vector<10xf32>
    %106 = vector.multi_reduction <add>, %105, %cst_34 [1] : vector<10x10xf32> to vector<10xf32>
    %107 = vector.shape_cast %106 : vector<10xf32> to vector<10x1xf32>
    %108 = tpu.reciprocal %107 {approx = true} : vector<10x1xf32> -> vector<10x1xf32>
    %109 = vector.broadcast %108 : vector<10x1xf32> to vector<10x10xf32>
    %110 = arith.mulf %105, %109 : vector<10x10xf32>
    %111 = arith.truncf %110 : vector<10x10xf32> to vector<10x10xbf16>
    %112 = arith.truncf %95 : vector<10x16xf32> to vector<10x16xbf16>
    %cst_35 = arith.constant dense<0.000000e+00> : vector<10x16xf32>
    %113 = tpu.matmul %111, %112, %cst_35 {dimension_numbers = #tpu.dot_dimension_numbers<[1], [0], [0], [1], [0, 0, 1, 1], [], []>} : vector<10x10xbf16>, vector<10x16xbf16>, vector<10x16xf32> -> vector<10x16xf32>
    %114 = tpu.concatenate %92, %113 in 1 : vector<10x16xf32>, vector<10x16xf32> -> vector<10x32xf32>
    %115 = tpu.concatenate %70, %114 in 0 : vector<10x32xf32>, vector<10x32xf32> -> vector<20x32xf32>
    %116 = arith.truncf %115 : vector<20x32xf32> to vector<20x32xbf16>
    %cst_36 = arith.constant dense<0.000000e+00> : vector<20x32xf32>
    %117 = tpu.matmul %116, %22, %cst_36 {dimension_numbers = #tpu.dot_dimension_numbers<[1], [0], [0], [1], [0, 0, 1, 1], [], []>} : vector<20x32xbf16>, vector<32x32xbf16>, vector<20x32xf32> -> vector<20x32xf32>
    %118 = vector.broadcast %12 : vector<1x32xf32> to vector<20x32xf32>
    %119 = arith.addf %117, %118 : vector<20x32xf32>
    %120 = arith.addf %0, %119 : vector<20x32xf32>
    %cst_37 = arith.constant dense<0.000000e+00> : vector<20xf32>
    %121 = vector.multi_reduction <add>, %120, %cst_37 [1] : vector<20x32xf32> to vector<20xf32>
    %122 = vector.shape_cast %121 : vector<20xf32> to vector<20x1xf32>
    %cst_38 = arith.constant 3.200000e+01 : f32
    %123 = vector.broadcast %cst_38 : f32 to vector<20x1xf32>
    %124 = arith.divf %122, %123 : vector<20x1xf32>
    %125 = vector.broadcast %124 : vector<20x1xf32> to vector<20x32xf32>
    %126 = arith.subf %120, %125 : vector<20x32xf32>
    %127 = arith.mulf %126, %126 : vector<20x32xf32>
    %cst_39 = arith.constant dense<0.000000e+00> : vector<20xf32>
    %128 = vector.multi_reduction <add>, %127, %cst_39 [1] : vector<20x32xf32> to vector<20xf32>
    %129 = vector.shape_cast %128 : vector<20xf32> to vector<20x1xf32>
    %cst_40 = arith.constant 3.200000e+01 : f32
    %130 = vector.broadcast %cst_40 : f32 to vector<20x1xf32>
    %131 = arith.divf %129, %130 : vector<20x1xf32>
    %cst_41 = arith.constant 9.99999974E-6 : f32
    %132 = vector.broadcast %cst_41 : f32 to vector<20x1xf32>
    %133 = arith.addf %131, %132 : vector<20x1xf32>
    %134 = math.rsqrt %133 : vector<20x1xf32>
    %135 = vector.broadcast %134 : vector<20x1xf32> to vector<20x32xf32>
    %136 = arith.mulf %126, %135 : vector<20x32xf32>
    %137 = vector.broadcast %13 : vector<1x32xf32> to vector<20x32xf32>
    %138 = arith.mulf %136, %137 : vector<20x32xf32>
    %139 = vector.broadcast %14 : vector<1x32xf32> to vector<20x32xf32>
    %140 = arith.addf %138, %139 : vector<20x32xf32>
    %c0_42 = arith.constant 0 : index
    %c0_43 = arith.constant 0 : index
    %c0_44 = arith.constant 0 : index
    %141 = vector.load %arg4[%c0_42, %c0_43, %c0_44] : memref<2x32x64xbf16, #tpu.memory_space<vmem>>, vector<1x32x64xbf16>
    %142 = vector.shape_cast %141 : vector<1x32x64xbf16> to vector<32x64xbf16>
    %c0_45 = arith.constant 0 : index
    %c0_46 = arith.constant 0 : index
    %c0_47 = arith.constant 0 : index
    %143 = vector.load %arg5[%c0_45, %c0_46, %c0_47] : memref<2x64x32xbf16, #tpu.memory_space<vmem>>, vector<1x64x32xbf16>
    %144 = vector.shape_cast %143 : vector<1x64x32xbf16> to vector<64x32xbf16>
    %145 = arith.truncf %140 : vector<20x32xf32> to vector<20x32xbf16>
    %cst_48 = arith.constant dense<0.000000e+00> : vector<20x64xf32>
    %146 = tpu.matmul %145, %142, %cst_48 {dimension_numbers = #tpu.dot_dimension_numbers<[1], [0], [0], [1], [0, 0, 1, 1], [], []>} : vector<20x32xbf16>, vector<32x64xbf16>, vector<20x64xf32> -> vector<20x64xf32>
    %147 = vector.broadcast %15 : vector<1x64xf32> to vector<20x64xf32>
    %148 = arith.addf %146, %147 : vector<20x64xf32>
    %cst_49 = arith.constant 0.000000e+00 : f32
    %149 = vector.broadcast %cst_49 : f32 to vector<20x64xf32>
    %150 = arith.maximumf %148, %149 : vector<20x64xf32>
    %151 = arith.truncf %150 : vector<20x64xf32> to vector<20x64xbf16>
    %cst_50 = arith.constant dense<0.000000e+00> : vector<20x32xf32>
    %152 = tpu.matmul %151, %144, %cst_50 {dimension_numbers = #tpu.dot_dimension_numbers<[1], [0], [0], [1], [0, 0, 1, 1], [], []>} : vector<20x64xbf16>, vector<64x32xbf16>, vector<20x32xf32> -> vector<20x32xf32>
    %153 = vector.broadcast %16 : vector<1x32xf32> to vector<20x32xf32>
    %154 = arith.addf %152, %153 : vector<20x32xf32>
    %155 = arith.addf %140, %154 : vector<20x32xf32>
    %cst_51 = arith.constant dense<0.000000e+00> : vector<20xf32>
    %156 = vector.multi_reduction <add>, %155, %cst_51 [1] : vector<20x32xf32> to vector<20xf32>
    %157 = vector.shape_cast %156 : vector<20xf32> to vector<20x1xf32>
    %cst_52 = arith.constant 3.200000e+01 : f32
    %158 = vector.broadcast %cst_52 : f32 to vector<20x1xf32>
    %159 = arith.divf %157, %158 : vector<20x1xf32>
    %160 = vector.broadcast %159 : vector<20x1xf32> to vector<20x32xf32>
    %161 = arith.subf %155, %160 : vector<20x32xf32>
    %162 = arith.mulf %161, %161 : vector<20x32xf32>
    %cst_53 = arith.constant dense<0.000000e+00> : vector<20xf32>
    %163 = vector.multi_reduction <add>, %162, %cst_53 [1] : vector<20x32xf32> to vector<20xf32>
    %164 = vector.shape_cast %163 : vector<20xf32> to vector<20x1xf32>
    %cst_54 = arith.constant 3.200000e+01 : f32
    %165 = vector.broadcast %cst_54 : f32 to vector<20x1xf32>
    %166 = arith.divf %164, %165 : vector<20x1xf32>
    %cst_55 = arith.constant 9.99999974E-6 : f32
    %167 = vector.broadcast %cst_55 : f32 to vector<20x1xf32>
    %168 = arith.addf %166, %167 : vector<20x1xf32>
    %169 = math.rsqrt %168 : vector<20x1xf32>
    %170 = vector.broadcast %169 : vector<20x1xf32> to vector<20x32xf32>
    %171 = arith.mulf %161, %170 : vector<20x32xf32>
    %172 = vector.broadcast %17 : vector<1x32xf32> to vector<20x32xf32>
    %173 = arith.mulf %171, %172 : vector<20x32xf32>
    %174 = vector.broadcast %18 : vector<1x32xf32> to vector<20x32xf32>
    %175 = arith.addf %173, %174 : vector<20x32xf32>
    %c1 = arith.constant 1 : index
    %c0_56 = arith.constant 0 : index
    %c0_57 = arith.constant 0 : index
    %176 = vector.load %arg6[%c1, %c0_56, %c0_57] : memref<2x8x96xf32, #tpu.memory_space<vmem>>, vector<1x8x96xf32>
    %177 = vector.shape_cast %176 : vector<1x8x96xf32> to vector<8x96xf32>
    %178 = vector.extract_strided_slice %177 {offsets = [0, 0], sizes = [1, 96], strides = [1, 1]} : vector<8x96xf32> to vector<1x96xf32>
    %179 = vector.extract_strided_slice %177 {offsets = [1, 0], sizes = [1, 32], strides = [1, 1]} : vector<8x96xf32> to vector<1x32xf32>
    %180 = vector.extract_strided_slice %177 {offsets = [2, 0], sizes = [1, 32], strides = [1, 1]} : vector<8x96xf32> to vector<1x32xf32>
    %181 = vector.extract_strided_slice %177 {offsets = [3, 0], sizes = [1, 32], strides = [1, 1]} : vector<8x96xf32> to vector<1x32xf32>
    %182 = vector.extract_strided_slice %177 {offsets = [4, 0], sizes = [1, 64], strides = [1, 1]} : vector<8x96xf32> to vector<1x64xf32>
    %183 = vector.extract_strided_slice %177 {offsets = [5, 0], sizes = [1, 32], strides = [1, 1]} : vector<8x96xf32> to vector<1x32xf32>
    %184 = vector.extract_strided_slice %177 {offsets = [6, 0], sizes = [1, 32], strides = [1, 1]} : vector<8x96xf32> to vector<1x32xf32>
    %185 = vector.extract_strided_slice %177 {offsets = [7, 0], sizes = [1, 32], strides = [1, 1]} : vector<8x96xf32> to vector<1x32xf32>
    %c1_58 = arith.constant 1 : index
    %c0_59 = arith.constant 0 : index
    %c0_60 = arith.constant 0 : index
    %186 = vector.load %arg2[%c1_58, %c0_59, %c0_60] : memref<2x32x96xbf16, #tpu.memory_space<vmem>>, vector<1x32x96xbf16>
    %187 = vector.shape_cast %186 : vector<1x32x96xbf16> to vector<32x96xbf16>
    %c1_61 = arith.constant 1 : index
    %c0_62 = arith.constant 0 : index
    %c0_63 = arith.constant 0 : index
    %188 = vector.load %arg3[%c1_61, %c0_62, %c0_63] : memref<2x32x32xbf16, #tpu.memory_space<vmem>>, vector<1x32x32xbf16>
    %189 = vector.shape_cast %188 : vector<1x32x32xbf16> to vector<32x32xbf16>
    %190 = arith.truncf %175 : vector<20x32xf32> to vector<20x32xbf16>
    %cst_64 = arith.constant dense<0.000000e+00> : vector<20x96xf32>
    %191 = tpu.matmul %190, %187, %cst_64 {dimension_numbers = #tpu.dot_dimension_numbers<[1], [0], [0], [1], [0, 0, 1, 1], [], []>} : vector<20x32xbf16>, vector<32x96xbf16>, vector<20x96xf32> -> vector<20x96xf32>
    %192 = vector.broadcast %178 : vector<1x96xf32> to vector<20x96xf32>
    %193 = arith.addf %191, %192 : vector<20x96xf32>
    %194 = vector.extract_strided_slice %193 {offsets = [0, 0], sizes = [10, 96], strides = [1, 1]} : vector<20x96xf32> to vector<10x96xf32>
    %195 = vector.extract_strided_slice %194 {offsets = [0, 0], sizes = [10, 16], strides = [1, 1]} : vector<10x96xf32> to vector<10x16xf32>
    %196 = vector.extract_strided_slice %194 {offsets = [0, 32], sizes = [10, 16], strides = [1, 1]} : vector<10x96xf32> to vector<10x16xf32>
    %197 = vector.extract_strided_slice %194 {offsets = [0, 64], sizes = [10, 16], strides = [1, 1]} : vector<10x96xf32> to vector<10x16xf32>
    %cst_65 = arith.constant 2.500000e-01 : f32
    %198 = vector.broadcast %cst_65 : f32 to vector<10x16xf32>
    %199 = arith.mulf %195, %198 : vector<10x16xf32>
    %200 = arith.truncf %199 : vector<10x16xf32> to vector<10x16xbf16>
    %201 = arith.truncf %196 : vector<10x16xf32> to vector<10x16xbf16>
    %cst_66 = arith.constant dense<0.000000e+00> : vector<10x10xf32>
    %202 = tpu.matmul %200, %201, %cst_66 {dimension_numbers = #tpu.dot_dimension_numbers<[1], [1], [0], [0], [0, 0, 1, 0], [], []>} : vector<10x16xbf16>, vector<10x16xbf16>, vector<10x10xf32> -> vector<10x10xf32>
    %cst_67 = arith.constant dense<0xFF800000> : vector<10xf32>
    %203 = vector.multi_reduction <maximumf>, %202, %cst_67 [1] : vector<10x10xf32> to vector<10xf32>
    %204 = vector.shape_cast %203 : vector<10xf32> to vector<10x1xf32>
    %205 = vector.broadcast %204 : vector<10x1xf32> to vector<10x10xf32>
    %206 = arith.subf %202, %205 : vector<10x10xf32>
    %207 = math.exp %206 : vector<10x10xf32>
    %cst_68 = arith.constant dense<0.000000e+00> : vector<10xf32>
    %208 = vector.multi_reduction <add>, %207, %cst_68 [1] : vector<10x10xf32> to vector<10xf32>
    %209 = vector.shape_cast %208 : vector<10xf32> to vector<10x1xf32>
    %210 = tpu.reciprocal %209 {approx = true} : vector<10x1xf32> -> vector<10x1xf32>
    %211 = vector.broadcast %210 : vector<10x1xf32> to vector<10x10xf32>
    %212 = arith.mulf %207, %211 : vector<10x10xf32>
    %213 = arith.truncf %212 : vector<10x10xf32> to vector<10x10xbf16>
    %214 = arith.truncf %197 : vector<10x16xf32> to vector<10x16xbf16>
    %cst_69 = arith.constant dense<0.000000e+00> : vector<10x16xf32>
    %215 = tpu.matmul %213, %214, %cst_69 {dimension_numbers = #tpu.dot_dimension_numbers<[1], [0], [0], [1], [0, 0, 1, 1], [], []>} : vector<10x10xbf16>, vector<10x16xbf16>, vector<10x16xf32> -> vector<10x16xf32>
    %216 = vector.extract_strided_slice %194 {offsets = [0, 16], sizes = [10, 16], strides = [1, 1]} : vector<10x96xf32> to vector<10x16xf32>
    %217 = vector.extract_strided_slice %194 {offsets = [0, 48], sizes = [10, 16], strides = [1, 1]} : vector<10x96xf32> to vector<10x16xf32>
    %218 = vector.extract_strided_slice %194 {offsets = [0, 80], sizes = [10, 16], strides = [1, 1]} : vector<10x96xf32> to vector<10x16xf32>
    %cst_70 = arith.constant 2.500000e-01 : f32
    %219 = vector.broadcast %cst_70 : f32 to vector<10x16xf32>
    %220 = arith.mulf %216, %219 : vector<10x16xf32>
    %221 = arith.truncf %220 : vector<10x16xf32> to vector<10x16xbf16>
    %222 = arith.truncf %217 : vector<10x16xf32> to vector<10x16xbf16>
    %cst_71 = arith.constant dense<0.000000e+00> : vector<10x10xf32>
    %223 = tpu.matmul %221, %222, %cst_71 {dimension_numbers = #tpu.dot_dimension_numbers<[1], [1], [0], [0], [0, 0, 1, 0], [], []>} : vector<10x16xbf16>, vector<10x16xbf16>, vector<10x10xf32> -> vector<10x10xf32>
    %cst_72 = arith.constant dense<0xFF800000> : vector<10xf32>
    %224 = vector.multi_reduction <maximumf>, %223, %cst_72 [1] : vector<10x10xf32> to vector<10xf32>
    %225 = vector.shape_cast %224 : vector<10xf32> to vector<10x1xf32>
    %226 = vector.broadcast %225 : vector<10x1xf32> to vector<10x10xf32>
    %227 = arith.subf %223, %226 : vector<10x10xf32>
    %228 = math.exp %227 : vector<10x10xf32>
    %cst_73 = arith.constant dense<0.000000e+00> : vector<10xf32>
    %229 = vector.multi_reduction <add>, %228, %cst_73 [1] : vector<10x10xf32> to vector<10xf32>
    %230 = vector.shape_cast %229 : vector<10xf32> to vector<10x1xf32>
    %231 = tpu.reciprocal %230 {approx = true} : vector<10x1xf32> -> vector<10x1xf32>
    %232 = vector.broadcast %231 : vector<10x1xf32> to vector<10x10xf32>
    %233 = arith.mulf %228, %232 : vector<10x10xf32>
    %234 = arith.truncf %233 : vector<10x10xf32> to vector<10x10xbf16>
    %235 = arith.truncf %218 : vector<10x16xf32> to vector<10x16xbf16>
    %cst_74 = arith.constant dense<0.000000e+00> : vector<10x16xf32>
    %236 = tpu.matmul %234, %235, %cst_74 {dimension_numbers = #tpu.dot_dimension_numbers<[1], [0], [0], [1], [0, 0, 1, 1], [], []>} : vector<10x10xbf16>, vector<10x16xbf16>, vector<10x16xf32> -> vector<10x16xf32>
    %237 = tpu.concatenate %215, %236 in 1 : vector<10x16xf32>, vector<10x16xf32> -> vector<10x32xf32>
    %238 = vector.extract_strided_slice %193 {offsets = [10, 0], sizes = [10, 96], strides = [1, 1]} : vector<20x96xf32> to vector<10x96xf32>
    %239 = vector.extract_strided_slice %238 {offsets = [0, 0], sizes = [10, 16], strides = [1, 1]} : vector<10x96xf32> to vector<10x16xf32>
    %240 = vector.extract_strided_slice %238 {offsets = [0, 32], sizes = [10, 16], strides = [1, 1]} : vector<10x96xf32> to vector<10x16xf32>
    %241 = vector.extract_strided_slice %238 {offsets = [0, 64], sizes = [10, 16], strides = [1, 1]} : vector<10x96xf32> to vector<10x16xf32>
    %cst_75 = arith.constant 2.500000e-01 : f32
    %242 = vector.broadcast %cst_75 : f32 to vector<10x16xf32>
    %243 = arith.mulf %239, %242 : vector<10x16xf32>
    %244 = arith.truncf %243 : vector<10x16xf32> to vector<10x16xbf16>
    %245 = arith.truncf %240 : vector<10x16xf32> to vector<10x16xbf16>
    %cst_76 = arith.constant dense<0.000000e+00> : vector<10x10xf32>
    %246 = tpu.matmul %244, %245, %cst_76 {dimension_numbers = #tpu.dot_dimension_numbers<[1], [1], [0], [0], [0, 0, 1, 0], [], []>} : vector<10x16xbf16>, vector<10x16xbf16>, vector<10x10xf32> -> vector<10x10xf32>
    %cst_77 = arith.constant dense<0xFF800000> : vector<10xf32>
    %247 = vector.multi_reduction <maximumf>, %246, %cst_77 [1] : vector<10x10xf32> to vector<10xf32>
    %248 = vector.shape_cast %247 : vector<10xf32> to vector<10x1xf32>
    %249 = vector.broadcast %248 : vector<10x1xf32> to vector<10x10xf32>
    %250 = arith.subf %246, %249 : vector<10x10xf32>
    %251 = math.exp %250 : vector<10x10xf32>
    %cst_78 = arith.constant dense<0.000000e+00> : vector<10xf32>
    %252 = vector.multi_reduction <add>, %251, %cst_78 [1] : vector<10x10xf32> to vector<10xf32>
    %253 = vector.shape_cast %252 : vector<10xf32> to vector<10x1xf32>
    %254 = tpu.reciprocal %253 {approx = true} : vector<10x1xf32> -> vector<10x1xf32>
    %255 = vector.broadcast %254 : vector<10x1xf32> to vector<10x10xf32>
    %256 = arith.mulf %251, %255 : vector<10x10xf32>
    %257 = arith.truncf %256 : vector<10x10xf32> to vector<10x10xbf16>
    %258 = arith.truncf %241 : vector<10x16xf32> to vector<10x16xbf16>
    %cst_79 = arith.constant dense<0.000000e+00> : vector<10x16xf32>
    %259 = tpu.matmul %257, %258, %cst_79 {dimension_numbers = #tpu.dot_dimension_numbers<[1], [0], [0], [1], [0, 0, 1, 1], [], []>} : vector<10x10xbf16>, vector<10x16xbf16>, vector<10x16xf32> -> vector<10x16xf32>
    %260 = vector.extract_strided_slice %238 {offsets = [0, 16], sizes = [10, 16], strides = [1, 1]} : vector<10x96xf32> to vector<10x16xf32>
    %261 = vector.extract_strided_slice %238 {offsets = [0, 48], sizes = [10, 16], strides = [1, 1]} : vector<10x96xf32> to vector<10x16xf32>
    %262 = vector.extract_strided_slice %238 {offsets = [0, 80], sizes = [10, 16], strides = [1, 1]} : vector<10x96xf32> to vector<10x16xf32>
    %cst_80 = arith.constant 2.500000e-01 : f32
    %263 = vector.broadcast %cst_80 : f32 to vector<10x16xf32>
    %264 = arith.mulf %260, %263 : vector<10x16xf32>
    %265 = arith.truncf %264 : vector<10x16xf32> to vector<10x16xbf16>
    %266 = arith.truncf %261 : vector<10x16xf32> to vector<10x16xbf16>
    %cst_81 = arith.constant dense<0.000000e+00> : vector<10x10xf32>
    %267 = tpu.matmul %265, %266, %cst_81 {dimension_numbers = #tpu.dot_dimension_numbers<[1], [1], [0], [0], [0, 0, 1, 0], [], []>} : vector<10x16xbf16>, vector<10x16xbf16>, vector<10x10xf32> -> vector<10x10xf32>
    %cst_82 = arith.constant dense<0xFF800000> : vector<10xf32>
    %268 = vector.multi_reduction <maximumf>, %267, %cst_82 [1] : vector<10x10xf32> to vector<10xf32>
    %269 = vector.shape_cast %268 : vector<10xf32> to vector<10x1xf32>
    %270 = vector.broadcast %269 : vector<10x1xf32> to vector<10x10xf32>
    %271 = arith.subf %267, %270 : vector<10x10xf32>
    %272 = math.exp %271 : vector<10x10xf32>
    %cst_83 = arith.constant dense<0.000000e+00> : vector<10xf32>
    %273 = vector.multi_reduction <add>, %272, %cst_83 [1] : vector<10x10xf32> to vector<10xf32>
    %274 = vector.shape_cast %273 : vector<10xf32> to vector<10x1xf32>
    %275 = tpu.reciprocal %274 {approx = true} : vector<10x1xf32> -> vector<10x1xf32>
    %276 = vector.broadcast %275 : vector<10x1xf32> to vector<10x10xf32>
    %277 = arith.mulf %272, %276 : vector<10x10xf32>
    %278 = arith.truncf %277 : vector<10x10xf32> to vector<10x10xbf16>
    %279 = arith.truncf %262 : vector<10x16xf32> to vector<10x16xbf16>
    %cst_84 = arith.constant dense<0.000000e+00> : vector<10x16xf32>
    %280 = tpu.matmul %278, %279, %cst_84 {dimension_numbers = #tpu.dot_dimension_numbers<[1], [0], [0], [1], [0, 0, 1, 1], [], []>} : vector<10x10xbf16>, vector<10x16xbf16>, vector<10x16xf32> -> vector<10x16xf32>
    %281 = tpu.concatenate %259, %280 in 1 : vector<10x16xf32>, vector<10x16xf32> -> vector<10x32xf32>
    %282 = tpu.concatenate %237, %281 in 0 : vector<10x32xf32>, vector<10x32xf32> -> vector<20x32xf32>
    %283 = arith.truncf %282 : vector<20x32xf32> to vector<20x32xbf16>
    %cst_85 = arith.constant dense<0.000000e+00> : vector<20x32xf32>
    %284 = tpu.matmul %283, %189, %cst_85 {dimension_numbers = #tpu.dot_dimension_numbers<[1], [0], [0], [1], [0, 0, 1, 1], [], []>} : vector<20x32xbf16>, vector<32x32xbf16>, vector<20x32xf32> -> vector<20x32xf32>
    %285 = vector.broadcast %179 : vector<1x32xf32> to vector<20x32xf32>
    %286 = arith.addf %284, %285 : vector<20x32xf32>
    %287 = arith.addf %175, %286 : vector<20x32xf32>
    %cst_86 = arith.constant dense<0.000000e+00> : vector<20xf32>
    %288 = vector.multi_reduction <add>, %287, %cst_86 [1] : vector<20x32xf32> to vector<20xf32>
    %289 = vector.shape_cast %288 : vector<20xf32> to vector<20x1xf32>
    %cst_87 = arith.constant 3.200000e+01 : f32
    %290 = vector.broadcast %cst_87 : f32 to vector<20x1xf32>
    %291 = arith.divf %289, %290 : vector<20x1xf32>
    %292 = vector.broadcast %291 : vector<20x1xf32> to vector<20x32xf32>
    %293 = arith.subf %287, %292 : vector<20x32xf32>
    %294 = arith.mulf %293, %293 : vector<20x32xf32>
    %cst_88 = arith.constant dense<0.000000e+00> : vector<20xf32>
    %295 = vector.multi_reduction <add>, %294, %cst_88 [1] : vector<20x32xf32> to vector<20xf32>
    %296 = vector.shape_cast %295 : vector<20xf32> to vector<20x1xf32>
    %cst_89 = arith.constant 3.200000e+01 : f32
    %297 = vector.broadcast %cst_89 : f32 to vector<20x1xf32>
    %298 = arith.divf %296, %297 : vector<20x1xf32>
    %cst_90 = arith.constant 9.99999974E-6 : f32
    %299 = vector.broadcast %cst_90 : f32 to vector<20x1xf32>
    %300 = arith.addf %298, %299 : vector<20x1xf32>
    %301 = math.rsqrt %300 : vector<20x1xf32>
    %302 = vector.broadcast %301 : vector<20x1xf32> to vector<20x32xf32>
    %303 = arith.mulf %293, %302 : vector<20x32xf32>
    %304 = vector.broadcast %180 : vector<1x32xf32> to vector<20x32xf32>
    %305 = arith.mulf %303, %304 : vector<20x32xf32>
    %306 = vector.broadcast %181 : vector<1x32xf32> to vector<20x32xf32>
    %307 = arith.addf %305, %306 : vector<20x32xf32>
    %c1_91 = arith.constant 1 : index
    %c0_92 = arith.constant 0 : index
    %c0_93 = arith.constant 0 : index
    %308 = vector.load %arg4[%c1_91, %c0_92, %c0_93] : memref<2x32x64xbf16, #tpu.memory_space<vmem>>, vector<1x32x64xbf16>
    %309 = vector.shape_cast %308 : vector<1x32x64xbf16> to vector<32x64xbf16>
    %c1_94 = arith.constant 1 : index
    %c0_95 = arith.constant 0 : index
    %c0_96 = arith.constant 0 : index
    %310 = vector.load %arg5[%c1_94, %c0_95, %c0_96] : memref<2x64x32xbf16, #tpu.memory_space<vmem>>, vector<1x64x32xbf16>
    %311 = vector.shape_cast %310 : vector<1x64x32xbf16> to vector<64x32xbf16>
    %312 = arith.truncf %307 : vector<20x32xf32> to vector<20x32xbf16>
    %cst_97 = arith.constant dense<0.000000e+00> : vector<20x64xf32>
    %313 = tpu.matmul %312, %309, %cst_97 {dimension_numbers = #tpu.dot_dimension_numbers<[1], [0], [0], [1], [0, 0, 1, 1], [], []>} : vector<20x32xbf16>, vector<32x64xbf16>, vector<20x64xf32> -> vector<20x64xf32>
    %314 = vector.broadcast %182 : vector<1x64xf32> to vector<20x64xf32>
    %315 = arith.addf %313, %314 : vector<20x64xf32>
    %cst_98 = arith.constant 0.000000e+00 : f32
    %316 = vector.broadcast %cst_98 : f32 to vector<20x64xf32>
    %317 = arith.maximumf %315, %316 : vector<20x64xf32>
    %318 = arith.truncf %317 : vector<20x64xf32> to vector<20x64xbf16>
    %cst_99 = arith.constant dense<0.000000e+00> : vector<20x32xf32>
    %319 = tpu.matmul %318, %311, %cst_99 {dimension_numbers = #tpu.dot_dimension_numbers<[1], [0], [0], [1], [0, 0, 1, 1], [], []>} : vector<20x64xbf16>, vector<64x32xbf16>, vector<20x32xf32> -> vector<20x32xf32>
    %320 = vector.broadcast %183 : vector<1x32xf32> to vector<20x32xf32>
    %321 = arith.addf %319, %320 : vector<20x32xf32>
    %322 = arith.addf %307, %321 : vector<20x32xf32>
    %cst_100 = arith.constant dense<0.000000e+00> : vector<20xf32>
    %323 = vector.multi_reduction <add>, %322, %cst_100 [1] : vector<20x32xf32> to vector<20xf32>
    %324 = vector.shape_cast %323 : vector<20xf32> to vector<20x1xf32>
    %cst_101 = arith.constant 3.200000e+01 : f32
    %325 = vector.broadcast %cst_101 : f32 to vector<20x1xf32>
    %326 = arith.divf %324, %325 : vector<20x1xf32>
    %327 = vector.broadcast %326 : vector<20x1xf32> to vector<20x32xf32>
    %328 = arith.subf %322, %327 : vector<20x32xf32>
    %329 = arith.mulf %328, %328 : vector<20x32xf32>
    %cst_102 = arith.constant dense<0.000000e+00> : vector<20xf32>
    %330 = vector.multi_reduction <add>, %329, %cst_102 [1] : vector<20x32xf32> to vector<20xf32>
    %331 = vector.shape_cast %330 : vector<20xf32> to vector<20x1xf32>
    %cst_103 = arith.constant 3.200000e+01 : f32
    %332 = vector.broadcast %cst_103 : f32 to vector<20x1xf32>
    %333 = arith.divf %331, %332 : vector<20x1xf32>
    %cst_104 = arith.constant 9.99999974E-6 : f32
    %334 = vector.broadcast %cst_104 : f32 to vector<20x1xf32>
    %335 = arith.addf %333, %334 : vector<20x1xf32>
    %336 = math.rsqrt %335 : vector<20x1xf32>
    %337 = vector.broadcast %336 : vector<20x1xf32> to vector<20x32xf32>
    %338 = arith.mulf %328, %337 : vector<20x32xf32>
    %339 = vector.broadcast %184 : vector<1x32xf32> to vector<20x32xf32>
    %340 = arith.mulf %338, %339 : vector<20x32xf32>
    %341 = vector.broadcast %185 : vector<1x32xf32> to vector<20x32xf32>
    %342 = arith.addf %340, %341 : vector<20x32xf32>
    %343 = vector.extract_strided_slice %2 {offsets = [0, 0], sizes = [1, 32], strides = [1, 1]} : vector<4x32xf32> to vector<1x32xf32>
    %344 = vector.extract_strided_slice %2 {offsets = [1, 0], sizes = [1, 32], strides = [1, 1]} : vector<4x32xf32> to vector<1x32xf32>
    %cst_105 = arith.constant dense<0.000000e+00> : vector<20xf32>
    %345 = vector.multi_reduction <add>, %342, %cst_105 [1] : vector<20x32xf32> to vector<20xf32>
    %346 = vector.shape_cast %345 : vector<20xf32> to vector<20x1xf32>
    %cst_106 = arith.constant 3.200000e+01 : f32
    %347 = vector.broadcast %cst_106 : f32 to vector<20x1xf32>
    %348 = arith.divf %346, %347 : vector<20x1xf32>
    %349 = vector.broadcast %348 : vector<20x1xf32> to vector<20x32xf32>
    %350 = arith.subf %342, %349 : vector<20x32xf32>
    %351 = arith.mulf %350, %350 : vector<20x32xf32>
    %cst_107 = arith.constant dense<0.000000e+00> : vector<20xf32>
    %352 = vector.multi_reduction <add>, %351, %cst_107 [1] : vector<20x32xf32> to vector<20xf32>
    %353 = vector.shape_cast %352 : vector<20xf32> to vector<20x1xf32>
    %cst_108 = arith.constant 3.200000e+01 : f32
    %354 = vector.broadcast %cst_108 : f32 to vector<20x1xf32>
    %355 = arith.divf %353, %354 : vector<20x1xf32>
    %cst_109 = arith.constant 9.99999974E-6 : f32
    %356 = vector.broadcast %cst_109 : f32 to vector<20x1xf32>
    %357 = arith.addf %355, %356 : vector<20x1xf32>
    %358 = math.rsqrt %357 : vector<20x1xf32>
    %359 = vector.broadcast %358 : vector<20x1xf32> to vector<20x32xf32>
    %360 = arith.mulf %350, %359 : vector<20x32xf32>
    %361 = vector.broadcast %343 : vector<1x32xf32> to vector<20x32xf32>
    %362 = arith.mulf %360, %361 : vector<20x32xf32>
    %363 = vector.broadcast %344 : vector<1x32xf32> to vector<20x32xf32>
    %364 = arith.addf %362, %363 : vector<20x32xf32>
    %c0_110 = arith.constant 0 : index
    %c0_111 = arith.constant 0 : index
    %c0_112 = arith.constant 0 : index
    %365 = vector.load %arg14[%c0_110, %c0_111, %c0_112] : memref<2x13x96xf32, #tpu.memory_space<vmem>>, vector<1x13x96xf32>
    %366 = vector.shape_cast %365 : vector<1x13x96xf32> to vector<13x96xf32>
    %367 = vector.extract_strided_slice %366 {offsets = [0, 0], sizes = [1, 96], strides = [1, 1]} : vector<13x96xf32> to vector<1x96xf32>
    %368 = vector.extract_strided_slice %366 {offsets = [1, 0], sizes = [1, 32], strides = [1, 1]} : vector<13x96xf32> to vector<1x32xf32>
    %369 = vector.extract_strided_slice %366 {offsets = [2, 0], sizes = [1, 32], strides = [1, 1]} : vector<13x96xf32> to vector<1x32xf32>
    %370 = vector.extract_strided_slice %366 {offsets = [3, 0], sizes = [1, 32], strides = [1, 1]} : vector<13x96xf32> to vector<1x32xf32>
    %371 = vector.extract_strided_slice %366 {offsets = [4, 0], sizes = [1, 32], strides = [1, 1]} : vector<13x96xf32> to vector<1x32xf32>
    %372 = vector.extract_strided_slice %366 {offsets = [5, 0], sizes = [1, 64], strides = [1, 1]} : vector<13x96xf32> to vector<1x64xf32>
    %373 = vector.extract_strided_slice %366 {offsets = [6, 0], sizes = [1, 32], strides = [1, 1]} : vector<13x96xf32> to vector<1x32xf32>
    %374 = vector.extract_strided_slice %366 {offsets = [7, 0], sizes = [1, 32], strides = [1, 1]} : vector<13x96xf32> to vector<1x32xf32>
    %375 = vector.extract_strided_slice %366 {offsets = [8, 0], sizes = [1, 32], strides = [1, 1]} : vector<13x96xf32> to vector<1x32xf32>
    %376 = vector.extract_strided_slice %366 {offsets = [9, 0], sizes = [1, 64], strides = [1, 1]} : vector<13x96xf32> to vector<1x64xf32>
    %377 = vector.extract_strided_slice %366 {offsets = [10, 0], sizes = [1, 32], strides = [1, 1]} : vector<13x96xf32> to vector<1x32xf32>
    %378 = vector.extract_strided_slice %366 {offsets = [11, 0], sizes = [1, 32], strides = [1, 1]} : vector<13x96xf32> to vector<1x32xf32>
    %379 = vector.extract_strided_slice %366 {offsets = [12, 0], sizes = [1, 32], strides = [1, 1]} : vector<13x96xf32> to vector<1x32xf32>
    %c0_113 = arith.constant 0 : index
    %c0_114 = arith.constant 0 : index
    %c0_115 = arith.constant 0 : index
    %380 = vector.load %arg7[%c0_113, %c0_114, %c0_115] : memref<2x32x96xbf16, #tpu.memory_space<vmem>>, vector<1x32x96xbf16>
    %381 = vector.shape_cast %380 : vector<1x32x96xbf16> to vector<32x96xbf16>
    %c0_116 = arith.constant 0 : index
    %c0_117 = arith.constant 0 : index
    %c0_118 = arith.constant 0 : index
    %382 = vector.load %arg8[%c0_116, %c0_117, %c0_118] : memref<2x32x32xbf16, #tpu.memory_space<vmem>>, vector<1x32x32xbf16>
    %383 = vector.shape_cast %382 : vector<1x32x32xbf16> to vector<32x32xbf16>
    %384 = arith.truncf %1 : vector<16x32xf32> to vector<16x32xbf16>
    %cst_119 = arith.constant dense<0.000000e+00> : vector<16x96xf32>
    %385 = tpu.matmul %384, %381, %cst_119 {dimension_numbers = #tpu.dot_dimension_numbers<[1], [0], [0], [1], [0, 0, 1, 1], [], []>} : vector<16x32xbf16>, vector<32x96xbf16>, vector<16x96xf32> -> vector<16x96xf32>
    %386 = vector.broadcast %367 : vector<1x96xf32> to vector<16x96xf32>
    %387 = arith.addf %385, %386 : vector<16x96xf32>
    %388 = vector.extract_strided_slice %387 {offsets = [0, 0], sizes = [8, 96], strides = [1, 1]} : vector<16x96xf32> to vector<8x96xf32>
    %389 = vector.extract_strided_slice %388 {offsets = [0, 0], sizes = [8, 16], strides = [1, 1]} : vector<8x96xf32> to vector<8x16xf32>
    %390 = vector.extract_strided_slice %388 {offsets = [0, 32], sizes = [8, 16], strides = [1, 1]} : vector<8x96xf32> to vector<8x16xf32>
    %391 = vector.extract_strided_slice %388 {offsets = [0, 64], sizes = [8, 16], strides = [1, 1]} : vector<8x96xf32> to vector<8x16xf32>
    %cst_120 = arith.constant 2.500000e-01 : f32
    %392 = vector.broadcast %cst_120 : f32 to vector<8x16xf32>
    %393 = arith.mulf %389, %392 : vector<8x16xf32>
    %394 = arith.truncf %393 : vector<8x16xf32> to vector<8x16xbf16>
    %395 = arith.truncf %390 : vector<8x16xf32> to vector<8x16xbf16>
    %cst_121 = arith.constant dense<0.000000e+00> : vector<8x8xf32>
    %396 = tpu.matmul %394, %395, %cst_121 {dimension_numbers = #tpu.dot_dimension_numbers<[1], [1], [0], [0], [0, 0, 1, 0], [], []>} : vector<8x16xbf16>, vector<8x16xbf16>, vector<8x8xf32> -> vector<8x8xf32>
    %397 = arith.addf %396, %8 : vector<8x8xf32>
    %cst_122 = arith.constant dense<0xFF800000> : vector<8xf32>
    %398 = vector.multi_reduction <maximumf>, %397, %cst_122 [1] : vector<8x8xf32> to vector<8xf32>
    %399 = vector.shape_cast %398 : vector<8xf32> to vector<8x1xf32>
    %400 = vector.broadcast %399 : vector<8x1xf32> to vector<8x8xf32>
    %401 = arith.subf %397, %400 : vector<8x8xf32>
    %402 = math.exp %401 : vector<8x8xf32>
    %cst_123 = arith.constant dense<0.000000e+00> : vector<8xf32>
    %403 = vector.multi_reduction <add>, %402, %cst_123 [1] : vector<8x8xf32> to vector<8xf32>
    %404 = vector.shape_cast %403 : vector<8xf32> to vector<8x1xf32>
    %405 = tpu.reciprocal %404 {approx = true} : vector<8x1xf32> -> vector<8x1xf32>
    %406 = vector.broadcast %405 : vector<8x1xf32> to vector<8x8xf32>
    %407 = arith.mulf %402, %406 : vector<8x8xf32>
    %408 = arith.truncf %407 : vector<8x8xf32> to vector<8x8xbf16>
    %409 = arith.truncf %391 : vector<8x16xf32> to vector<8x16xbf16>
    %cst_124 = arith.constant dense<0.000000e+00> : vector<8x16xf32>
    %410 = tpu.matmul %408, %409, %cst_124 {dimension_numbers = #tpu.dot_dimension_numbers<[1], [0], [0], [1], [0, 0, 1, 1], [], []>} : vector<8x8xbf16>, vector<8x16xbf16>, vector<8x16xf32> -> vector<8x16xf32>
    %411 = vector.extract_strided_slice %388 {offsets = [0, 16], sizes = [8, 16], strides = [1, 1]} : vector<8x96xf32> to vector<8x16xf32>
    %412 = vector.extract_strided_slice %388 {offsets = [0, 48], sizes = [8, 16], strides = [1, 1]} : vector<8x96xf32> to vector<8x16xf32>
    %413 = vector.extract_strided_slice %388 {offsets = [0, 80], sizes = [8, 16], strides = [1, 1]} : vector<8x96xf32> to vector<8x16xf32>
    %cst_125 = arith.constant 2.500000e-01 : f32
    %414 = vector.broadcast %cst_125 : f32 to vector<8x16xf32>
    %415 = arith.mulf %411, %414 : vector<8x16xf32>
    %416 = arith.truncf %415 : vector<8x16xf32> to vector<8x16xbf16>
    %417 = arith.truncf %412 : vector<8x16xf32> to vector<8x16xbf16>
    %cst_126 = arith.constant dense<0.000000e+00> : vector<8x8xf32>
    %418 = tpu.matmul %416, %417, %cst_126 {dimension_numbers = #tpu.dot_dimension_numbers<[1], [1], [0], [0], [0, 0, 1, 0], [], []>} : vector<8x16xbf16>, vector<8x16xbf16>, vector<8x8xf32> -> vector<8x8xf32>
    %419 = arith.addf %418, %8 : vector<8x8xf32>
    %cst_127 = arith.constant dense<0xFF800000> : vector<8xf32>
    %420 = vector.multi_reduction <maximumf>, %419, %cst_127 [1] : vector<8x8xf32> to vector<8xf32>
    %421 = vector.shape_cast %420 : vector<8xf32> to vector<8x1xf32>
    %422 = vector.broadcast %421 : vector<8x1xf32> to vector<8x8xf32>
    %423 = arith.subf %419, %422 : vector<8x8xf32>
    %424 = math.exp %423 : vector<8x8xf32>
    %cst_128 = arith.constant dense<0.000000e+00> : vector<8xf32>
    %425 = vector.multi_reduction <add>, %424, %cst_128 [1] : vector<8x8xf32> to vector<8xf32>
    %426 = vector.shape_cast %425 : vector<8xf32> to vector<8x1xf32>
    %427 = tpu.reciprocal %426 {approx = true} : vector<8x1xf32> -> vector<8x1xf32>
    %428 = vector.broadcast %427 : vector<8x1xf32> to vector<8x8xf32>
    %429 = arith.mulf %424, %428 : vector<8x8xf32>
    %430 = arith.truncf %429 : vector<8x8xf32> to vector<8x8xbf16>
    %431 = arith.truncf %413 : vector<8x16xf32> to vector<8x16xbf16>
    %cst_129 = arith.constant dense<0.000000e+00> : vector<8x16xf32>
    %432 = tpu.matmul %430, %431, %cst_129 {dimension_numbers = #tpu.dot_dimension_numbers<[1], [0], [0], [1], [0, 0, 1, 1], [], []>} : vector<8x8xbf16>, vector<8x16xbf16>, vector<8x16xf32> -> vector<8x16xf32>
    %433 = tpu.concatenate %410, %432 in 1 : vector<8x16xf32>, vector<8x16xf32> -> vector<8x32xf32>
    %434 = vector.extract_strided_slice %387 {offsets = [8, 0], sizes = [8, 96], strides = [1, 1]} : vector<16x96xf32> to vector<8x96xf32>
    %435 = vector.extract_strided_slice %434 {offsets = [0, 0], sizes = [8, 16], strides = [1, 1]} : vector<8x96xf32> to vector<8x16xf32>
    %436 = vector.extract_strided_slice %434 {offsets = [0, 32], sizes = [8, 16], strides = [1, 1]} : vector<8x96xf32> to vector<8x16xf32>
    %437 = vector.extract_strided_slice %434 {offsets = [0, 64], sizes = [8, 16], strides = [1, 1]} : vector<8x96xf32> to vector<8x16xf32>
    %cst_130 = arith.constant 2.500000e-01 : f32
    %438 = vector.broadcast %cst_130 : f32 to vector<8x16xf32>
    %439 = arith.mulf %435, %438 : vector<8x16xf32>
    %440 = arith.truncf %439 : vector<8x16xf32> to vector<8x16xbf16>
    %441 = arith.truncf %436 : vector<8x16xf32> to vector<8x16xbf16>
    %cst_131 = arith.constant dense<0.000000e+00> : vector<8x8xf32>
    %442 = tpu.matmul %440, %441, %cst_131 {dimension_numbers = #tpu.dot_dimension_numbers<[1], [1], [0], [0], [0, 0, 1, 0], [], []>} : vector<8x16xbf16>, vector<8x16xbf16>, vector<8x8xf32> -> vector<8x8xf32>
    %443 = arith.addf %442, %8 : vector<8x8xf32>
    %cst_132 = arith.constant dense<0xFF800000> : vector<8xf32>
    %444 = vector.multi_reduction <maximumf>, %443, %cst_132 [1] : vector<8x8xf32> to vector<8xf32>
    %445 = vector.shape_cast %444 : vector<8xf32> to vector<8x1xf32>
    %446 = vector.broadcast %445 : vector<8x1xf32> to vector<8x8xf32>
    %447 = arith.subf %443, %446 : vector<8x8xf32>
    %448 = math.exp %447 : vector<8x8xf32>
    %cst_133 = arith.constant dense<0.000000e+00> : vector<8xf32>
    %449 = vector.multi_reduction <add>, %448, %cst_133 [1] : vector<8x8xf32> to vector<8xf32>
    %450 = vector.shape_cast %449 : vector<8xf32> to vector<8x1xf32>
    %451 = tpu.reciprocal %450 {approx = true} : vector<8x1xf32> -> vector<8x1xf32>
    %452 = vector.broadcast %451 : vector<8x1xf32> to vector<8x8xf32>
    %453 = arith.mulf %448, %452 : vector<8x8xf32>
    %454 = arith.truncf %453 : vector<8x8xf32> to vector<8x8xbf16>
    %455 = arith.truncf %437 : vector<8x16xf32> to vector<8x16xbf16>
    %cst_134 = arith.constant dense<0.000000e+00> : vector<8x16xf32>
    %456 = tpu.matmul %454, %455, %cst_134 {dimension_numbers = #tpu.dot_dimension_numbers<[1], [0], [0], [1], [0, 0, 1, 1], [], []>} : vector<8x8xbf16>, vector<8x16xbf16>, vector<8x16xf32> -> vector<8x16xf32>
    %457 = vector.extract_strided_slice %434 {offsets = [0, 16], sizes = [8, 16], strides = [1, 1]} : vector<8x96xf32> to vector<8x16xf32>
    %458 = vector.extract_strided_slice %434 {offsets = [0, 48], sizes = [8, 16], strides = [1, 1]} : vector<8x96xf32> to vector<8x16xf32>
    %459 = vector.extract_strided_slice %434 {offsets = [0, 80], sizes = [8, 16], strides = [1, 1]} : vector<8x96xf32> to vector<8x16xf32>
    %cst_135 = arith.constant 2.500000e-01 : f32
    %460 = vector.broadcast %cst_135 : f32 to vector<8x16xf32>
    %461 = arith.mulf %457, %460 : vector<8x16xf32>
    %462 = arith.truncf %461 : vector<8x16xf32> to vector<8x16xbf16>
    %463 = arith.truncf %458 : vector<8x16xf32> to vector<8x16xbf16>
    %cst_136 = arith.constant dense<0.000000e+00> : vector<8x8xf32>
    %464 = tpu.matmul %462, %463, %cst_136 {dimension_numbers = #tpu.dot_dimension_numbers<[1], [1], [0], [0], [0, 0, 1, 0], [], []>} : vector<8x16xbf16>, vector<8x16xbf16>, vector<8x8xf32> -> vector<8x8xf32>
    %465 = arith.addf %464, %8 : vector<8x8xf32>
    %cst_137 = arith.constant dense<0xFF800000> : vector<8xf32>
    %466 = vector.multi_reduction <maximumf>, %465, %cst_137 [1] : vector<8x8xf32> to vector<8xf32>
    %467 = vector.shape_cast %466 : vector<8xf32> to vector<8x1xf32>
    %468 = vector.broadcast %467 : vector<8x1xf32> to vector<8x8xf32>
    %469 = arith.subf %465, %468 : vector<8x8xf32>
    %470 = math.exp %469 : vector<8x8xf32>
    %cst_138 = arith.constant dense<0.000000e+00> : vector<8xf32>
    %471 = vector.multi_reduction <add>, %470, %cst_138 [1] : vector<8x8xf32> to vector<8xf32>
    %472 = vector.shape_cast %471 : vector<8xf32> to vector<8x1xf32>
    %473 = tpu.reciprocal %472 {approx = true} : vector<8x1xf32> -> vector<8x1xf32>
    %474 = vector.broadcast %473 : vector<8x1xf32> to vector<8x8xf32>
    %475 = arith.mulf %470, %474 : vector<8x8xf32>
    %476 = arith.truncf %475 : vector<8x8xf32> to vector<8x8xbf16>
    %477 = arith.truncf %459 : vector<8x16xf32> to vector<8x16xbf16>
    %cst_139 = arith.constant dense<0.000000e+00> : vector<8x16xf32>
    %478 = tpu.matmul %476, %477, %cst_139 {dimension_numbers = #tpu.dot_dimension_numbers<[1], [0], [0], [1], [0, 0, 1, 1], [], []>} : vector<8x8xbf16>, vector<8x16xbf16>, vector<8x16xf32> -> vector<8x16xf32>
    %479 = tpu.concatenate %456, %478 in 1 : vector<8x16xf32>, vector<8x16xf32> -> vector<8x32xf32>
    %480 = tpu.concatenate %433, %479 in 0 : vector<8x32xf32>, vector<8x32xf32> -> vector<16x32xf32>
    %481 = arith.truncf %480 : vector<16x32xf32> to vector<16x32xbf16>
    %cst_140 = arith.constant dense<0.000000e+00> : vector<16x32xf32>
    %482 = tpu.matmul %481, %383, %cst_140 {dimension_numbers = #tpu.dot_dimension_numbers<[1], [0], [0], [1], [0, 0, 1, 1], [], []>} : vector<16x32xbf16>, vector<32x32xbf16>, vector<16x32xf32> -> vector<16x32xf32>
    %483 = vector.broadcast %368 : vector<1x32xf32> to vector<16x32xf32>
    %484 = arith.addf %482, %483 : vector<16x32xf32>
    %485 = arith.addf %1, %484 : vector<16x32xf32>
    %cst_141 = arith.constant dense<0.000000e+00> : vector<16xf32>
    %486 = vector.multi_reduction <add>, %485, %cst_141 [1] : vector<16x32xf32> to vector<16xf32>
    %487 = vector.shape_cast %486 : vector<16xf32> to vector<16x1xf32>
    %cst_142 = arith.constant 3.200000e+01 : f32
    %488 = vector.broadcast %cst_142 : f32 to vector<16x1xf32>
    %489 = arith.divf %487, %488 : vector<16x1xf32>
    %490 = vector.broadcast %489 : vector<16x1xf32> to vector<16x32xf32>
    %491 = arith.subf %485, %490 : vector<16x32xf32>
    %492 = arith.mulf %491, %491 : vector<16x32xf32>
    %cst_143 = arith.constant dense<0.000000e+00> : vector<16xf32>
    %493 = vector.multi_reduction <add>, %492, %cst_143 [1] : vector<16x32xf32> to vector<16xf32>
    %494 = vector.shape_cast %493 : vector<16xf32> to vector<16x1xf32>
    %cst_144 = arith.constant 3.200000e+01 : f32
    %495 = vector.broadcast %cst_144 : f32 to vector<16x1xf32>
    %496 = arith.divf %494, %495 : vector<16x1xf32>
    %cst_145 = arith.constant 9.99999974E-6 : f32
    %497 = vector.broadcast %cst_145 : f32 to vector<16x1xf32>
    %498 = arith.addf %496, %497 : vector<16x1xf32>
    %499 = math.rsqrt %498 : vector<16x1xf32>
    %500 = vector.broadcast %499 : vector<16x1xf32> to vector<16x32xf32>
    %501 = arith.mulf %491, %500 : vector<16x32xf32>
    %502 = vector.broadcast %369 : vector<1x32xf32> to vector<16x32xf32>
    %503 = arith.mulf %501, %502 : vector<16x32xf32>
    %504 = vector.broadcast %370 : vector<1x32xf32> to vector<16x32xf32>
    %505 = arith.addf %503, %504 : vector<16x32xf32>
    %c0_146 = arith.constant 0 : index
    %c0_147 = arith.constant 0 : index
    %c0_148 = arith.constant 0 : index
    %506 = vector.load %arg9[%c0_146, %c0_147, %c0_148] : memref<2x32x32xbf16, #tpu.memory_space<vmem>>, vector<1x32x32xbf16>
    %507 = vector.shape_cast %506 : vector<1x32x32xbf16> to vector<32x32xbf16>
    %c0_149 = arith.constant 0 : index
    %c0_150 = arith.constant 0 : index
    %c0_151 = arith.constant 0 : index
    %508 = vector.load %arg10[%c0_149, %c0_150, %c0_151] : memref<2x32x64xbf16, #tpu.memory_space<vmem>>, vector<1x32x64xbf16>
    %509 = vector.shape_cast %508 : vector<1x32x64xbf16> to vector<32x64xbf16>
    %c0_152 = arith.constant 0 : index
    %c0_153 = arith.constant 0 : index
    %c0_154 = arith.constant 0 : index
    %510 = vector.load %arg11[%c0_152, %c0_153, %c0_154] : memref<2x32x32xbf16, #tpu.memory_space<vmem>>, vector<1x32x32xbf16>
    %511 = vector.shape_cast %510 : vector<1x32x32xbf16> to vector<32x32xbf16>
    %512 = arith.truncf %505 : vector<16x32xf32> to vector<16x32xbf16>
    %cst_155 = arith.constant dense<0.000000e+00> : vector<16x32xf32>
    %513 = tpu.matmul %512, %507, %cst_155 {dimension_numbers = #tpu.dot_dimension_numbers<[1], [0], [0], [1], [0, 0, 1, 1], [], []>} : vector<16x32xbf16>, vector<32x32xbf16>, vector<16x32xf32> -> vector<16x32xf32>
    %514 = vector.broadcast %371 : vector<1x32xf32> to vector<16x32xf32>
    %515 = arith.addf %513, %514 : vector<16x32xf32>
    %516 = arith.truncf %364 : vector<20x32xf32> to vector<20x32xbf16>
    %cst_156 = arith.constant dense<0.000000e+00> : vector<20x64xf32>
    %517 = tpu.matmul %516, %509, %cst_156 {dimension_numbers = #tpu.dot_dimension_numbers<[1], [0], [0], [1], [0, 0, 1, 1], [], []>} : vector<20x32xbf16>, vector<32x64xbf16>, vector<20x64xf32> -> vector<20x64xf32>
    %518 = vector.broadcast %372 : vector<1x64xf32> to vector<20x64xf32>
    %519 = arith.addf %517, %518 : vector<20x64xf32>
    %520 = vector.extract_strided_slice %515 {offsets = [0, 0], sizes = [8, 32], strides = [1, 1]} : vector<16x32xf32> to vector<8x32xf32>
    %521 = vector.extract_strided_slice %519 {offsets = [0, 0], sizes = [10, 64], strides = [1, 1]} : vector<20x64xf32> to vector<10x64xf32>
    %522 = vector.extract_strided_slice %520 {offsets = [0, 0], sizes = [8, 16], strides = [1, 1]} : vector<8x32xf32> to vector<8x16xf32>
    %523 = vector.extract_strided_slice %521 {offsets = [0, 0], sizes = [10, 16], strides = [1, 1]} : vector<10x64xf32> to vector<10x16xf32>
    %524 = vector.extract_strided_slice %521 {offsets = [0, 32], sizes = [10, 16], strides = [1, 1]} : vector<10x64xf32> to vector<10x16xf32>
    %cst_157 = arith.constant 2.500000e-01 : f32
    %525 = vector.broadcast %cst_157 : f32 to vector<8x16xf32>
    %526 = arith.mulf %522, %525 : vector<8x16xf32>
    %527 = arith.truncf %526 : vector<8x16xf32> to vector<8x16xbf16>
    %528 = arith.truncf %523 : vector<10x16xf32> to vector<10x16xbf16>
    %cst_158 = arith.constant dense<0.000000e+00> : vector<8x10xf32>
    %529 = tpu.matmul %527, %528, %cst_158 {dimension_numbers = #tpu.dot_dimension_numbers<[1], [1], [0], [0], [0, 0, 1, 0], [], []>} : vector<8x16xbf16>, vector<10x16xbf16>, vector<8x10xf32> -> vector<8x10xf32>
    %cst_159 = arith.constant dense<0xFF800000> : vector<8xf32>
    %530 = vector.multi_reduction <maximumf>, %529, %cst_159 [1] : vector<8x10xf32> to vector<8xf32>
    %531 = vector.shape_cast %530 : vector<8xf32> to vector<8x1xf32>
    %532 = vector.broadcast %531 : vector<8x1xf32> to vector<8x10xf32>
    %533 = arith.subf %529, %532 : vector<8x10xf32>
    %534 = math.exp %533 : vector<8x10xf32>
    %cst_160 = arith.constant dense<0.000000e+00> : vector<8xf32>
    %535 = vector.multi_reduction <add>, %534, %cst_160 [1] : vector<8x10xf32> to vector<8xf32>
    %536 = vector.shape_cast %535 : vector<8xf32> to vector<8x1xf32>
    %537 = tpu.reciprocal %536 {approx = true} : vector<8x1xf32> -> vector<8x1xf32>
    %538 = vector.broadcast %537 : vector<8x1xf32> to vector<8x10xf32>
    %539 = arith.mulf %534, %538 : vector<8x10xf32>
    %540 = arith.truncf %539 : vector<8x10xf32> to vector<8x10xbf16>
    %541 = arith.truncf %524 : vector<10x16xf32> to vector<10x16xbf16>
    %cst_161 = arith.constant dense<0.000000e+00> : vector<8x16xf32>
    %542 = tpu.matmul %540, %541, %cst_161 {dimension_numbers = #tpu.dot_dimension_numbers<[1], [0], [0], [1], [0, 0, 1, 1], [], []>} : vector<8x10xbf16>, vector<10x16xbf16>, vector<8x16xf32> -> vector<8x16xf32>
    %543 = vector.extract_strided_slice %520 {offsets = [0, 16], sizes = [8, 16], strides = [1, 1]} : vector<8x32xf32> to vector<8x16xf32>
    %544 = vector.extract_strided_slice %521 {offsets = [0, 16], sizes = [10, 16], strides = [1, 1]} : vector<10x64xf32> to vector<10x16xf32>
    %545 = vector.extract_strided_slice %521 {offsets = [0, 48], sizes = [10, 16], strides = [1, 1]} : vector<10x64xf32> to vector<10x16xf32>
    %cst_162 = arith.constant 2.500000e-01 : f32
    %546 = vector.broadcast %cst_162 : f32 to vector<8x16xf32>
    %547 = arith.mulf %543, %546 : vector<8x16xf32>
    %548 = arith.truncf %547 : vector<8x16xf32> to vector<8x16xbf16>
    %549 = arith.truncf %544 : vector<10x16xf32> to vector<10x16xbf16>
    %cst_163 = arith.constant dense<0.000000e+00> : vector<8x10xf32>
    %550 = tpu.matmul %548, %549, %cst_163 {dimension_numbers = #tpu.dot_dimension_numbers<[1], [1], [0], [0], [0, 0, 1, 0], [], []>} : vector<8x16xbf16>, vector<10x16xbf16>, vector<8x10xf32> -> vector<8x10xf32>
    %cst_164 = arith.constant dense<0xFF800000> : vector<8xf32>
    %551 = vector.multi_reduction <maximumf>, %550, %cst_164 [1] : vector<8x10xf32> to vector<8xf32>
    %552 = vector.shape_cast %551 : vector<8xf32> to vector<8x1xf32>
    %553 = vector.broadcast %552 : vector<8x1xf32> to vector<8x10xf32>
    %554 = arith.subf %550, %553 : vector<8x10xf32>
    %555 = math.exp %554 : vector<8x10xf32>
    %cst_165 = arith.constant dense<0.000000e+00> : vector<8xf32>
    %556 = vector.multi_reduction <add>, %555, %cst_165 [1] : vector<8x10xf32> to vector<8xf32>
    %557 = vector.shape_cast %556 : vector<8xf32> to vector<8x1xf32>
    %558 = tpu.reciprocal %557 {approx = true} : vector<8x1xf32> -> vector<8x1xf32>
    %559 = vector.broadcast %558 : vector<8x1xf32> to vector<8x10xf32>
    %560 = arith.mulf %555, %559 : vector<8x10xf32>
    %561 = arith.truncf %560 : vector<8x10xf32> to vector<8x10xbf16>
    %562 = arith.truncf %545 : vector<10x16xf32> to vector<10x16xbf16>
    %cst_166 = arith.constant dense<0.000000e+00> : vector<8x16xf32>
    %563 = tpu.matmul %561, %562, %cst_166 {dimension_numbers = #tpu.dot_dimension_numbers<[1], [0], [0], [1], [0, 0, 1, 1], [], []>} : vector<8x10xbf16>, vector<10x16xbf16>, vector<8x16xf32> -> vector<8x16xf32>
    %564 = tpu.concatenate %542, %563 in 1 : vector<8x16xf32>, vector<8x16xf32> -> vector<8x32xf32>
    %565 = vector.extract_strided_slice %515 {offsets = [8, 0], sizes = [8, 32], strides = [1, 1]} : vector<16x32xf32> to vector<8x32xf32>
    %566 = vector.extract_strided_slice %519 {offsets = [10, 0], sizes = [10, 64], strides = [1, 1]} : vector<20x64xf32> to vector<10x64xf32>
    %567 = vector.extract_strided_slice %565 {offsets = [0, 0], sizes = [8, 16], strides = [1, 1]} : vector<8x32xf32> to vector<8x16xf32>
    %568 = vector.extract_strided_slice %566 {offsets = [0, 0], sizes = [10, 16], strides = [1, 1]} : vector<10x64xf32> to vector<10x16xf32>
    %569 = vector.extract_strided_slice %566 {offsets = [0, 32], sizes = [10, 16], strides = [1, 1]} : vector<10x64xf32> to vector<10x16xf32>
    %cst_167 = arith.constant 2.500000e-01 : f32
    %570 = vector.broadcast %cst_167 : f32 to vector<8x16xf32>
    %571 = arith.mulf %567, %570 : vector<8x16xf32>
    %572 = arith.truncf %571 : vector<8x16xf32> to vector<8x16xbf16>
    %573 = arith.truncf %568 : vector<10x16xf32> to vector<10x16xbf16>
    %cst_168 = arith.constant dense<0.000000e+00> : vector<8x10xf32>
    %574 = tpu.matmul %572, %573, %cst_168 {dimension_numbers = #tpu.dot_dimension_numbers<[1], [1], [0], [0], [0, 0, 1, 0], [], []>} : vector<8x16xbf16>, vector<10x16xbf16>, vector<8x10xf32> -> vector<8x10xf32>
    %cst_169 = arith.constant dense<0xFF800000> : vector<8xf32>
    %575 = vector.multi_reduction <maximumf>, %574, %cst_169 [1] : vector<8x10xf32> to vector<8xf32>
    %576 = vector.shape_cast %575 : vector<8xf32> to vector<8x1xf32>
    %577 = vector.broadcast %576 : vector<8x1xf32> to vector<8x10xf32>
    %578 = arith.subf %574, %577 : vector<8x10xf32>
    %579 = math.exp %578 : vector<8x10xf32>
    %cst_170 = arith.constant dense<0.000000e+00> : vector<8xf32>
    %580 = vector.multi_reduction <add>, %579, %cst_170 [1] : vector<8x10xf32> to vector<8xf32>
    %581 = vector.shape_cast %580 : vector<8xf32> to vector<8x1xf32>
    %582 = tpu.reciprocal %581 {approx = true} : vector<8x1xf32> -> vector<8x1xf32>
    %583 = vector.broadcast %582 : vector<8x1xf32> to vector<8x10xf32>
    %584 = arith.mulf %579, %583 : vector<8x10xf32>
    %585 = arith.truncf %584 : vector<8x10xf32> to vector<8x10xbf16>
    %586 = arith.truncf %569 : vector<10x16xf32> to vector<10x16xbf16>
    %cst_171 = arith.constant dense<0.000000e+00> : vector<8x16xf32>
    %587 = tpu.matmul %585, %586, %cst_171 {dimension_numbers = #tpu.dot_dimension_numbers<[1], [0], [0], [1], [0, 0, 1, 1], [], []>} : vector<8x10xbf16>, vector<10x16xbf16>, vector<8x16xf32> -> vector<8x16xf32>
    %588 = vector.extract_strided_slice %565 {offsets = [0, 16], sizes = [8, 16], strides = [1, 1]} : vector<8x32xf32> to vector<8x16xf32>
    %589 = vector.extract_strided_slice %566 {offsets = [0, 16], sizes = [10, 16], strides = [1, 1]} : vector<10x64xf32> to vector<10x16xf32>
    %590 = vector.extract_strided_slice %566 {offsets = [0, 48], sizes = [10, 16], strides = [1, 1]} : vector<10x64xf32> to vector<10x16xf32>
    %cst_172 = arith.constant 2.500000e-01 : f32
    %591 = vector.broadcast %cst_172 : f32 to vector<8x16xf32>
    %592 = arith.mulf %588, %591 : vector<8x16xf32>
    %593 = arith.truncf %592 : vector<8x16xf32> to vector<8x16xbf16>
    %594 = arith.truncf %589 : vector<10x16xf32> to vector<10x16xbf16>
    %cst_173 = arith.constant dense<0.000000e+00> : vector<8x10xf32>
    %595 = tpu.matmul %593, %594, %cst_173 {dimension_numbers = #tpu.dot_dimension_numbers<[1], [1], [0], [0], [0, 0, 1, 0], [], []>} : vector<8x16xbf16>, vector<10x16xbf16>, vector<8x10xf32> -> vector<8x10xf32>
    %cst_174 = arith.constant dense<0xFF800000> : vector<8xf32>
    %596 = vector.multi_reduction <maximumf>, %595, %cst_174 [1] : vector<8x10xf32> to vector<8xf32>
    %597 = vector.shape_cast %596 : vector<8xf32> to vector<8x1xf32>
    %598 = vector.broadcast %597 : vector<8x1xf32> to vector<8x10xf32>
    %599 = arith.subf %595, %598 : vector<8x10xf32>
    %600 = math.exp %599 : vector<8x10xf32>
    %cst_175 = arith.constant dense<0.000000e+00> : vector<8xf32>
    %601 = vector.multi_reduction <add>, %600, %cst_175 [1] : vector<8x10xf32> to vector<8xf32>
    %602 = vector.shape_cast %601 : vector<8xf32> to vector<8x1xf32>
    %603 = tpu.reciprocal %602 {approx = true} : vector<8x1xf32> -> vector<8x1xf32>
    %604 = vector.broadcast %603 : vector<8x1xf32> to vector<8x10xf32>
    %605 = arith.mulf %600, %604 : vector<8x10xf32>
    %606 = arith.truncf %605 : vector<8x10xf32> to vector<8x10xbf16>
    %607 = arith.truncf %590 : vector<10x16xf32> to vector<10x16xbf16>
    %cst_176 = arith.constant dense<0.000000e+00> : vector<8x16xf32>
    %608 = tpu.matmul %606, %607, %cst_176 {dimension_numbers = #tpu.dot_dimension_numbers<[1], [0], [0], [1], [0, 0, 1, 1], [], []>} : vector<8x10xbf16>, vector<10x16xbf16>, vector<8x16xf32> -> vector<8x16xf32>
    %609 = tpu.concatenate %587, %608 in 1 : vector<8x16xf32>, vector<8x16xf32> -> vector<8x32xf32>
    %610 = tpu.concatenate %564, %609 in 0 : vector<8x32xf32>, vector<8x32xf32> -> vector<16x32xf32>
    %611 = arith.truncf %610 : vector<16x32xf32> to vector<16x32xbf16>
    %cst_177 = arith.constant dense<0.000000e+00> : vector<16x32xf32>
    %612 = tpu.matmul %611, %511, %cst_177 {dimension_numbers = #tpu.dot_dimension_numbers<[1], [0], [0], [1], [0, 0, 1, 1], [], []>} : vector<16x32xbf16>, vector<32x32xbf16>, vector<16x32xf32> -> vector<16x32xf32>
    %613 = vector.broadcast %373 : vector<1x32xf32> to vector<16x32xf32>
    %614 = arith.addf %612, %613 : vector<16x32xf32>
    %615 = arith.addf %505, %614 : vector<16x32xf32>
    %cst_178 = arith.constant dense<0.000000e+00> : vector<16xf32>
    %616 = vector.multi_reduction <add>, %615, %cst_178 [1] : vector<16x32xf32> to vector<16xf32>
    %617 = vector.shape_cast %616 : vector<16xf32> to vector<16x1xf32>
    %cst_179 = arith.constant 3.200000e+01 : f32
    %618 = vector.broadcast %cst_179 : f32 to vector<16x1xf32>
    %619 = arith.divf %617, %618 : vector<16x1xf32>
    %620 = vector.broadcast %619 : vector<16x1xf32> to vector<16x32xf32>
    %621 = arith.subf %615, %620 : vector<16x32xf32>
    %622 = arith.mulf %621, %621 : vector<16x32xf32>
    %cst_180 = arith.constant dense<0.000000e+00> : vector<16xf32>
    %623 = vector.multi_reduction <add>, %622, %cst_180 [1] : vector<16x32xf32> to vector<16xf32>
    %624 = vector.shape_cast %623 : vector<16xf32> to vector<16x1xf32>
    %cst_181 = arith.constant 3.200000e+01 : f32
    %625 = vector.broadcast %cst_181 : f32 to vector<16x1xf32>
    %626 = arith.divf %624, %625 : vector<16x1xf32>
    %cst_182 = arith.constant 9.99999974E-6 : f32
    %627 = vector.broadcast %cst_182 : f32 to vector<16x1xf32>
    %628 = arith.addf %626, %627 : vector<16x1xf32>
    %629 = math.rsqrt %628 : vector<16x1xf32>
    %630 = vector.broadcast %629 : vector<16x1xf32> to vector<16x32xf32>
    %631 = arith.mulf %621, %630 : vector<16x32xf32>
    %632 = vector.broadcast %374 : vector<1x32xf32> to vector<16x32xf32>
    %633 = arith.mulf %631, %632 : vector<16x32xf32>
    %634 = vector.broadcast %375 : vector<1x32xf32> to vector<16x32xf32>
    %635 = arith.addf %633, %634 : vector<16x32xf32>
    %c0_183 = arith.constant 0 : index
    %c0_184 = arith.constant 0 : index
    %c0_185 = arith.constant 0 : index
    %636 = vector.load %arg12[%c0_183, %c0_184, %c0_185] : memref<2x32x64xbf16, #tpu.memory_space<vmem>>, vector<1x32x64xbf16>
    %637 = vector.shape_cast %636 : vector<1x32x64xbf16> to vector<32x64xbf16>
    %c0_186 = arith.constant 0 : index
    %c0_187 = arith.constant 0 : index
    %c0_188 = arith.constant 0 : index
    %638 = vector.load %arg13[%c0_186, %c0_187, %c0_188] : memref<2x64x32xbf16, #tpu.memory_space<vmem>>, vector<1x64x32xbf16>
    %639 = vector.shape_cast %638 : vector<1x64x32xbf16> to vector<64x32xbf16>
    %640 = arith.truncf %635 : vector<16x32xf32> to vector<16x32xbf16>
    %cst_189 = arith.constant dense<0.000000e+00> : vector<16x64xf32>
    %641 = tpu.matmul %640, %637, %cst_189 {dimension_numbers = #tpu.dot_dimension_numbers<[1], [0], [0], [1], [0, 0, 1, 1], [], []>} : vector<16x32xbf16>, vector<32x64xbf16>, vector<16x64xf32> -> vector<16x64xf32>
    %642 = vector.broadcast %376 : vector<1x64xf32> to vector<16x64xf32>
    %643 = arith.addf %641, %642 : vector<16x64xf32>
    %cst_190 = arith.constant 0.000000e+00 : f32
    %644 = vector.broadcast %cst_190 : f32 to vector<16x64xf32>
    %645 = arith.maximumf %643, %644 : vector<16x64xf32>
    %646 = arith.truncf %645 : vector<16x64xf32> to vector<16x64xbf16>
    %cst_191 = arith.constant dense<0.000000e+00> : vector<16x32xf32>
    %647 = tpu.matmul %646, %639, %cst_191 {dimension_numbers = #tpu.dot_dimension_numbers<[1], [0], [0], [1], [0, 0, 1, 1], [], []>} : vector<16x64xbf16>, vector<64x32xbf16>, vector<16x32xf32> -> vector<16x32xf32>
    %648 = vector.broadcast %377 : vector<1x32xf32> to vector<16x32xf32>
    %649 = arith.addf %647, %648 : vector<16x32xf32>
    %650 = arith.addf %635, %649 : vector<16x32xf32>
    %cst_192 = arith.constant dense<0.000000e+00> : vector<16xf32>
    %651 = vector.multi_reduction <add>, %650, %cst_192 [1] : vector<16x32xf32> to vector<16xf32>
    %652 = vector.shape_cast %651 : vector<16xf32> to vector<16x1xf32>
    %cst_193 = arith.constant 3.200000e+01 : f32
    %653 = vector.broadcast %cst_193 : f32 to vector<16x1xf32>
    %654 = arith.divf %652, %653 : vector<16x1xf32>
    %655 = vector.broadcast %654 : vector<16x1xf32> to vector<16x32xf32>
    %656 = arith.subf %650, %655 : vector<16x32xf32>
    %657 = arith.mulf %656, %656 : vector<16x32xf32>
    %cst_194 = arith.constant dense<0.000000e+00> : vector<16xf32>
    %658 = vector.multi_reduction <add>, %657, %cst_194 [1] : vector<16x32xf32> to vector<16xf32>
    %659 = vector.shape_cast %658 : vector<16xf32> to vector<16x1xf32>
    %cst_195 = arith.constant 3.200000e+01 : f32
    %660 = vector.broadcast %cst_195 : f32 to vector<16x1xf32>
    %661 = arith.divf %659, %660 : vector<16x1xf32>
    %cst_196 = arith.constant 9.99999974E-6 : f32
    %662 = vector.broadcast %cst_196 : f32 to vector<16x1xf32>
    %663 = arith.addf %661, %662 : vector<16x1xf32>
    %664 = math.rsqrt %663 : vector<16x1xf32>
    %665 = vector.broadcast %664 : vector<16x1xf32> to vector<16x32xf32>
    %666 = arith.mulf %656, %665 : vector<16x32xf32>
    %667 = vector.broadcast %378 : vector<1x32xf32> to vector<16x32xf32>
    %668 = arith.mulf %666, %667 : vector<16x32xf32>
    %669 = vector.broadcast %379 : vector<1x32xf32> to vector<16x32xf32>
    %670 = arith.addf %668, %669 : vector<16x32xf32>
    %c1_197 = arith.constant 1 : index
    %c0_198 = arith.constant 0 : index
    %c0_199 = arith.constant 0 : index
    %671 = vector.load %arg14[%c1_197, %c0_198, %c0_199] : memref<2x13x96xf32, #tpu.memory_space<vmem>>, vector<1x13x96xf32>
    %672 = vector.shape_cast %671 : vector<1x13x96xf32> to vector<13x96xf32>
    %673 = vector.extract_strided_slice %672 {offsets = [0, 0], sizes = [1, 96], strides = [1, 1]} : vector<13x96xf32> to vector<1x96xf32>
    %674 = vector.extract_strided_slice %672 {offsets = [1, 0], sizes = [1, 32], strides = [1, 1]} : vector<13x96xf32> to vector<1x32xf32>
    %675 = vector.extract_strided_slice %672 {offsets = [2, 0], sizes = [1, 32], strides = [1, 1]} : vector<13x96xf32> to vector<1x32xf32>
    %676 = vector.extract_strided_slice %672 {offsets = [3, 0], sizes = [1, 32], strides = [1, 1]} : vector<13x96xf32> to vector<1x32xf32>
    %677 = vector.extract_strided_slice %672 {offsets = [4, 0], sizes = [1, 32], strides = [1, 1]} : vector<13x96xf32> to vector<1x32xf32>
    %678 = vector.extract_strided_slice %672 {offsets = [5, 0], sizes = [1, 64], strides = [1, 1]} : vector<13x96xf32> to vector<1x64xf32>
    %679 = vector.extract_strided_slice %672 {offsets = [6, 0], sizes = [1, 32], strides = [1, 1]} : vector<13x96xf32> to vector<1x32xf32>
    %680 = vector.extract_strided_slice %672 {offsets = [7, 0], sizes = [1, 32], strides = [1, 1]} : vector<13x96xf32> to vector<1x32xf32>
    %681 = vector.extract_strided_slice %672 {offsets = [8, 0], sizes = [1, 32], strides = [1, 1]} : vector<13x96xf32> to vector<1x32xf32>
    %682 = vector.extract_strided_slice %672 {offsets = [9, 0], sizes = [1, 64], strides = [1, 1]} : vector<13x96xf32> to vector<1x64xf32>
    %683 = vector.extract_strided_slice %672 {offsets = [10, 0], sizes = [1, 32], strides = [1, 1]} : vector<13x96xf32> to vector<1x32xf32>
    %684 = vector.extract_strided_slice %672 {offsets = [11, 0], sizes = [1, 32], strides = [1, 1]} : vector<13x96xf32> to vector<1x32xf32>
    %685 = vector.extract_strided_slice %672 {offsets = [12, 0], sizes = [1, 32], strides = [1, 1]} : vector<13x96xf32> to vector<1x32xf32>
    %c1_200 = arith.constant 1 : index
    %c0_201 = arith.constant 0 : index
    %c0_202 = arith.constant 0 : index
    %686 = vector.load %arg7[%c1_200, %c0_201, %c0_202] : memref<2x32x96xbf16, #tpu.memory_space<vmem>>, vector<1x32x96xbf16>
    %687 = vector.shape_cast %686 : vector<1x32x96xbf16> to vector<32x96xbf16>
    %c1_203 = arith.constant 1 : index
    %c0_204 = arith.constant 0 : index
    %c0_205 = arith.constant 0 : index
    %688 = vector.load %arg8[%c1_203, %c0_204, %c0_205] : memref<2x32x32xbf16, #tpu.memory_space<vmem>>, vector<1x32x32xbf16>
    %689 = vector.shape_cast %688 : vector<1x32x32xbf16> to vector<32x32xbf16>
    %690 = arith.truncf %670 : vector<16x32xf32> to vector<16x32xbf16>
    %cst_206 = arith.constant dense<0.000000e+00> : vector<16x96xf32>
    %691 = tpu.matmul %690, %687, %cst_206 {dimension_numbers = #tpu.dot_dimension_numbers<[1], [0], [0], [1], [0, 0, 1, 1], [], []>} : vector<16x32xbf16>, vector<32x96xbf16>, vector<16x96xf32> -> vector<16x96xf32>
    %692 = vector.broadcast %673 : vector<1x96xf32> to vector<16x96xf32>
    %693 = arith.addf %691, %692 : vector<16x96xf32>
    %694 = vector.extract_strided_slice %693 {offsets = [0, 0], sizes = [8, 96], strides = [1, 1]} : vector<16x96xf32> to vector<8x96xf32>
    %695 = vector.extract_strided_slice %694 {offsets = [0, 0], sizes = [8, 16], strides = [1, 1]} : vector<8x96xf32> to vector<8x16xf32>
    %696 = vector.extract_strided_slice %694 {offsets = [0, 32], sizes = [8, 16], strides = [1, 1]} : vector<8x96xf32> to vector<8x16xf32>
    %697 = vector.extract_strided_slice %694 {offsets = [0, 64], sizes = [8, 16], strides = [1, 1]} : vector<8x96xf32> to vector<8x16xf32>
    %cst_207 = arith.constant 2.500000e-01 : f32
    %698 = vector.broadcast %cst_207 : f32 to vector<8x16xf32>
    %699 = arith.mulf %695, %698 : vector<8x16xf32>
    %700 = arith.truncf %699 : vector<8x16xf32> to vector<8x16xbf16>
    %701 = arith.truncf %696 : vector<8x16xf32> to vector<8x16xbf16>
    %cst_208 = arith.constant dense<0.000000e+00> : vector<8x8xf32>
    %702 = tpu.matmul %700, %701, %cst_208 {dimension_numbers = #tpu.dot_dimension_numbers<[1], [1], [0], [0], [0, 0, 1, 0], [], []>} : vector<8x16xbf16>, vector<8x16xbf16>, vector<8x8xf32> -> vector<8x8xf32>
    %703 = arith.addf %702, %8 : vector<8x8xf32>
    %cst_209 = arith.constant dense<0xFF800000> : vector<8xf32>
    %704 = vector.multi_reduction <maximumf>, %703, %cst_209 [1] : vector<8x8xf32> to vector<8xf32>
    %705 = vector.shape_cast %704 : vector<8xf32> to vector<8x1xf32>
    %706 = vector.broadcast %705 : vector<8x1xf32> to vector<8x8xf32>
    %707 = arith.subf %703, %706 : vector<8x8xf32>
    %708 = math.exp %707 : vector<8x8xf32>
    %cst_210 = arith.constant dense<0.000000e+00> : vector<8xf32>
    %709 = vector.multi_reduction <add>, %708, %cst_210 [1] : vector<8x8xf32> to vector<8xf32>
    %710 = vector.shape_cast %709 : vector<8xf32> to vector<8x1xf32>
    %711 = tpu.reciprocal %710 {approx = true} : vector<8x1xf32> -> vector<8x1xf32>
    %712 = vector.broadcast %711 : vector<8x1xf32> to vector<8x8xf32>
    %713 = arith.mulf %708, %712 : vector<8x8xf32>
    %714 = arith.truncf %713 : vector<8x8xf32> to vector<8x8xbf16>
    %715 = arith.truncf %697 : vector<8x16xf32> to vector<8x16xbf16>
    %cst_211 = arith.constant dense<0.000000e+00> : vector<8x16xf32>
    %716 = tpu.matmul %714, %715, %cst_211 {dimension_numbers = #tpu.dot_dimension_numbers<[1], [0], [0], [1], [0, 0, 1, 1], [], []>} : vector<8x8xbf16>, vector<8x16xbf16>, vector<8x16xf32> -> vector<8x16xf32>
    %717 = vector.extract_strided_slice %694 {offsets = [0, 16], sizes = [8, 16], strides = [1, 1]} : vector<8x96xf32> to vector<8x16xf32>
    %718 = vector.extract_strided_slice %694 {offsets = [0, 48], sizes = [8, 16], strides = [1, 1]} : vector<8x96xf32> to vector<8x16xf32>
    %719 = vector.extract_strided_slice %694 {offsets = [0, 80], sizes = [8, 16], strides = [1, 1]} : vector<8x96xf32> to vector<8x16xf32>
    %cst_212 = arith.constant 2.500000e-01 : f32
    %720 = vector.broadcast %cst_212 : f32 to vector<8x16xf32>
    %721 = arith.mulf %717, %720 : vector<8x16xf32>
    %722 = arith.truncf %721 : vector<8x16xf32> to vector<8x16xbf16>
    %723 = arith.truncf %718 : vector<8x16xf32> to vector<8x16xbf16>
    %cst_213 = arith.constant dense<0.000000e+00> : vector<8x8xf32>
    %724 = tpu.matmul %722, %723, %cst_213 {dimension_numbers = #tpu.dot_dimension_numbers<[1], [1], [0], [0], [0, 0, 1, 0], [], []>} : vector<8x16xbf16>, vector<8x16xbf16>, vector<8x8xf32> -> vector<8x8xf32>
    %725 = arith.addf %724, %8 : vector<8x8xf32>
    %cst_214 = arith.constant dense<0xFF800000> : vector<8xf32>
    %726 = vector.multi_reduction <maximumf>, %725, %cst_214 [1] : vector<8x8xf32> to vector<8xf32>
    %727 = vector.shape_cast %726 : vector<8xf32> to vector<8x1xf32>
    %728 = vector.broadcast %727 : vector<8x1xf32> to vector<8x8xf32>
    %729 = arith.subf %725, %728 : vector<8x8xf32>
    %730 = math.exp %729 : vector<8x8xf32>
    %cst_215 = arith.constant dense<0.000000e+00> : vector<8xf32>
    %731 = vector.multi_reduction <add>, %730, %cst_215 [1] : vector<8x8xf32> to vector<8xf32>
    %732 = vector.shape_cast %731 : vector<8xf32> to vector<8x1xf32>
    %733 = tpu.reciprocal %732 {approx = true} : vector<8x1xf32> -> vector<8x1xf32>
    %734 = vector.broadcast %733 : vector<8x1xf32> to vector<8x8xf32>
    %735 = arith.mulf %730, %734 : vector<8x8xf32>
    %736 = arith.truncf %735 : vector<8x8xf32> to vector<8x8xbf16>
    %737 = arith.truncf %719 : vector<8x16xf32> to vector<8x16xbf16>
    %cst_216 = arith.constant dense<0.000000e+00> : vector<8x16xf32>
    %738 = tpu.matmul %736, %737, %cst_216 {dimension_numbers = #tpu.dot_dimension_numbers<[1], [0], [0], [1], [0, 0, 1, 1], [], []>} : vector<8x8xbf16>, vector<8x16xbf16>, vector<8x16xf32> -> vector<8x16xf32>
    %739 = tpu.concatenate %716, %738 in 1 : vector<8x16xf32>, vector<8x16xf32> -> vector<8x32xf32>
    %740 = vector.extract_strided_slice %693 {offsets = [8, 0], sizes = [8, 96], strides = [1, 1]} : vector<16x96xf32> to vector<8x96xf32>
    %741 = vector.extract_strided_slice %740 {offsets = [0, 0], sizes = [8, 16], strides = [1, 1]} : vector<8x96xf32> to vector<8x16xf32>
    %742 = vector.extract_strided_slice %740 {offsets = [0, 32], sizes = [8, 16], strides = [1, 1]} : vector<8x96xf32> to vector<8x16xf32>
    %743 = vector.extract_strided_slice %740 {offsets = [0, 64], sizes = [8, 16], strides = [1, 1]} : vector<8x96xf32> to vector<8x16xf32>
    %cst_217 = arith.constant 2.500000e-01 : f32
    %744 = vector.broadcast %cst_217 : f32 to vector<8x16xf32>
    %745 = arith.mulf %741, %744 : vector<8x16xf32>
    %746 = arith.truncf %745 : vector<8x16xf32> to vector<8x16xbf16>
    %747 = arith.truncf %742 : vector<8x16xf32> to vector<8x16xbf16>
    %cst_218 = arith.constant dense<0.000000e+00> : vector<8x8xf32>
    %748 = tpu.matmul %746, %747, %cst_218 {dimension_numbers = #tpu.dot_dimension_numbers<[1], [1], [0], [0], [0, 0, 1, 0], [], []>} : vector<8x16xbf16>, vector<8x16xbf16>, vector<8x8xf32> -> vector<8x8xf32>
    %749 = arith.addf %748, %8 : vector<8x8xf32>
    %cst_219 = arith.constant dense<0xFF800000> : vector<8xf32>
    %750 = vector.multi_reduction <maximumf>, %749, %cst_219 [1] : vector<8x8xf32> to vector<8xf32>
    %751 = vector.shape_cast %750 : vector<8xf32> to vector<8x1xf32>
    %752 = vector.broadcast %751 : vector<8x1xf32> to vector<8x8xf32>
    %753 = arith.subf %749, %752 : vector<8x8xf32>
    %754 = math.exp %753 : vector<8x8xf32>
    %cst_220 = arith.constant dense<0.000000e+00> : vector<8xf32>
    %755 = vector.multi_reduction <add>, %754, %cst_220 [1] : vector<8x8xf32> to vector<8xf32>
    %756 = vector.shape_cast %755 : vector<8xf32> to vector<8x1xf32>
    %757 = tpu.reciprocal %756 {approx = true} : vector<8x1xf32> -> vector<8x1xf32>
    %758 = vector.broadcast %757 : vector<8x1xf32> to vector<8x8xf32>
    %759 = arith.mulf %754, %758 : vector<8x8xf32>
    %760 = arith.truncf %759 : vector<8x8xf32> to vector<8x8xbf16>
    %761 = arith.truncf %743 : vector<8x16xf32> to vector<8x16xbf16>
    %cst_221 = arith.constant dense<0.000000e+00> : vector<8x16xf32>
    %762 = tpu.matmul %760, %761, %cst_221 {dimension_numbers = #tpu.dot_dimension_numbers<[1], [0], [0], [1], [0, 0, 1, 1], [], []>} : vector<8x8xbf16>, vector<8x16xbf16>, vector<8x16xf32> -> vector<8x16xf32>
    %763 = vector.extract_strided_slice %740 {offsets = [0, 16], sizes = [8, 16], strides = [1, 1]} : vector<8x96xf32> to vector<8x16xf32>
    %764 = vector.extract_strided_slice %740 {offsets = [0, 48], sizes = [8, 16], strides = [1, 1]} : vector<8x96xf32> to vector<8x16xf32>
    %765 = vector.extract_strided_slice %740 {offsets = [0, 80], sizes = [8, 16], strides = [1, 1]} : vector<8x96xf32> to vector<8x16xf32>
    %cst_222 = arith.constant 2.500000e-01 : f32
    %766 = vector.broadcast %cst_222 : f32 to vector<8x16xf32>
    %767 = arith.mulf %763, %766 : vector<8x16xf32>
    %768 = arith.truncf %767 : vector<8x16xf32> to vector<8x16xbf16>
    %769 = arith.truncf %764 : vector<8x16xf32> to vector<8x16xbf16>
    %cst_223 = arith.constant dense<0.000000e+00> : vector<8x8xf32>
    %770 = tpu.matmul %768, %769, %cst_223 {dimension_numbers = #tpu.dot_dimension_numbers<[1], [1], [0], [0], [0, 0, 1, 0], [], []>} : vector<8x16xbf16>, vector<8x16xbf16>, vector<8x8xf32> -> vector<8x8xf32>
    %771 = arith.addf %770, %8 : vector<8x8xf32>
    %cst_224 = arith.constant dense<0xFF800000> : vector<8xf32>
    %772 = vector.multi_reduction <maximumf>, %771, %cst_224 [1] : vector<8x8xf32> to vector<8xf32>
    %773 = vector.shape_cast %772 : vector<8xf32> to vector<8x1xf32>
    %774 = vector.broadcast %773 : vector<8x1xf32> to vector<8x8xf32>
    %775 = arith.subf %771, %774 : vector<8x8xf32>
    %776 = math.exp %775 : vector<8x8xf32>
    %cst_225 = arith.constant dense<0.000000e+00> : vector<8xf32>
    %777 = vector.multi_reduction <add>, %776, %cst_225 [1] : vector<8x8xf32> to vector<8xf32>
    %778 = vector.shape_cast %777 : vector<8xf32> to vector<8x1xf32>
    %779 = tpu.reciprocal %778 {approx = true} : vector<8x1xf32> -> vector<8x1xf32>
    %780 = vector.broadcast %779 : vector<8x1xf32> to vector<8x8xf32>
    %781 = arith.mulf %776, %780 : vector<8x8xf32>
    %782 = arith.truncf %781 : vector<8x8xf32> to vector<8x8xbf16>
    %783 = arith.truncf %765 : vector<8x16xf32> to vector<8x16xbf16>
    %cst_226 = arith.constant dense<0.000000e+00> : vector<8x16xf32>
    %784 = tpu.matmul %782, %783, %cst_226 {dimension_numbers = #tpu.dot_dimension_numbers<[1], [0], [0], [1], [0, 0, 1, 1], [], []>} : vector<8x8xbf16>, vector<8x16xbf16>, vector<8x16xf32> -> vector<8x16xf32>
    %785 = tpu.concatenate %762, %784 in 1 : vector<8x16xf32>, vector<8x16xf32> -> vector<8x32xf32>
    %786 = tpu.concatenate %739, %785 in 0 : vector<8x32xf32>, vector<8x32xf32> -> vector<16x32xf32>
    %787 = arith.truncf %786 : vector<16x32xf32> to vector<16x32xbf16>
    %cst_227 = arith.constant dense<0.000000e+00> : vector<16x32xf32>
    %788 = tpu.matmul %787, %689, %cst_227 {dimension_numbers = #tpu.dot_dimension_numbers<[1], [0], [0], [1], [0, 0, 1, 1], [], []>} : vector<16x32xbf16>, vector<32x32xbf16>, vector<16x32xf32> -> vector<16x32xf32>
    %789 = vector.broadcast %674 : vector<1x32xf32> to vector<16x32xf32>
    %790 = arith.addf %788, %789 : vector<16x32xf32>
    %791 = arith.addf %670, %790 : vector<16x32xf32>
    %cst_228 = arith.constant dense<0.000000e+00> : vector<16xf32>
    %792 = vector.multi_reduction <add>, %791, %cst_228 [1] : vector<16x32xf32> to vector<16xf32>
    %793 = vector.shape_cast %792 : vector<16xf32> to vector<16x1xf32>
    %cst_229 = arith.constant 3.200000e+01 : f32
    %794 = vector.broadcast %cst_229 : f32 to vector<16x1xf32>
    %795 = arith.divf %793, %794 : vector<16x1xf32>
    %796 = vector.broadcast %795 : vector<16x1xf32> to vector<16x32xf32>
    %797 = arith.subf %791, %796 : vector<16x32xf32>
    %798 = arith.mulf %797, %797 : vector<16x32xf32>
    %cst_230 = arith.constant dense<0.000000e+00> : vector<16xf32>
    %799 = vector.multi_reduction <add>, %798, %cst_230 [1] : vector<16x32xf32> to vector<16xf32>
    %800 = vector.shape_cast %799 : vector<16xf32> to vector<16x1xf32>
    %cst_231 = arith.constant 3.200000e+01 : f32
    %801 = vector.broadcast %cst_231 : f32 to vector<16x1xf32>
    %802 = arith.divf %800, %801 : vector<16x1xf32>
    %cst_232 = arith.constant 9.99999974E-6 : f32
    %803 = vector.broadcast %cst_232 : f32 to vector<16x1xf32>
    %804 = arith.addf %802, %803 : vector<16x1xf32>
    %805 = math.rsqrt %804 : vector<16x1xf32>
    %806 = vector.broadcast %805 : vector<16x1xf32> to vector<16x32xf32>
    %807 = arith.mulf %797, %806 : vector<16x32xf32>
    %808 = vector.broadcast %675 : vector<1x32xf32> to vector<16x32xf32>
    %809 = arith.mulf %807, %808 : vector<16x32xf32>
    %810 = vector.broadcast %676 : vector<1x32xf32> to vector<16x32xf32>
    %811 = arith.addf %809, %810 : vector<16x32xf32>
    %c1_233 = arith.constant 1 : index
    %c0_234 = arith.constant 0 : index
    %c0_235 = arith.constant 0 : index
    %812 = vector.load %arg9[%c1_233, %c0_234, %c0_235] : memref<2x32x32xbf16, #tpu.memory_space<vmem>>, vector<1x32x32xbf16>
    %813 = vector.shape_cast %812 : vector<1x32x32xbf16> to vector<32x32xbf16>
    %c1_236 = arith.constant 1 : index
    %c0_237 = arith.constant 0 : index
    %c0_238 = arith.constant 0 : index
    %814 = vector.load %arg10[%c1_236, %c0_237, %c0_238] : memref<2x32x64xbf16, #tpu.memory_space<vmem>>, vector<1x32x64xbf16>
    %815 = vector.shape_cast %814 : vector<1x32x64xbf16> to vector<32x64xbf16>
    %c1_239 = arith.constant 1 : index
    %c0_240 = arith.constant 0 : index
    %c0_241 = arith.constant 0 : index
    %816 = vector.load %arg11[%c1_239, %c0_240, %c0_241] : memref<2x32x32xbf16, #tpu.memory_space<vmem>>, vector<1x32x32xbf16>
    %817 = vector.shape_cast %816 : vector<1x32x32xbf16> to vector<32x32xbf16>
    %818 = arith.truncf %811 : vector<16x32xf32> to vector<16x32xbf16>
    %cst_242 = arith.constant dense<0.000000e+00> : vector<16x32xf32>
    %819 = tpu.matmul %818, %813, %cst_242 {dimension_numbers = #tpu.dot_dimension_numbers<[1], [0], [0], [1], [0, 0, 1, 1], [], []>} : vector<16x32xbf16>, vector<32x32xbf16>, vector<16x32xf32> -> vector<16x32xf32>
    %820 = vector.broadcast %677 : vector<1x32xf32> to vector<16x32xf32>
    %821 = arith.addf %819, %820 : vector<16x32xf32>
    %822 = arith.truncf %364 : vector<20x32xf32> to vector<20x32xbf16>
    %cst_243 = arith.constant dense<0.000000e+00> : vector<20x64xf32>
    %823 = tpu.matmul %822, %815, %cst_243 {dimension_numbers = #tpu.dot_dimension_numbers<[1], [0], [0], [1], [0, 0, 1, 1], [], []>} : vector<20x32xbf16>, vector<32x64xbf16>, vector<20x64xf32> -> vector<20x64xf32>
    %824 = vector.broadcast %678 : vector<1x64xf32> to vector<20x64xf32>
    %825 = arith.addf %823, %824 : vector<20x64xf32>
    %826 = vector.extract_strided_slice %821 {offsets = [0, 0], sizes = [8, 32], strides = [1, 1]} : vector<16x32xf32> to vector<8x32xf32>
    %827 = vector.extract_strided_slice %825 {offsets = [0, 0], sizes = [10, 64], strides = [1, 1]} : vector<20x64xf32> to vector<10x64xf32>
    %828 = vector.extract_strided_slice %826 {offsets = [0, 0], sizes = [8, 16], strides = [1, 1]} : vector<8x32xf32> to vector<8x16xf32>
    %829 = vector.extract_strided_slice %827 {offsets = [0, 0], sizes = [10, 16], strides = [1, 1]} : vector<10x64xf32> to vector<10x16xf32>
    %830 = vector.extract_strided_slice %827 {offsets = [0, 32], sizes = [10, 16], strides = [1, 1]} : vector<10x64xf32> to vector<10x16xf32>
    %cst_244 = arith.constant 2.500000e-01 : f32
    %831 = vector.broadcast %cst_244 : f32 to vector<8x16xf32>
    %832 = arith.mulf %828, %831 : vector<8x16xf32>
    %833 = arith.truncf %832 : vector<8x16xf32> to vector<8x16xbf16>
    %834 = arith.truncf %829 : vector<10x16xf32> to vector<10x16xbf16>
    %cst_245 = arith.constant dense<0.000000e+00> : vector<8x10xf32>
    %835 = tpu.matmul %833, %834, %cst_245 {dimension_numbers = #tpu.dot_dimension_numbers<[1], [1], [0], [0], [0, 0, 1, 0], [], []>} : vector<8x16xbf16>, vector<10x16xbf16>, vector<8x10xf32> -> vector<8x10xf32>
    %cst_246 = arith.constant dense<0xFF800000> : vector<8xf32>
    %836 = vector.multi_reduction <maximumf>, %835, %cst_246 [1] : vector<8x10xf32> to vector<8xf32>
    %837 = vector.shape_cast %836 : vector<8xf32> to vector<8x1xf32>
    %838 = vector.broadcast %837 : vector<8x1xf32> to vector<8x10xf32>
    %839 = arith.subf %835, %838 : vector<8x10xf32>
    %840 = math.exp %839 : vector<8x10xf32>
    %cst_247 = arith.constant dense<0.000000e+00> : vector<8xf32>
    %841 = vector.multi_reduction <add>, %840, %cst_247 [1] : vector<8x10xf32> to vector<8xf32>
    %842 = vector.shape_cast %841 : vector<8xf32> to vector<8x1xf32>
    %843 = tpu.reciprocal %842 {approx = true} : vector<8x1xf32> -> vector<8x1xf32>
    %844 = vector.broadcast %843 : vector<8x1xf32> to vector<8x10xf32>
    %845 = arith.mulf %840, %844 : vector<8x10xf32>
    %846 = arith.truncf %845 : vector<8x10xf32> to vector<8x10xbf16>
    %847 = arith.truncf %830 : vector<10x16xf32> to vector<10x16xbf16>
    %cst_248 = arith.constant dense<0.000000e+00> : vector<8x16xf32>
    %848 = tpu.matmul %846, %847, %cst_248 {dimension_numbers = #tpu.dot_dimension_numbers<[1], [0], [0], [1], [0, 0, 1, 1], [], []>} : vector<8x10xbf16>, vector<10x16xbf16>, vector<8x16xf32> -> vector<8x16xf32>
    %849 = vector.extract_strided_slice %826 {offsets = [0, 16], sizes = [8, 16], strides = [1, 1]} : vector<8x32xf32> to vector<8x16xf32>
    %850 = vector.extract_strided_slice %827 {offsets = [0, 16], sizes = [10, 16], strides = [1, 1]} : vector<10x64xf32> to vector<10x16xf32>
    %851 = vector.extract_strided_slice %827 {offsets = [0, 48], sizes = [10, 16], strides = [1, 1]} : vector<10x64xf32> to vector<10x16xf32>
    %cst_249 = arith.constant 2.500000e-01 : f32
    %852 = vector.broadcast %cst_249 : f32 to vector<8x16xf32>
    %853 = arith.mulf %849, %852 : vector<8x16xf32>
    %854 = arith.truncf %853 : vector<8x16xf32> to vector<8x16xbf16>
    %855 = arith.truncf %850 : vector<10x16xf32> to vector<10x16xbf16>
    %cst_250 = arith.constant dense<0.000000e+00> : vector<8x10xf32>
    %856 = tpu.matmul %854, %855, %cst_250 {dimension_numbers = #tpu.dot_dimension_numbers<[1], [1], [0], [0], [0, 0, 1, 0], [], []>} : vector<8x16xbf16>, vector<10x16xbf16>, vector<8x10xf32> -> vector<8x10xf32>
    %cst_251 = arith.constant dense<0xFF800000> : vector<8xf32>
    %857 = vector.multi_reduction <maximumf>, %856, %cst_251 [1] : vector<8x10xf32> to vector<8xf32>
    %858 = vector.shape_cast %857 : vector<8xf32> to vector<8x1xf32>
    %859 = vector.broadcast %858 : vector<8x1xf32> to vector<8x10xf32>
    %860 = arith.subf %856, %859 : vector<8x10xf32>
    %861 = math.exp %860 : vector<8x10xf32>
    %cst_252 = arith.constant dense<0.000000e+00> : vector<8xf32>
    %862 = vector.multi_reduction <add>, %861, %cst_252 [1] : vector<8x10xf32> to vector<8xf32>
    %863 = vector.shape_cast %862 : vector<8xf32> to vector<8x1xf32>
    %864 = tpu.reciprocal %863 {approx = true} : vector<8x1xf32> -> vector<8x1xf32>
    %865 = vector.broadcast %864 : vector<8x1xf32> to vector<8x10xf32>
    %866 = arith.mulf %861, %865 : vector<8x10xf32>
    %867 = arith.truncf %866 : vector<8x10xf32> to vector<8x10xbf16>
    %868 = arith.truncf %851 : vector<10x16xf32> to vector<10x16xbf16>
    %cst_253 = arith.constant dense<0.000000e+00> : vector<8x16xf32>
    %869 = tpu.matmul %867, %868, %cst_253 {dimension_numbers = #tpu.dot_dimension_numbers<[1], [0], [0], [1], [0, 0, 1, 1], [], []>} : vector<8x10xbf16>, vector<10x16xbf16>, vector<8x16xf32> -> vector<8x16xf32>
    %870 = tpu.concatenate %848, %869 in 1 : vector<8x16xf32>, vector<8x16xf32> -> vector<8x32xf32>
    %871 = vector.extract_strided_slice %821 {offsets = [8, 0], sizes = [8, 32], strides = [1, 1]} : vector<16x32xf32> to vector<8x32xf32>
    %872 = vector.extract_strided_slice %825 {offsets = [10, 0], sizes = [10, 64], strides = [1, 1]} : vector<20x64xf32> to vector<10x64xf32>
    %873 = vector.extract_strided_slice %871 {offsets = [0, 0], sizes = [8, 16], strides = [1, 1]} : vector<8x32xf32> to vector<8x16xf32>
    %874 = vector.extract_strided_slice %872 {offsets = [0, 0], sizes = [10, 16], strides = [1, 1]} : vector<10x64xf32> to vector<10x16xf32>
    %875 = vector.extract_strided_slice %872 {offsets = [0, 32], sizes = [10, 16], strides = [1, 1]} : vector<10x64xf32> to vector<10x16xf32>
    %cst_254 = arith.constant 2.500000e-01 : f32
    %876 = vector.broadcast %cst_254 : f32 to vector<8x16xf32>
    %877 = arith.mulf %873, %876 : vector<8x16xf32>
    %878 = arith.truncf %877 : vector<8x16xf32> to vector<8x16xbf16>
    %879 = arith.truncf %874 : vector<10x16xf32> to vector<10x16xbf16>
    %cst_255 = arith.constant dense<0.000000e+00> : vector<8x10xf32>
    %880 = tpu.matmul %878, %879, %cst_255 {dimension_numbers = #tpu.dot_dimension_numbers<[1], [1], [0], [0], [0, 0, 1, 0], [], []>} : vector<8x16xbf16>, vector<10x16xbf16>, vector<8x10xf32> -> vector<8x10xf32>
    %cst_256 = arith.constant dense<0xFF800000> : vector<8xf32>
    %881 = vector.multi_reduction <maximumf>, %880, %cst_256 [1] : vector<8x10xf32> to vector<8xf32>
    %882 = vector.shape_cast %881 : vector<8xf32> to vector<8x1xf32>
    %883 = vector.broadcast %882 : vector<8x1xf32> to vector<8x10xf32>
    %884 = arith.subf %880, %883 : vector<8x10xf32>
    %885 = math.exp %884 : vector<8x10xf32>
    %cst_257 = arith.constant dense<0.000000e+00> : vector<8xf32>
    %886 = vector.multi_reduction <add>, %885, %cst_257 [1] : vector<8x10xf32> to vector<8xf32>
    %887 = vector.shape_cast %886 : vector<8xf32> to vector<8x1xf32>
    %888 = tpu.reciprocal %887 {approx = true} : vector<8x1xf32> -> vector<8x1xf32>
    %889 = vector.broadcast %888 : vector<8x1xf32> to vector<8x10xf32>
    %890 = arith.mulf %885, %889 : vector<8x10xf32>
    %891 = arith.truncf %890 : vector<8x10xf32> to vector<8x10xbf16>
    %892 = arith.truncf %875 : vector<10x16xf32> to vector<10x16xbf16>
    %cst_258 = arith.constant dense<0.000000e+00> : vector<8x16xf32>
    %893 = tpu.matmul %891, %892, %cst_258 {dimension_numbers = #tpu.dot_dimension_numbers<[1], [0], [0], [1], [0, 0, 1, 1], [], []>} : vector<8x10xbf16>, vector<10x16xbf16>, vector<8x16xf32> -> vector<8x16xf32>
    %894 = vector.extract_strided_slice %871 {offsets = [0, 16], sizes = [8, 16], strides = [1, 1]} : vector<8x32xf32> to vector<8x16xf32>
    %895 = vector.extract_strided_slice %872 {offsets = [0, 16], sizes = [10, 16], strides = [1, 1]} : vector<10x64xf32> to vector<10x16xf32>
    %896 = vector.extract_strided_slice %872 {offsets = [0, 48], sizes = [10, 16], strides = [1, 1]} : vector<10x64xf32> to vector<10x16xf32>
    %cst_259 = arith.constant 2.500000e-01 : f32
    %897 = vector.broadcast %cst_259 : f32 to vector<8x16xf32>
    %898 = arith.mulf %894, %897 : vector<8x16xf32>
    %899 = arith.truncf %898 : vector<8x16xf32> to vector<8x16xbf16>
    %900 = arith.truncf %895 : vector<10x16xf32> to vector<10x16xbf16>
    %cst_260 = arith.constant dense<0.000000e+00> : vector<8x10xf32>
    %901 = tpu.matmul %899, %900, %cst_260 {dimension_numbers = #tpu.dot_dimension_numbers<[1], [1], [0], [0], [0, 0, 1, 0], [], []>} : vector<8x16xbf16>, vector<10x16xbf16>, vector<8x10xf32> -> vector<8x10xf32>
    %cst_261 = arith.constant dense<0xFF800000> : vector<8xf32>
    %902 = vector.multi_reduction <maximumf>, %901, %cst_261 [1] : vector<8x10xf32> to vector<8xf32>
    %903 = vector.shape_cast %902 : vector<8xf32> to vector<8x1xf32>
    %904 = vector.broadcast %903 : vector<8x1xf32> to vector<8x10xf32>
    %905 = arith.subf %901, %904 : vector<8x10xf32>
    %906 = math.exp %905 : vector<8x10xf32>
    %cst_262 = arith.constant dense<0.000000e+00> : vector<8xf32>
    %907 = vector.multi_reduction <add>, %906, %cst_262 [1] : vector<8x10xf32> to vector<8xf32>
    %908 = vector.shape_cast %907 : vector<8xf32> to vector<8x1xf32>
    %909 = tpu.reciprocal %908 {approx = true} : vector<8x1xf32> -> vector<8x1xf32>
    %910 = vector.broadcast %909 : vector<8x1xf32> to vector<8x10xf32>
    %911 = arith.mulf %906, %910 : vector<8x10xf32>
    %912 = arith.truncf %911 : vector<8x10xf32> to vector<8x10xbf16>
    %913 = arith.truncf %896 : vector<10x16xf32> to vector<10x16xbf16>
    %cst_263 = arith.constant dense<0.000000e+00> : vector<8x16xf32>
    %914 = tpu.matmul %912, %913, %cst_263 {dimension_numbers = #tpu.dot_dimension_numbers<[1], [0], [0], [1], [0, 0, 1, 1], [], []>} : vector<8x10xbf16>, vector<10x16xbf16>, vector<8x16xf32> -> vector<8x16xf32>
    %915 = tpu.concatenate %893, %914 in 1 : vector<8x16xf32>, vector<8x16xf32> -> vector<8x32xf32>
    %916 = tpu.concatenate %870, %915 in 0 : vector<8x32xf32>, vector<8x32xf32> -> vector<16x32xf32>
    %917 = arith.truncf %916 : vector<16x32xf32> to vector<16x32xbf16>
    %cst_264 = arith.constant dense<0.000000e+00> : vector<16x32xf32>
    %918 = tpu.matmul %917, %817, %cst_264 {dimension_numbers = #tpu.dot_dimension_numbers<[1], [0], [0], [1], [0, 0, 1, 1], [], []>} : vector<16x32xbf16>, vector<32x32xbf16>, vector<16x32xf32> -> vector<16x32xf32>
    %919 = vector.broadcast %679 : vector<1x32xf32> to vector<16x32xf32>
    %920 = arith.addf %918, %919 : vector<16x32xf32>
    %921 = arith.addf %811, %920 : vector<16x32xf32>
    %cst_265 = arith.constant dense<0.000000e+00> : vector<16xf32>
    %922 = vector.multi_reduction <add>, %921, %cst_265 [1] : vector<16x32xf32> to vector<16xf32>
    %923 = vector.shape_cast %922 : vector<16xf32> to vector<16x1xf32>
    %cst_266 = arith.constant 3.200000e+01 : f32
    %924 = vector.broadcast %cst_266 : f32 to vector<16x1xf32>
    %925 = arith.divf %923, %924 : vector<16x1xf32>
    %926 = vector.broadcast %925 : vector<16x1xf32> to vector<16x32xf32>
    %927 = arith.subf %921, %926 : vector<16x32xf32>
    %928 = arith.mulf %927, %927 : vector<16x32xf32>
    %cst_267 = arith.constant dense<0.000000e+00> : vector<16xf32>
    %929 = vector.multi_reduction <add>, %928, %cst_267 [1] : vector<16x32xf32> to vector<16xf32>
    %930 = vector.shape_cast %929 : vector<16xf32> to vector<16x1xf32>
    %cst_268 = arith.constant 3.200000e+01 : f32
    %931 = vector.broadcast %cst_268 : f32 to vector<16x1xf32>
    %932 = arith.divf %930, %931 : vector<16x1xf32>
    %cst_269 = arith.constant 9.99999974E-6 : f32
    %933 = vector.broadcast %cst_269 : f32 to vector<16x1xf32>
    %934 = arith.addf %932, %933 : vector<16x1xf32>
    %935 = math.rsqrt %934 : vector<16x1xf32>
    %936 = vector.broadcast %935 : vector<16x1xf32> to vector<16x32xf32>
    %937 = arith.mulf %927, %936 : vector<16x32xf32>
    %938 = vector.broadcast %680 : vector<1x32xf32> to vector<16x32xf32>
    %939 = arith.mulf %937, %938 : vector<16x32xf32>
    %940 = vector.broadcast %681 : vector<1x32xf32> to vector<16x32xf32>
    %941 = arith.addf %939, %940 : vector<16x32xf32>
    %c1_270 = arith.constant 1 : index
    %c0_271 = arith.constant 0 : index
    %c0_272 = arith.constant 0 : index
    %942 = vector.load %arg12[%c1_270, %c0_271, %c0_272] : memref<2x32x64xbf16, #tpu.memory_space<vmem>>, vector<1x32x64xbf16>
    %943 = vector.shape_cast %942 : vector<1x32x64xbf16> to vector<32x64xbf16>
    %c1_273 = arith.constant 1 : index
    %c0_274 = arith.constant 0 : index
    %c0_275 = arith.constant 0 : index
    %944 = vector.load %arg13[%c1_273, %c0_274, %c0_275] : memref<2x64x32xbf16, #tpu.memory_space<vmem>>, vector<1x64x32xbf16>
    %945 = vector.shape_cast %944 : vector<1x64x32xbf16> to vector<64x32xbf16>
    %946 = arith.truncf %941 : vector<16x32xf32> to vector<16x32xbf16>
    %cst_276 = arith.constant dense<0.000000e+00> : vector<16x64xf32>
    %947 = tpu.matmul %946, %943, %cst_276 {dimension_numbers = #tpu.dot_dimension_numbers<[1], [0], [0], [1], [0, 0, 1, 1], [], []>} : vector<16x32xbf16>, vector<32x64xbf16>, vector<16x64xf32> -> vector<16x64xf32>
    %948 = vector.broadcast %682 : vector<1x64xf32> to vector<16x64xf32>
    %949 = arith.addf %947, %948 : vector<16x64xf32>
    %cst_277 = arith.constant 0.000000e+00 : f32
    %950 = vector.broadcast %cst_277 : f32 to vector<16x64xf32>
    %951 = arith.maximumf %949, %950 : vector<16x64xf32>
    %952 = arith.truncf %951 : vector<16x64xf32> to vector<16x64xbf16>
    %cst_278 = arith.constant dense<0.000000e+00> : vector<16x32xf32>
    %953 = tpu.matmul %952, %945, %cst_278 {dimension_numbers = #tpu.dot_dimension_numbers<[1], [0], [0], [1], [0, 0, 1, 1], [], []>} : vector<16x64xbf16>, vector<64x32xbf16>, vector<16x32xf32> -> vector<16x32xf32>
    %954 = vector.broadcast %683 : vector<1x32xf32> to vector<16x32xf32>
    %955 = arith.addf %953, %954 : vector<16x32xf32>
    %956 = arith.addf %941, %955 : vector<16x32xf32>
    %cst_279 = arith.constant dense<0.000000e+00> : vector<16xf32>
    %957 = vector.multi_reduction <add>, %956, %cst_279 [1] : vector<16x32xf32> to vector<16xf32>
    %958 = vector.shape_cast %957 : vector<16xf32> to vector<16x1xf32>
    %cst_280 = arith.constant 3.200000e+01 : f32
    %959 = vector.broadcast %cst_280 : f32 to vector<16x1xf32>
    %960 = arith.divf %958, %959 : vector<16x1xf32>
    %961 = vector.broadcast %960 : vector<16x1xf32> to vector<16x32xf32>
    %962 = arith.subf %956, %961 : vector<16x32xf32>
    %963 = arith.mulf %962, %962 : vector<16x32xf32>
    %cst_281 = arith.constant dense<0.000000e+00> : vector<16xf32>
    %964 = vector.multi_reduction <add>, %963, %cst_281 [1] : vector<16x32xf32> to vector<16xf32>
    %965 = vector.shape_cast %964 : vector<16xf32> to vector<16x1xf32>
    %cst_282 = arith.constant 3.200000e+01 : f32
    %966 = vector.broadcast %cst_282 : f32 to vector<16x1xf32>
    %967 = arith.divf %965, %966 : vector<16x1xf32>
    %cst_283 = arith.constant 9.99999974E-6 : f32
    %968 = vector.broadcast %cst_283 : f32 to vector<16x1xf32>
    %969 = arith.addf %967, %968 : vector<16x1xf32>
    %970 = math.rsqrt %969 : vector<16x1xf32>
    %971 = vector.broadcast %970 : vector<16x1xf32> to vector<16x32xf32>
    %972 = arith.mulf %962, %971 : vector<16x32xf32>
    %973 = vector.broadcast %684 : vector<1x32xf32> to vector<16x32xf32>
    %974 = arith.mulf %972, %973 : vector<16x32xf32>
    %975 = vector.broadcast %685 : vector<1x32xf32> to vector<16x32xf32>
    %976 = arith.addf %974, %975 : vector<16x32xf32>
    %977 = vector.extract_strided_slice %2 {offsets = [2, 0], sizes = [1, 32], strides = [1, 1]} : vector<4x32xf32> to vector<1x32xf32>
    %978 = vector.extract_strided_slice %2 {offsets = [3, 0], sizes = [1, 32], strides = [1, 1]} : vector<4x32xf32> to vector<1x32xf32>
    %cst_284 = arith.constant dense<0.000000e+00> : vector<16xf32>
    %979 = vector.multi_reduction <add>, %976, %cst_284 [1] : vector<16x32xf32> to vector<16xf32>
    %980 = vector.shape_cast %979 : vector<16xf32> to vector<16x1xf32>
    %cst_285 = arith.constant 3.200000e+01 : f32
    %981 = vector.broadcast %cst_285 : f32 to vector<16x1xf32>
    %982 = arith.divf %980, %981 : vector<16x1xf32>
    %983 = vector.broadcast %982 : vector<16x1xf32> to vector<16x32xf32>
    %984 = arith.subf %976, %983 : vector<16x32xf32>
    %985 = arith.mulf %984, %984 : vector<16x32xf32>
    %cst_286 = arith.constant dense<0.000000e+00> : vector<16xf32>
    %986 = vector.multi_reduction <add>, %985, %cst_286 [1] : vector<16x32xf32> to vector<16xf32>
    %987 = vector.shape_cast %986 : vector<16xf32> to vector<16x1xf32>
    %cst_287 = arith.constant 3.200000e+01 : f32
    %988 = vector.broadcast %cst_287 : f32 to vector<16x1xf32>
    %989 = arith.divf %987, %988 : vector<16x1xf32>
    %cst_288 = arith.constant 9.99999974E-6 : f32
    %990 = vector.broadcast %cst_288 : f32 to vector<16x1xf32>
    %991 = arith.addf %989, %990 : vector<16x1xf32>
    %992 = math.rsqrt %991 : vector<16x1xf32>
    %993 = vector.broadcast %992 : vector<16x1xf32> to vector<16x32xf32>
    %994 = arith.mulf %984, %993 : vector<16x32xf32>
    %995 = vector.broadcast %977 : vector<1x32xf32> to vector<16x32xf32>
    %996 = arith.mulf %994, %995 : vector<16x32xf32>
    %997 = vector.broadcast %978 : vector<1x32xf32> to vector<16x32xf32>
    %998 = arith.addf %996, %997 : vector<16x32xf32>
    %c0_289 = arith.constant 0 : index
    %c0_290 = arith.constant 0 : index
    %999 = vector.load %arg16[%c0_289, %c0_290] : memref<32x128xbf16, #tpu.memory_space<vmem>>, vector<32x128xbf16>
    %1000 = arith.truncf %998 : vector<16x32xf32> to vector<16x32xbf16>
    %cst_291 = arith.constant dense<0.000000e+00> : vector<16x128xf32>
    %1001 = tpu.matmul %1000, %999, %cst_291 {dimension_numbers = #tpu.dot_dimension_numbers<[1], [0], [0], [1], [0, 0, 1, 1], [], []>} : vector<16x32xbf16>, vector<32x128xbf16>, vector<16x128xf32> -> vector<16x128xf32>
    %c0_292 = arith.constant 0 : index
    %c0_293 = arith.constant 0 : index
    %1002 = vector.load %arg17[%c0_292, %c0_293] : memref<1x128xf32, #tpu.memory_space<vmem>>, vector<1x128xf32>
    %1003 = vector.broadcast %1002 : vector<1x128xf32> to vector<16x128xf32>
    %1004 = arith.addf %1001, %1003 : vector<16x128xf32>
    %1005 = vector.extract_strided_slice %1004 {offsets = [0, 0], sizes = [8, 128], strides = [1, 1]} : vector<16x128xf32> to vector<8x128xf32>
    %cst_294 = arith.constant dense<0xFF800000> : vector<128xf32>
    %1006 = vector.multi_reduction <maximumf>, %1005, %cst_294 [0] : vector<8x128xf32> to vector<128xf32>
    %1007 = vector.shape_cast %1006 : vector<128xf32> to vector<1x128xf32>
    %1008 = vector.broadcast %1007 : vector<1x128xf32> to vector<8x128xf32>
    %1009 = arith.subf %1005, %1008 : vector<8x128xf32>
    %1010 = math.exp %1009 : vector<8x128xf32>
    %cst_295 = arith.constant dense<0.000000e+00> : vector<128xf32>
    %1011 = vector.multi_reduction <add>, %1010, %cst_295 [0] : vector<8x128xf32> to vector<128xf32>
    %1012 = vector.shape_cast %1011 : vector<128xf32> to vector<1x128xf32>
    %1013 = vector.broadcast %1012 : vector<1x128xf32> to vector<8x128xf32>
    %1014 = arith.divf %1010, %1013 : vector<8x128xf32>
    %1015 = vector.extract_strided_slice %1004 {offsets = [8, 0], sizes = [8, 128], strides = [1, 1]} : vector<16x128xf32> to vector<8x128xf32>
    %cst_296 = arith.constant dense<0xFF800000> : vector<128xf32>
    %1016 = vector.multi_reduction <maximumf>, %1015, %cst_296 [0] : vector<8x128xf32> to vector<128xf32>
    %1017 = vector.shape_cast %1016 : vector<128xf32> to vector<1x128xf32>
    %1018 = vector.broadcast %1017 : vector<1x128xf32> to vector<8x128xf32>
    %1019 = arith.subf %1015, %1018 : vector<8x128xf32>
    %1020 = math.exp %1019 : vector<8x128xf32>
    %cst_297 = arith.constant dense<0.000000e+00> : vector<128xf32>
    %1021 = vector.multi_reduction <add>, %1020, %cst_297 [0] : vector<8x128xf32> to vector<128xf32>
    %1022 = vector.shape_cast %1021 : vector<128xf32> to vector<1x128xf32>
    %1023 = vector.broadcast %1022 : vector<1x128xf32> to vector<8x128xf32>
    %1024 = arith.divf %1020, %1023 : vector<8x128xf32>
    %1025 = tpu.concatenate %1014, %1024 in 0 : vector<8x128xf32>, vector<8x128xf32> -> vector<16x128xf32>
    %c0_298 = arith.constant 0 : index
    %c0_299 = arith.constant 0 : index
    %1026 = vector.load %arg18[%c0_298, %c0_299] : memref<16x128xf32, #tpu.memory_space<vmem>>, vector<16x128xf32>
    tpu.vector_store %arg18[%c0_298, %c0_299], %1025 {strides = array<i32>} : memref<16x128xf32, #tpu.memory_space<vmem>>, vector<16x128xf32>,
    return
  }
}

</mosaic_0001>

<bundles_post_ra>
// kernel: transformer_forward.1
= control target key start
LH: loop header
LB: loop body
LE: loop exit
PB: predicated region body
PF: predicated region fallthrough
CT: control target
= control target key end

     0   :  { %vm99_vm0 = vcmask 261120   ;;  %v66_v7 = vlaneseq  ;;  %v6408_v11 = vmov 0.0   ;;  %vm6409_vm1 = vmmov 0   ;;  %s6410_s27 = smov 96   ;;  %s6411_s28 = smov 112   ;;  %s7595_s2 = inlined_call_operand.vmem [shape: bf16[2,32,96], index: 2, kind: input, shape index: {}]   ;;  %s7596_s0 = inlined_call_operand.vmem [shape: f32[20,32], index: 0, kind: input, shape index: {}]   ;;  %s7597_s6 = inlined_call_operand.vmem [shape: f32[2,8,96], index: 6, kind: input, shape index: {}]   ;;  %s7598_s3 = inlined_call_operand.vmem [shape: bf16[2,32,32], index: 3, kind: input, shape index: {}]   ;;  %s7599_s4 = inlined_call_operand.vmem [shape: bf16[2,32,64], index: 4, kind: input, shape index: {}]   ;;  %s7600_s5 = inlined_call_operand.vmem [shape: bf16[2,64,32], index: 5, kind: input, shape index: {}]   ;;  %s7601_s7 = inlined_call_operand.vmem [shape: bf16[2,32,96], index: 7, kind: input, shape index: {}]   ;;  %s7602_s1 = inlined_call_operand.vmem [shape: f32[16,32], index: 1, kind: input, shape index: {}]   ;;  %s7603_s14 = inlined_call_operand.vmem [shape: f32[2,13,96], index: 14, kind: input, shape index: {}]   ;;  %s7604_s8 = inlined_call_operand.vmem [shape: bf16[2,32,32], index: 8, kind: input, shape index: {}]   ;;  %s7605_s10 = inlined_call_operand.vmem [shape: bf16[2,32,64], index: 10, kind: input, shape index: {}]   ;;  %s7606_s9 = inlined_call_operand.vmem [shape: bf16[2,32,32], index: 9, kind: input, shape index: {}]   ;;  %s7607_s15 = inlined_call_operand.vmem [shape: f32[4,32], index: 15, kind: input, shape index: {}]   ;;  %s7608_s11 = inlined_call_operand.vmem [shape: bf16[2,32,32], index: 11, kind: input, shape index: {}]   ;;  %s7609_s12 = inlined_call_operand.vmem [shape: bf16[2,32,64], index: 12, kind: input, shape index: {}]   ;;  %s7610_s13 = inlined_call_operand.vmem [shape: bf16[2,64,32], index: 13, kind: input, shape index: {}]   ;;  %s7611_s16 = inlined_call_operand.vmem [shape: bf16[32,128], index: 16, kind: input, shape index: {}]   ;;  %s7612_s17 = inlined_call_operand.vmem [shape: f32[1,128], index: 17, kind: input, shape index: {}]   ;;  %s7613_s18 = inlined_call_operand.vmem [shape: f32[16,128], index: 18, kind: output, shape index: {}]  }
   0x1   :  { %7619 = sst [smem:[#allocation2_spill]] %s7595_s2  ;;  %5629 = vmatprep.subr.bf16.mxu1 %v6408_v11  ;;  %5631 = vmatprep.mubr.msk.bf16.mxu1 %vm6409_vm1, %v6408_v11  ;;  %s6412_s30 = smov 80   ;;  %vm161_vm2 = vcmask 130048   ;;  %vm209_vm3 = vcmask 80896   ;;  %vm213_vm4 = vcmask 74752   ;;  %vm239_vm5 = vcmask 1044480  }
   0x2   :  { %7620 = sst [smem:[#allocation3_spill]] %s7596_s0  ;;  %s7622_s29 = sld [smem:[#allocation2_spill]]  ;;  %v6539_v8 = vshrl.u32 %v66_v7, 7  ;;  %vm681_vm6 = vcmask 1041408   ;;  %vm769_vm7 = vcmask 257024   ;;  %vm935_vm8 = vcmask 523264  }
   0x3   :  { %7621 = sst [smem:[#allocation4_spill]] %s7597_s6  ;;  %s7623_s20 = sld [smem:[#allocation3_spill]]  ;;  %vm2192_vm10 = vcmask 64512   ;;  %vm2210_vm11 = vcmask 1043456  }
   0x4   :  { %v6542_v9 = vsub.s32 0, %v6539_v8  ;;  %s7624_s26 = sld [smem:[#allocation4_spill]]  ;;  %s6413_s2 = smov 64  }
   0x5   :  { %s6414_s19 = smov 48   ;;  %s7617_s0 = smov 16  }
   0x6   :  { %s7625_s23 = smov 16  }
   0x8   :  { %v6157_v0 = vld [vmem:[%s7622_s29] sm:$0xff]   ;;  %v6158_v1 = vld [vmem:[%s7622_s29 + $0x8] sm:$0xff]  }
   0x9   :  { %5621 = vmatprep.subr.bf16.mxu0 %v6157_v0  ;;  %v6520_v2 = vld [vmem:[%s7623_s20] sm:$0xff]  ;;  %v6525_v3 = vld [vmem:[%s7623_s20 + $0x8] sm:$0xff]  ;;  %v6530_v4 = vld [vmem:[%s7623_s20 + $0x10] sm:$0xf] }
   0xa   :  { %5622 = vmatpush3.bf16.msra.mxu0 %v6157_v0  ;;  %v81_v5 = vpack.c.bf16 %v6525_v3, %v6520_v2  ;;  %v82_v6 = vpack.c.bf16 %v6530_v4, %v6530_v4  ;;  %v6547_v10 = vld [vmem:[%s7624_s26] sm:$0xff] }
   0xb   :  { %5623 = vmatprep.subr.bf16.mxu0 %v6158_v1  ;;  %v86_v12 = vrot.slane %v6547_v10, %v6542_v9 }
   0xc   :  { %5625 = vmatprep.mubr.msk.bf16.mxu0 %vm99_vm0, %v81_v5 }
   0xe   :  { %5624 = vmatpush3.bf16.msra.mxu0 %v6158_v1 }
   0xf   :  { %5635 = vmatprep.subr.bf16.mxu0 %v6408_v11 }
  0x11   :  { %5626 = vmatmul.mubr.msk.bf16.vlgmr.msra.gmra.mrb[0].mxu0 %vm99_vm0, %v82_v6 }
  0x12   :  { %5637 = vmatprep.mubr.msk.bf16.mxu0 %vm6409_vm1, %v6408_v11 }
  0xe4   :  { %v5627_v13 = vpop.f32.mrb[0].mxu0 }
  0xe5   :  { %v149_v14 = vadd.f32 %v5627_v13, %v86_v12  ;;  %v140_v15 = vpop.f32.mrb[1].mxu0 }
  0xe6   :  { %v141_v16 = vadd.f32 %v140_v15, %v86_v12  ;;  %v5628_v17 = vpop.f32.mrb[2].mxu0 }
  0xe7   :  { %v143_v18 = vpop.f32.mrb[3].mxu0  ;;  %v418_v20 = vmul.f32 0.25, %v149_v14 }
  0xe8   :  { %v144_v19 = vadd.f32 %v143_v18, %v86_v12  ;;  %v154_v21 = vmul.f32 0.25, %v141_v16 }
  0xea   :  { %v6557_v22 = vpack.c.bf16 %v144_v19, %v141_v16  ;;  %v420_v23 = vpack.c.bf16 %v149_v14, %v144_v19  ;;  %v155_v24 = vmul.f32 0.25, %v144_v19 }
  0xec   :  { %159 = vrot.lane.b32.xlu0 %v6557_v22, %s6410_s27  ;;  %v156_v25 = vpack.c.bf16 %v155_v24, %v154_v21  ;;  %v419_v26 = vpack.c.bf16 %v418_v20, %v155_v24  ;;  %v6562_v27 = vrot.slane %v420_v23, 1 }
  0xee   :  { %285 = vrot.lane.b32.xlu1 %v156_v25, %s6411_s28  ;;  %v422_v28 = vrot.slane %v419_v26, 1 }
  0xf0   :  { %287 = vrot.lane.b32.xlu0 %v6557_v22, %s6412_s30 }
  0xf2   :  { %425 = vrot.lane.b32.xlu1 %v6562_v27, %s6410_s27 }
  0xf4   :  { %548 = vrot.lane.b32.xlu0 %v6562_v27, %s6412_s30 }
  0xf6   :  { %546 = vrot.lane.b32.xlu1 %v422_v28, %s6411_s28 }
 0x15e   :  { %v160_v29 = vpop.permute.xlu0 %159 }
 0x15f   :  { %v166_v30 = vsel %vm161_vm2, %v160_v29, 0 }
 0x160   :  { %5630 = vmatpush3.bf16.xpose.msra.mxu1 %v166_v30  ;;  %v286_v32 = vpop.permute.xlu1 %285 }
 0x161   :  { %5641 = vmatprep.subr.bf16.mxu1 %v6408_v11 }
 0x162   :  { %v288_v31 = vpop.permute.xlu0 %287 }
 0x163   :  { %v293_v33 = vsel %vm161_vm2, %v288_v31, 0 }
 0x164   :  { %v426_v34 = vpop.permute.xlu1 %425 }
 0x165   :  { %v431_v35 = vsel %vm161_vm2, %v426_v34, 0 }
 0x166   :  { %v549_v36 = vpop.permute.xlu0 %548 }
 0x167   :  { %5632 = vmatmul.mubr.msk.bf16.vlgmr.msra.gmra.mrb[0].mxu1 %vm161_vm2, %v156_v25  ;;  %v554_v37 = vsel %vm161_vm2, %v549_v36, 0 }
 0x168   :  { %5642 = vmatpush3.bf16.xpose.msra.mxu1 %v293_v33  ;;  %5643 = vmatprep.mubr.msk.bf16.mxu1 %vm6409_vm1, %v6408_v11  ;;  %v547_v38 = vpop.permute.xlu1 %546 }
 0x169   :  { %5653 = vmatprep.subr.bf16.mxu1 %v6408_v11 }
 0x16f   :  { %5644 = vmatmul.mubr.msk.bf16.vlgmr.msra.gmra.mrb[4].mxu1 %vm161_vm2, %v286_v32 }
 0x170   :  { %5654 = vmatpush3.bf16.xpose.msra.mxu1 %v431_v35  ;;  %5655 = vmatprep.mubr.msk.bf16.mxu1 %vm6409_vm1, %v6408_v11 }
 0x171   :  { %5665 = vmatprep.subr.bf16.mxu1 %v6408_v11 }
 0x177   :  { %5656 = vmatmul.mubr.msk.bf16.vlgmr.msra.gmra.mrb[8].mxu1 %vm161_vm2, %v422_v28 }
 0x178   :  { %5666 = vmatpush3.bf16.xpose.msra.mxu1 %v554_v37  ;;  %5667 = vmatprep.mubr.msk.bf16.mxu1 %vm6409_vm1, %v6408_v11 }
 0x17f   :  { %5668 = vmatmul.mubr.msk.bf16.vlgmr.msra.gmra.mrb[12].mxu1 %vm161_vm2, %v547_v38 }
 0x23a   :  { %v202_v39 = vpop.f32.mrb[0].mxu1 }
 0x23b   :  { %v5633_v40 = vpop.f32.mrb[1].mxu1  ;;  %v210_v41 = vsel %vm209_vm3, %v202_v39, -inf }
 0x23c   :  { %211 = vmax.xlane.f32.xlu0 %v210_v41  ;;  %v205_v42 = vpop.f32.mrb[2].mxu1 }
 0x23d   :  { %v5634_v43 = vpop.f32.mrb[3].mxu1  ;;  %v214_v44 = vsel %vm213_vm4, %v205_v42, -inf }
 0x23e   :  { %215 = vmax.xlane.f32.xlu1 %v214_v44 }
 0x242   :  { %v329_v45 = vpop.f32.mrb[4].mxu1 }
 0x243   :  { %v5645_v46 = vpop.f32.mrb[5].mxu1  ;;  %v336_v47 = vsel %vm209_vm3, %v329_v45, -inf }
 0x244   :  { %337 = vmax.xlane.f32.xlu0 %v336_v47  ;;  %v332_v48 = vpop.f32.mrb[6].mxu1 }
 0x245   :  { %v5646_v49 = vpop.f32.mrb[7].mxu1  ;;  %v339_v50 = vsel %vm213_vm4, %v332_v48, -inf }
 0x248   :  { %340 = vmax.xlane.f32.xlu0 %v339_v50 }
 0x24a   :  { %v467_v51 = vpop.f32.mrb[8].mxu1 }
 0x24b   :  { %v5657_v52 = vpop.f32.mrb[9].mxu1  ;;  %v474_v53 = vsel %vm209_vm3, %v467_v51, -inf }
 0x24c   :  { %475 = vmax.xlane.f32.xlu1 %v474_v53  ;;  %v470_v54 = vpop.f32.mrb[10].mxu1 }
 0x24d   :  { %v5658_v55 = vpop.f32.mrb[11].mxu1  ;;  %v477_v56 = vsel %vm213_vm4, %v470_v54, -inf }
 0x24e   :  { %478 = vmax.xlane.f32.xlu0 %v477_v56 }
 0x252   :  { %v590_v57 = vpop.f32.mrb[12].mxu1 }
 0x253   :  { %v5669_v58 = vpop.f32.mrb[13].mxu1  ;;  %v597_v59 = vsel %vm209_vm3, %v590_v57, -inf }
 0x254   :  { %598 = vmax.xlane.f32.xlu1 %v597_v59  ;;  %v593_v60 = vpop.f32.mrb[14].mxu1 }
 0x255   :  { %v5670_v61 = vpop.f32.mrb[15].mxu1  ;;  %v600_v62 = vsel %vm213_vm4, %v593_v60, -inf }
 0x256   :  { %601 = vmax.xlane.f32.xlu0 %v600_v62 }
 0x265   :  { %234 = vrot.lane.b32.xlu1 %v6557_v22, %s6413_s2 }
 0x2c9   :  { %v212_v63 = vpop.xlane.xlu0 %211 }
 0x2ca   :  { %v217_v0 = vsub.f32 %v202_v39, %v212_v63 }
 0x2cb   :  { %v216_v1 = vpop.xlane.xlu1 %215 }
 0x2cc   :  { %v219_v5 = vmul.f32 1.442695, %v217_v0  ;;  %v218_v6 = vsub.f32 %v205_v42, %v216_v1 }
 0x2ce   :  { %6211 = vpow2.f32 %v219_v5  ;;  %v221_v12 = vmul.f32 1.442695, %v218_v6 }
 0x2d0   :  { %6213 = vpow2.f32 %v221_v12 }
 0x2d1   :  { %v338_v13 = vpop.xlane.xlu0 %337 }
 0x2d2   :  { %v342_v14 = vsub.f32 %v329_v45, %v338_v13 }
 0x2d4   :  { %v344_v15 = vmul.f32 1.442695, %v342_v14 }
 0x2d5   :  { %v341_v16 = vpop.xlane.xlu0 %340 }
 0x2d6   :  { %6215 = vpow2.f32 %v344_v15  ;;  %v343_v17 = vsub.f32 %v332_v48, %v341_v16 }
 0x2d8   :  { %v6212_v18 = vpop.eup %6211  ;;  %v346_v19 = vmul.f32 1.442695, %v343_v17 }
 0x2d9   :  { %v476_v20 = vpop.xlane.xlu1 %475  ;;  %v223_v21 = vsel %vm209_vm3, %v6212_v18, 0.0 }
 0x2da   :  { %v6214_v23 = vpop.eup %6213  ;;  %6217 = vpow2.f32 %v346_v19  ;;  %v480_v24 = vsub.f32 %v467_v51, %v476_v20  ;;  %224 = vadd.xlane.f32.xlu1 %v223_v21 }
 0x2db   :  { %v479_v25 = vpop.xlane.xlu0 %478  ;;  %v226_v26 = vsel %vm213_vm4, %v6214_v23, 0.0 }
 0x2dc   :  { %v482_v28 = vmul.f32 1.442695, %v480_v24  ;;  %v481_v29 = vsub.f32 %v470_v54, %v479_v25  ;;  %227 = vadd.xlane.f32.xlu0 %v226_v26 }
 0x2de   :  { %6219 = vpow2.f32 %v482_v28  ;;  %v484_v30 = vmul.f32 1.442695, %v481_v29 }
 0x2e0   :  { %v6216_v31 = vpop.eup %6215  ;;  %6221 = vpow2.f32 %v484_v30 }
 0x2e1   :  { %v599_v32 = vpop.xlane.xlu1 %598  ;;  %v348_v33 = vsel %vm209_vm3, %v6216_v31, 0.0 }
 0x2e2   :  { %v603_v34 = vsub.f32 %v590_v57, %v599_v32  ;;  %349 = vadd.xlane.f32.xlu1 %v348_v33 }
 0x2e3   :  { %v602_v35 = vpop.xlane.xlu0 %601 }
 0x2e4   :  { %v6218_v36 = vpop.eup %6217  ;;  %v605_v37 = vmul.f32 1.442695, %v603_v34  ;;  %v604_v38 = vsub.f32 %v593_v60, %v602_v35 }
 0x2e5   :  { %v235_v39 = vpop.permute.xlu1 %234  ;;  %v351_v40 = vsel %vm213_vm4, %v6218_v36, 0.0 }
 0x2e6   :  { %6223 = vpow2.f32 %v605_v37  ;;  %v607_v41 = vmul.f32 1.442695, %v604_v38  ;;  %v241_v42 = vsel %vm239_vm5, %v235_v39, 0  ;;  %352 = vadd.xlane.f32.xlu0 %v351_v40  ;;  %v6159_v39 = vld [vmem:[%s7598_s3] sm:$0xff]  }
 0x2e7   :  { %5636 = vmatpush3.bf16.msra.mxu0 %v241_v42  ;;  %5677 = vmatprep.subr.bf16.mxu1 %v6159_v39 }
 0x2e8   :  { %v6220_v43 = vpop.eup %6219  ;;  %6225 = vpow2.f32 %v607_v41  ;;  %5647 = vmatprep.subr.bf16.mxu0 %v6408_v11  ;;  %5678 = vmatpush3.bf16.msra.mxu1 %v6159_v39  ;;  %v6164_v39 = vld [vmem:[%s7600_s5 + $0x8] sm:$0xff]  }
 0x2e9   :  { %v486_v44 = vsel %vm209_vm3, %v6220_v43, 0.0 }
 0x2ea   :  { %v6222_v45 = vpop.eup %6221  ;;  %487 = vadd.xlane.f32.xlu1 %v486_v44 }
 0x2eb   :  { %v489_v46 = vsel %vm213_vm4, %v6222_v45, 0.0 }
 0x2ec   :  { %490 = vadd.xlane.f32.xlu0 %v489_v46 }
 0x2f0   :  { %v6224_v47 = vpop.eup %6223 }
 0x2f1   :  { %v609_v48 = vsel %vm209_vm3, %v6224_v47, 0.0 }
 0x2f2   :  { %v6226_v49 = vpop.eup %6225  ;;  %610 = vadd.xlane.f32.xlu1 %v609_v48 }
 0x2f3   :  { %v612_v50 = vsel %vm213_vm4, %v6226_v49, 0.0 }
 0x2f4   :  { %613 = vadd.xlane.f32.xlu0 %v612_v50 }
 0x303   :  { %497 = vrot.lane.b32.xlu1 %v6562_v27, %s6413_s2 }
 0x307   :  { %620 = vrot.lane.b32.xlu1 %v6562_v27, %s6414_s19 }
 0x30a   :  { %359 = vrot.lane.b32.xlu0 %v6557_v22, %s6414_s19 }
 0x367   :  { %v225_v51 = vpop.xlane.xlu1 %224 }
 0x368   :  { %6227 = vrcp.f32 %v225_v51 }
 0x369   :  { %v228_v52 = vpop.xlane.xlu0 %227 }
 0x36a   :  { %6229 = vrcp.f32 %v228_v52 }
 0x36f   :  { %v350_v58 = vpop.xlane.xlu1 %349 }
 0x372   :  { %v6228_v53 = vpop.eup %6227 }
 0x373   :  { %v353_v55 = vpop.xlane.xlu0 %352  ;;  %v231_v56 = vmul.f32 %v6228_v53, %v6212_v18 }
 0x374   :  { %v6230_v54 = vpop.eup %6229  ;;  %6231 = vrcp.f32 %v353_v55 }
 0x375   :  { %v232_v57 = vmul.f32 %v6230_v54, %v6214_v23  ;;  %6233 = vrcp.f32 %v350_v58 }
 0x377   :  { %v233_v59 = vpack.c.bf16 %v232_v57, %v231_v56  ;;  %v488_v22 = vpop.xlane.xlu1 %487 }
 0x379   :  { %5638 = vmatmul.mubr.msk.bf16.vlgmr.msra.gmra.mrb[4].mxu0 %vm209_vm3, %v233_v59  ;;  %v491_v27 = vpop.xlane.xlu0 %490 }
 0x37a   :  { %5649 = vmatprep.mubr.msk.bf16.mxu0 %vm6409_vm1, %v6408_v11  ;;  %6235 = vrcp.f32 %v491_v27 }
 0x37b   :  { %6237 = vrcp.f32 %v488_v22 }
 0x37e   :  { %v6232_v60 = vpop.eup %6231 }
 0x37f   :  { %v611_v61 = vpop.xlane.xlu1 %610  ;;  %v6234_v63 = vpop.eup %6233  ;;  %v357_v0 = vmul.f32 %v6232_v60, %v6218_v36 }
 0x380   :  { %v356_v5 = vmul.f32 %v6234_v63, %v6216_v31  ;;  %v6646_v63 = vsub.s32 1, %v6539_v8 }
 0x381   :  { %v614_v62 = vpop.xlane.xlu0 %613 }
 0x382   :  { %6239 = vrcp.f32 %v614_v62  ;;  %v358_v13 = vpack.c.bf16 %v357_v0, %v356_v5  ;;  %v693_v0 = vrot.slane %v6547_v10, %v6646_v63 }
 0x383   :  { %v498_v12 = vpop.permute.xlu1 %497  ;;  %6241 = vrcp.f32 %v611_v61 }
 0x384   :  { %v6236_v14 = vpop.eup %6235  ;;  %v503_v15 = vsel %vm239_vm5, %v498_v12, 0 }
 0x385   :  { %v360_v1 = vpop.permute.xlu0 %359  ;;  %v6238_v16 = vpop.eup %6237  ;;  %v495_v17 = vmul.f32 %v6236_v14, %v6222_v45 }
 0x386   :  { %v365_v6 = vsel %vm239_vm5, %v360_v1, 0  ;;  %v494_v18 = vmul.f32 %v6238_v16, %v6220_v43  ;;  %v6160_v43 = vld [vmem:[%s7598_s3 + $0x8] sm:$0xff]  }
 0x387   :  { %5648 = vmatpush3.bf16.msra.mxu0 %v365_v6  ;;  %v621_v19 = vpop.permute.xlu1 %620  ;;  %5679 = vmatprep.subr.bf16.mxu1 %v6160_v43 }
 0x388   :  { %5659 = vmatprep.subr.bf16.mxu0 %v6408_v11  ;;  %v496_v20 = vpack.c.bf16 %v495_v17, %v494_v18  ;;  %v626_v23 = vsel %vm239_vm5, %v621_v19, 0  ;;  %5680 = vmatpush3.bf16.msra.mxu1 %v6160_v43 }
 0x38a   :  { %5650 = vmatmul.mubr.msk.bf16.vlgmr.msra.gmra.mrb[8].mxu0 %vm209_vm3, %v358_v13 }
 0x38b   :  { %5660 = vmatpush3.bf16.msra.mxu0 %v503_v15  ;;  %5661 = vmatprep.mubr.msk.bf16.mxu0 %vm6409_vm1, %v6408_v11 }
 0x38c   :  { %5671 = vmatprep.subr.bf16.mxu0 %v6408_v11  ;;  %v6240_v21 = vpop.eup %6239 }
 0x38d   :  { %v6242_v24 = vpop.eup %6241  ;;  %v618_v25 = vmul.f32 %v6240_v21, %v6226_v49 }
 0x38e   :  { %v617_v26 = vmul.f32 %v6242_v24, %v6224_v47 }
 0x390   :  { %v619_v28 = vpack.c.bf16 %v618_v25, %v617_v26 }
 0x392   :  { %5662 = vmatmul.mubr.msk.bf16.vlgmr.msra.gmra.mrb[12].mxu0 %vm209_vm3, %v496_v20 }
 0x393   :  { %5672 = vmatpush3.bf16.msra.mxu0 %v626_v23  ;;  %5673 = vmatprep.mubr.msk.bf16.mxu0 %vm6409_vm1, %v6408_v11 }
 0x39a   :  { %5674 = vmatmul.mubr.msk.bf16.vlgmr.msra.gmra.mrb[16].mxu0 %vm209_vm3, %v619_v28 }
 0x44c   :  { %v277_v29 = vpop.f32.mrb[4].mxu0 }
 0x44d   :  { %v5639_v30 = vpop.f32.mrb[5].mxu0 }
 0x44e   :  { %v280_v31 = vpop.f32.mrb[6].mxu0 }
 0x44f   :  { %v5640_v32 = vpop.f32.mrb[7].mxu0 }
 0x45d   :  { %v401_v33 = vpop.f32.mrb[8].mxu0 }
 0x45e   :  { %v5651_v34 = vpop.f32.mrb[9].mxu0 }
 0x45f   :  { %v404_v35 = vpop.f32.mrb[10].mxu0 }
 0x460   :  { %v6122_v36 = vpack.i.bf16 %v401_v33, %v404_v35  ;;  %v5652_v37 = vpop.f32.mrb[11].mxu0 }
 0x461   :  { %v6162_v37 = vld [vmem:[%s7599_s4 + $0x8] sm:$0xff]  }
 0x462   :  { %6123 = vrot.lane.b32.xlu1 %v6122_v36, %s7617_s0  ;;  %v6161_v36 = vld [vmem:[%s7599_s4] sm:$0xff]  }
 0x463   :  { %5685 = vmatprep.subr.bf16.mxu0 %v6161_v36 }
 0x464   :  { %5686 = vmatpush3.bf16.msra.mxu0 %v6161_v36 }
 0x465   :  { %v539_v38 = vpop.f32.mrb[12].mxu0  ;;  %5687 = vmatprep.subr.bf16.mxu0 %v6162_v37 }
 0x466   :  { %v5663_v40 = vpop.f32.mrb[13].mxu0 }
 0x467   :  { %v542_v41 = vpop.f32.mrb[14].mxu0 }
 0x468   :  { %v5664_v42 = vpop.f32.mrb[15].mxu0  ;;  %5688 = vmatpush3.bf16.msra.mxu0 %v6162_v37 }
 0x46d   :  { %v662_v44 = vpop.f32.mrb[16].mxu0 }
 0x46e   :  { %v5675_v45 = vpop.f32.mrb[17].mxu0 }
 0x46f   :  { %v665_v46 = vpop.f32.mrb[18].mxu0 }
 0x470   :  { %v6117_v47 = vpack.i.bf16 %v665_v46, %v662_v44  ;;  %v5676_v48 = vpop.f32.mrb[19].mxu0 }
 0x472   :  { %6118 = vrot.lane.b32.xlu0 %v6117_v47, %s7617_s0 }
 0x4d4   :  { %v6124_v49 = vpop.permute.xlu1 %6123 }
 0x4d5   :  { %v6125_v51 = vunpack.i.l.bf16 %v6124_v49  ;;  %v6126_v54 = vunpack.i.h.bf16 %v6124_v49  ;;  %v6672_v49 = vsub.s32 2, %v6539_v8 }
 0x4d7   :  { %v417_v59 = vsel %vm161_vm2, %v280_v31, %v6125_v51  ;;  %v416_v27 = vsel %vm161_vm2, %v277_v29, %v6126_v54  ;;  %v6677_v51 = vsub.s32 3, %v6539_v8 }
 0x4e4   :  { %v6119_v50 = vpop.permute.xlu0 %6118 }
 0x4e5   :  { %v6121_v52 = vunpack.i.h.bf16 %v6119_v50  ;;  %v6120_v53 = vunpack.i.l.bf16 %v6119_v50  ;;  %v807_v50 = vrot.slane %v6547_v10, %v6672_v49 }
 0x4e7   :  { %v678_v55 = vsel %vm161_vm2, %v542_v41, %v6121_v52  ;;  %v677_v56 = vsel %vm161_vm2, %v539_v38, %v6120_v53  ;;  %v6163_v38 = vld [vmem:[%s7600_s5] sm:$0xff]  }
 0x4e8   :  { %v683_v57 = vrot.slane %v678_v55, 6  ;;  %v682_v58 = vrot.slane %v677_v56, 6  ;;  %5693 = vmatprep.subr.bf16.mxu1 %v6163_v38 }
 0x4ea   :  { %v687_v22 = vsel %vm681_vm6, %v417_v59, %v682_v58  ;;  %v684_v60 = vsel %vm681_vm6, %v682_v58, %v683_v57  ;;  %v814_v57 = vrot.slane %v6547_v10, %v6677_v51 }
 0x4eb   :  { %v688_v61 = vpack.c.bf16 %v687_v22, %v416_v27  ;;  %v689_v62 = vpack.c.bf16 %v684_v60, %v684_v60 }
 0x4ed   :  { %5681 = vmatprep.mubr.msk.bf16.mxu1 %vm99_vm0, %v688_v61 }
 0x4ee   :  { %5682 = vmatmul.mubr.msk.bf16.vlgmr.msra.gmra.mrb[16].mxu1 %vm99_vm0, %v689_v62 }
 0x4ef   :  { %5694 = vmatpush3.bf16.msra.mxu1 %v6163_v38 }
 0x4f0   :  { %5695 = vmatprep.subr.bf16.mxu1 %v6164_v39 }
 0x4f3   :  { %5696 = vmatpush3.bf16.msra.mxu1 %v6164_v39 }
 0x5c1   :  { %v5683_v1 = vpop.f32.mrb[16].mxu1 }
 0x5c2   :  { %v746_v5 = vpop.f32.mrb[17].mxu1  ;;  %v755_v6 = vadd.f32 %v5683_v1, %v693_v0 }
 0x5c3   :  { %v747_v12 = vadd.f32 %v746_v5, %v693_v0  ;;  %v5684_v13 = vpop.f32.mrb[18].mxu1  ;;  %v6165_v5 = vld [vmem:[%s7600_s5 + $0x10] sm:$0xff]  }
 0x5c4   :  { %v749_v14 = vpop.f32.mrb[19].mxu1  ;;  %v762_v19 = vadd.f32 %v755_v6, %v6530_v4  ;;  %5697 = vmatprep.subr.bf16.mxu1 %v6165_v5  ;;  %v6166_v6 = vld [vmem:[%s7600_s5 + $0x18] sm:$0xff]  }
 0x5c5   :  { %v750_v15 = vadd.f32 %v749_v14, %v693_v0  ;;  %v760_v16 = vadd.f32 %v747_v12, %v6520_v2  ;;  %5698 = vmatpush3.bf16.msra.mxu1 %v6165_v5  ;;  %v6691_v12 = vsub.s32 4, %v6539_v8 }
 0x5c6   :  { %v770_v21 = vsel %vm769_vm7, %v762_v19, 0.0  ;;  %5699 = vmatprep.subr.bf16.mxu1 %v6166_v6 }
 0x5c7   :  { %v763_v17 = vsel %vm99_vm0, %v760_v16, 0.0  ;;  %v761_v18 = vadd.f32 %v750_v15, %v6525_v3  ;;  %v835_v13 = vrot.slane %v6547_v10, %v6691_v12 }
 0x5c8   :  { %764 = vadd.xlane.f32.xlu0 %v763_v17 }
 0x5c9   :  { %v766_v20 = vsel %vm99_vm0, %v761_v18, 0.0  ;;  %5700 = vmatpush3.bf16.msra.mxu1 %v6166_v6  ;;  %v6718_v6 = vsub.s32 6, %v6539_v8 }
 0x5ca   :  { %767 = vadd.xlane.f32.xlu1 %v766_v20  ;;  %5719 = vmatprep.subr.bf16.mxu1 %v6408_v11 }
 0x5cc   :  { %771 = vadd.xlane.f32.xlu0 %v770_v21 }
 0x655   :  { %v765_v23 = vpop.xlane.xlu0 %764 }
 0x656   :  { %v774_v24 = vmul.f32 0.03125, %v765_v23 }
 0x657   :  { %v768_v25 = vpop.xlane.xlu1 %767 }
 0x658   :  { %v777_v26 = vsub.f32 %v760_v16, %v774_v24  ;;  %v775_v28 = vmul.f32 0.03125, %v768_v25 }
 0x659   :  { %v772_v2 = vpop.xlane.xlu0 %771 }
 0x65a   :  { %v778_v29 = vsub.f32 %v761_v18, %v775_v28  ;;  %v776_v30 = vmul.f32 0.03125, %v772_v2  ;;  %v780_v31 = vmul.f32 %v777_v26, %v777_v26  ;;  %v6700_v28 = vsub.s32 5, %v6539_v8 }
 0x65c   :  { %v779_v3 = vsub.f32 %v762_v19, %v776_v30  ;;  %v783_v4 = vsel %vm99_vm0, %v780_v31, 0.0  ;;  %v781_v32 = vmul.f32 %v778_v29, %v778_v29  ;;  %v910_v2 = vrot.slane %v6547_v10, %v6700_v28 }
 0x65d   :  { %784 = vadd.xlane.f32.xlu0 %v783_v4 }
 0x65e   :  { %v786_v33 = vsel %vm99_vm0, %v781_v32, 0.0  ;;  %v782_v34 = vmul.f32 %v779_v3, %v779_v3 }
 0x65f   :  { %787 = vadd.xlane.f32.xlu1 %v786_v33 }
 0x660   :  { %v789_v35 = vsel %vm769_vm7, %v782_v34, 0.0 }
 0x661   :  { %790 = vadd.xlane.f32.xlu0 %v789_v35 }
 0x6ea   :  { %v785_v40 = vpop.xlane.xlu0 %784 }
 0x6eb   :  { %v792_v41 = vmul.f32 0.03125, %v785_v40 }
 0x6ec   :  { %v788_v42 = vpop.xlane.xlu1 %787 }
 0x6ed   :  { %v795_v43 = vadd.f32 1e-05, %v792_v41  ;;  %v793_v44 = vmul.f32 0.03125, %v788_v42 }
 0x6ee   :  { %v791_v45 = vpop.xlane.xlu0 %790 }
 0x6ef   :  { %6243 = vrsqrt.f32 %v795_v43  ;;  %v796_v46 = vadd.f32 1e-05, %v793_v44  ;;  %v794_v47 = vmul.f32 0.03125, %v791_v45 }
 0x6f1   :  { %6245 = vrsqrt.f32 %v796_v46  ;;  %v797_v48 = vadd.f32 1e-05, %v794_v47 }
 0x6f3   :  { %6247 = vrsqrt.f32 %v797_v48 }
 0x6f9   :  { %v6244_v52 = vpop.eup %6243 }
 0x6fa   :  { %v801_v53 = vmul.f32 %v6244_v52, %v777_v26 }
 0x6fb   :  { %v6246_v54 = vpop.eup %6245 }
 0x6fc   :  { %v802_v55 = vmul.f32 %v6246_v54, %v778_v29  ;;  %v808_v56 = vmul.f32 %v807_v50, %v801_v53 }
 0x6fd   :  { %v6248_v58 = vpop.eup %6247 }
 0x6fe   :  { %v803_v59 = vmul.f32 %v6248_v58, %v779_v3  ;;  %v809_v27 = vmul.f32 %v807_v50, %v802_v55  ;;  %v815_v60 = vadd.f32 %v814_v57, %v808_v56  ;;  %v6168_v58 = vld [vmem:[%s7622_s29 + $0x18] sm:$0xff]  }
 0x700   :  { %v810_v22 = vmul.f32 %v807_v50, %v803_v59  ;;  %v816_v61 = vadd.f32 %v814_v57, %v809_v27 }
 0x702   :  { %v830_v62 = vpack.c.bf16 %v816_v61, %v815_v60  ;;  %v817_v0 = vadd.f32 %v814_v57, %v810_v22  ;;  %v6167_v57 = vld [vmem:[%s7622_s29 + $0x10] sm:$0xff]  }
 0x703   :  { %5705 = vmatprep.subr.bf16.mxu0 %v6167_v57 }
 0x704   :  { %5689 = vmatprep.mubr.msk.bf16.mxu0 %vm99_vm0, %v830_v62  ;;  %v831_v1 = vpack.c.bf16 %v817_v0, %v817_v0 }
 0x706   :  { %5690 = vmatmul.mubr.msk.bf16.vlgmr.msra.gmra.mrb[20].mxu0 %vm99_vm0, %v831_v1 }
 0x707   :  { %5706 = vmatpush3.bf16.msra.mxu0 %v6167_v57 }
 0x708   :  { %5707 = vmatprep.subr.bf16.mxu0 %v6168_v58 }
 0x70b   :  { %5708 = vmatpush3.bf16.msra.mxu0 %v6168_v58 }
 0x70c   :  { %5713 = vmatprep.subr.bf16.mxu0 %v6408_v11 }
 0x7d9   :  { %v5691_v14 = vpop.f32.mrb[20].mxu0 }
 0x7da   :  { %v897_v15 = vadd.f32 %v5691_v14, %v835_v13  ;;  %v888_v16 = vpop.f32.mrb[21].mxu0  ;;  %v6723_v14 = vsub.s32 7, %v6539_v8 }
 0x7db   :  { %v889_v17 = vadd.f32 %v888_v16, %v835_v13  ;;  %v5692_v18 = vpop.f32.mrb[22].mxu0 }
 0x7dc   :  { %v891_v19 = vpop.f32.mrb[23].mxu0  ;;  %v904_v21 = vmax.f32 %v897_v15, 0.0 }
 0x7dd   :  { %v892_v20 = vadd.f32 %v891_v19, %v835_v13  ;;  %v902_v23 = vmax.f32 %v889_v17, 0.0  ;;  %v1035_v13 = vrot.slane %v6547_v10, %v6718_v6 }
 0x7de   :  { %v906_v26 = vpack.c.bf16 %v904_v21, %v904_v21 }
 0x7df   :  { %v903_v24 = vmax.f32 %v892_v20, 0.0  ;;  %v1042_v20 = vrot.slane %v6547_v10, %v6723_v14  ;;  %v6744_v10 = vld [vmem:[%s7624_s26 + $0x8] sm:$0xff] }
 0x7e1   :  { %v905_v25 = vpack.c.bf16 %v903_v24, %v902_v23 }
 0x7e3   :  { %5701 = vmatprep.mubr.msk.bf16.mxu1 %vm935_vm8, %v905_v25 }
 0x7e4   :  { %5702 = vmatmul.mubr.msk.bf16.vlgmr.msra.gmra.mrb[20].mxu1 %vm935_vm8, %v906_v26 }
 0x7e5   :  { %5721 = vmatprep.mubr.msk.bf16.mxu1 %vm6409_vm1, %v6408_v11 }
 0x8b7   :  { %v5703_v29 = vpop.f32.mrb[20].mxu1 }
 0x8b8   :  { %v976_v30 = vpop.f32.mrb[21].mxu1  ;;  %v985_v31 = vadd.f32 %v5703_v29, %v910_v2 }
 0x8b9   :  { %v977_v3 = vadd.f32 %v976_v30, %v910_v2  ;;  %v5704_v4 = vpop.f32.mrb[22].mxu1 }
 0x8ba   :  { %v979_v32 = vpop.f32.mrb[23].mxu1  ;;  %v992_v37 = vadd.f32 %v985_v31, %v817_v0 }
 0x8bb   :  { %v980_v33 = vadd.f32 %v979_v32, %v910_v2  ;;  %v990_v34 = vadd.f32 %v977_v3, %v815_v60  ;;  %v1063_v3 = vrot.slane %v6744_v10, %v6542_v9 }
 0x8bc   :  { %v999_v39 = vsel %vm769_vm7, %v992_v37, 0.0 }
 0x8bd   :  { %v993_v35 = vsel %vm99_vm0, %v990_v34, 0.0  ;;  %v991_v36 = vadd.f32 %v980_v33, %v816_v61 }
 0x8be   :  { %994 = vadd.xlane.f32.xlu1 %v993_v35 }
 0x8bf   :  { %v996_v38 = vsel %vm99_vm0, %v991_v36, 0.0 }
 0x8c0   :  { %997 = vadd.xlane.f32.xlu0 %v996_v38 }
 0x8c2   :  { %1000 = vadd.xlane.f32.xlu1 %v999_v39 }
 0x94b   :  { %v995_v40 = vpop.xlane.xlu1 %994 }
 0x94c   :  { %v1002_v41 = vmul.f32 0.03125, %v995_v40 }
 0x94d   :  { %v998_v42 = vpop.xlane.xlu0 %997 }
 0x94e   :  { %v1005_v43 = vsub.f32 %v990_v34, %v1002_v41  ;;  %v1003_v44 = vmul.f32 0.03125, %v998_v42 }
 0x94f   :  { %v1001_v45 = vpop.xlane.xlu1 %1000 }
 0x950   :  { %v1006_v46 = vsub.f32 %v991_v36, %v1003_v44  ;;  %v1004_v47 = vmul.f32 0.03125, %v1001_v45  ;;  %v1008_v48 = vmul.f32 %v1005_v43, %v1005_v43 }
 0x952   :  { %v1007_v50 = vsub.f32 %v992_v37, %v1004_v47  ;;  %v1011_v52 = vsel %vm99_vm0, %v1008_v48, 0.0  ;;  %v1009_v53 = vmul.f32 %v1006_v46, %v1006_v46 }
 0x953   :  { %1012 = vadd.xlane.f32.xlu0 %v1011_v52 }
 0x954   :  { %v1014_v54 = vsel %vm99_vm0, %v1009_v53, 0.0  ;;  %v1010_v55 = vmul.f32 %v1007_v50, %v1007_v50 }
 0x955   :  { %1015 = vadd.xlane.f32.xlu1 %v1014_v54 }
 0x956   :  { %v1017_v56 = vsel %vm769_vm7, %v1010_v55, 0.0 }
 0x957   :  { %1018 = vadd.xlane.f32.xlu0 %v1017_v56 }
 0x9e0   :  { %v1013_v59 = vpop.xlane.xlu0 %1012 }
 0x9e1   :  { %v1020_v27 = vmul.f32 0.03125, %v1013_v59 }
 0x9e2   :  { %v1016_v22 = vpop.xlane.xlu1 %1015 }
 0x9e3   :  { %v1023_v60 = vadd.f32 1e-05, %v1020_v27  ;;  %v1021_v61 = vmul.f32 0.03125, %v1016_v22 }
 0x9e4   :  { %v1019_v62 = vpop.xlane.xlu0 %1018 }
 0x9e5   :  { %6249 = vrsqrt.f32 %v1023_v60  ;;  %v1024_v0 = vadd.f32 1e-05, %v1021_v61  ;;  %v1022_v1 = vmul.f32 0.03125, %v1019_v62 }
 0x9e7   :  { %6251 = vrsqrt.f32 %v1024_v0  ;;  %v1025_v5 = vadd.f32 1e-05, %v1022_v1 }
 0x9e9   :  { %6253 = vrsqrt.f32 %v1025_v5 }
 0x9ef   :  { %v6250_v15 = vpop.eup %6249 }
 0x9f0   :  { %v1029_v16 = vmul.f32 %v6250_v15, %v1005_v43 }
 0x9f1   :  { %v6252_v17 = vpop.eup %6251 }
 0x9f2   :  { %v1030_v18 = vmul.f32 %v6252_v17, %v1006_v46  ;;  %v1036_v19 = vmul.f32 %v1035_v13, %v1029_v16 }
 0x9f3   :  { %v6254_v21 = vpop.eup %6253 }
 0x9f4   :  { %v1031_v23 = vmul.f32 %v6254_v21, %v1007_v50  ;;  %v1037_v24 = vmul.f32 %v1035_v13, %v1030_v18  ;;  %v6727_v26 = vadd.f32 %v1042_v20, %v1036_v19 }
 0x9f6   :  { %v1038_v25 = vmul.f32 %v1035_v13, %v1031_v23  ;;  %v6729_v2 = vadd.f32 %v1042_v20, %v1037_v24 }
 0x9f8   :  { %v1058_v29 = vpack.c.bf16 %v6729_v2, %v6727_v26  ;;  %v6733_v30 = vadd.f32 %v1042_v20, %v1038_v25 }
 0x9fa   :  { %5709 = vmatprep.mubr.msk.bf16.mxu0 %vm99_vm0, %v1058_v29  ;;  %v1059_v31 = vpack.c.bf16 %v6733_v30, %v6733_v30 }
 0x9fc   :  { %5710 = vmatmul.mubr.msk.bf16.vlgmr.msra.gmra.mrb[24].mxu0 %vm99_vm0, %v1059_v31 }
 0x9fd   :  { %5715 = vmatprep.mubr.msk.bf16.mxu0 %vm6409_vm1, %v6408_v11 }
 0xacf   :  { %v5711_v4 = vpop.f32.mrb[24].mxu0 }
 0xad0   :  { %v1125_v32 = vadd.f32 %v5711_v4, %v1063_v3  ;;  %v1116_v33 = vpop.f32.mrb[25].mxu0 }
 0xad1   :  { %v1117_v34 = vadd.f32 %v1116_v33, %v1063_v3  ;;  %v5712_v35 = vpop.f32.mrb[26].mxu0 }
 0xad2   :  { %v1119_v36 = vpop.f32.mrb[27].mxu0  ;;  %v1390_v38 = vmul.f32 0.25, %v1125_v32 }
 0xad3   :  { %v1120_v37 = vadd.f32 %v1119_v36, %v1063_v3  ;;  %v1130_v39 = vmul.f32 0.25, %v1117_v34 }
 0xad5   :  { %v1131_v40 = vmul.f32 0.25, %v1120_v37  ;;  %v6748_v41 = vpack.c.bf16 %v1120_v37, %v1117_v34  ;;  %v1392_v42 = vpack.c.bf16 %v1125_v32, %v1120_v37 }
 0xad7   :  { %1259 = vrot.lane.b32.xlu0 %v6748_v41, %s6412_s30  ;;  %1135 = vrot.lane.b32.xlu1 %v6748_v41, %s6410_s27  ;;  %v1132_v43 = vpack.c.bf16 %v1131_v40, %v1130_v39  ;;  %v1391_v44 = vpack.c.bf16 %v1390_v38, %v1131_v40  ;;  %v6754_v45 = vrot.slane %v1392_v42, 1 }
 0xad9   :  { %v1394_v46 = vrot.slane %v1391_v44, 1 }
 0xadb   :  { %1520 = vrot.lane.b32.xlu0 %v6754_v45, %s6412_s30  ;;  %1257 = vrot.lane.b32.xlu1 %v1132_v43, %s6411_s28 }
 0xadf   :  { %1397 = vrot.lane.b32.xlu1 %v6754_v45, %s6410_s27 }
 0xae3   :  { %1518 = vrot.lane.b32.xlu1 %v1394_v46, %s6411_s28 }
 0xb49   :  { %v1136_v47 = vpop.permute.xlu1 %1135  ;;  %v1260_v50 = vpop.permute.xlu0 %1259 }
 0xb4a   :  { %v1141_v48 = vsel %vm161_vm2, %v1136_v47, 0  ;;  %v1265_v53 = vsel %vm161_vm2, %v1260_v50, 0 }
 0xb4b   :  { %5714 = vmatpush3.bf16.xpose.msra.mxu0 %v1141_v48 }
 0xb4c   :  { %5725 = vmatprep.subr.bf16.mxu0 %v6408_v11 }
 0xb4d   :  { %v1258_v52 = vpop.permute.xlu1 %1257  ;;  %v1521_v56 = vpop.permute.xlu0 %1520 }
 0xb4e   :  { %v1526_v57 = vsel %vm161_vm2, %v1521_v56, 0 }
 0xb51   :  { %v1398_v54 = vpop.permute.xlu1 %1397 }
 0xb52   :  { %5716 = vmatmul.mubr.msk.bf16.vlgmr.msra.gmra.mrb[28].mxu0 %vm161_vm2, %v1132_v43  ;;  %v1403_v55 = vsel %vm161_vm2, %v1398_v54, 0 }
 0xb53   :  { %5726 = vmatpush3.bf16.xpose.msra.mxu0 %v1265_v53  ;;  %5727 = vmatprep.mubr.msk.bf16.mxu0 %vm6409_vm1, %v6408_v11 }
 0xb54   :  { %5737 = vmatprep.subr.bf16.mxu0 %v6408_v11 }
 0xb55   :  { %v1519_v58 = vpop.permute.xlu1 %1518 }
 0xb5a   :  { %5728 = vmatmul.mubr.msk.bf16.vlgmr.msra.gmra.mrb[32].mxu0 %vm161_vm2, %v1258_v52 }
 0xb5b   :  { %5738 = vmatpush3.bf16.xpose.msra.mxu0 %v1403_v55  ;;  %5739 = vmatprep.mubr.msk.bf16.mxu0 %vm6409_vm1, %v6408_v11 }
 0xb5c   :  { %5749 = vmatprep.subr.bf16.mxu0 %v6408_v11 }
 0xb62   :  { %5740 = vmatmul.mubr.msk.bf16.vlgmr.msra.gmra.mrb[36].mxu0 %vm161_vm2, %v1394_v46 }
 0xb63   :  { %5750 = vmatpush3.bf16.xpose.msra.mxu0 %v1526_v57  ;;  %5751 = vmatprep.mubr.msk.bf16.mxu0 %vm6409_vm1, %v6408_v11 }
 0xb6a   :  { %5752 = vmatmul.mubr.msk.bf16.vlgmr.msra.gmra.mrb[40].mxu0 %vm161_vm2, %v1519_v58 }
 0xc25   :  { %v1177_v59 = vpop.f32.mrb[28].mxu0 }
 0xc26   :  { %v5717_v27 = vpop.f32.mrb[29].mxu0  ;;  %v1184_v22 = vsel %vm209_vm3, %v1177_v59, -inf }
 0xc27   :  { %1185 = vmax.xlane.f32.xlu0 %v1184_v22  ;;  %v1180_v60 = vpop.f32.mrb[30].mxu0 }
 0xc28   :  { %v5718_v61 = vpop.f32.mrb[31].mxu0  ;;  %v1187_v62 = vsel %vm213_vm4, %v1180_v60, -inf }
 0xc29   :  { %1188 = vmax.xlane.f32.xlu1 %v1187_v62 }
 0xc2d   :  { %v1301_v0 = vpop.f32.mrb[32].mxu0 }
 0xc2e   :  { %v5729_v1 = vpop.f32.mrb[33].mxu0  ;;  %v1308_v5 = vsel %vm209_vm3, %v1301_v0, -inf }
 0xc2f   :  { %1309 = vmax.xlane.f32.xlu0 %v1308_v5  ;;  %v1304_v13 = vpop.f32.mrb[34].mxu0 }
 0xc30   :  { %v5730_v15 = vpop.f32.mrb[35].mxu0  ;;  %v1311_v16 = vsel %vm213_vm4, %v1304_v13, -inf }
 0xc33   :  { %1312 = vmax.xlane.f32.xlu0 %v1311_v16 }
 0xc35   :  { %v1439_v17 = vpop.f32.mrb[36].mxu0 }
 0xc36   :  { %v5741_v18 = vpop.f32.mrb[37].mxu0  ;;  %v1446_v19 = vsel %vm209_vm3, %v1439_v17, -inf }
 0xc37   :  { %1447 = vmax.xlane.f32.xlu1 %v1446_v19  ;;  %v1442_v20 = vpop.f32.mrb[38].mxu0 }
 0xc38   :  { %v5742_v21 = vpop.f32.mrb[39].mxu0  ;;  %v1449_v23 = vsel %vm213_vm4, %v1442_v20, -inf }
 0xc39   :  { %1450 = vmax.xlane.f32.xlu0 %v1449_v23 }
 0xc3d   :  { %v1562_v24 = vpop.f32.mrb[40].mxu0 }
 0xc3e   :  { %v5753_v25 = vpop.f32.mrb[41].mxu0  ;;  %v1569_v29 = vsel %vm209_vm3, %v1562_v24, -inf }
 0xc3f   :  { %1570 = vmax.xlane.f32.xlu1 %v1569_v29  ;;  %v1565_v31 = vpop.f32.mrb[42].mxu0 }
 0xc40   :  { %v5754_v3 = vpop.f32.mrb[43].mxu0  ;;  %v1572_v4 = vsel %vm213_vm4, %v1565_v31, -inf }
 0xc41   :  { %1573 = vmax.xlane.f32.xlu0 %v1572_v4 }
 0xc50   :  { %1207 = vrot.lane.b32.xlu1 %v6748_v41, %s6413_s2 }
 0xcb4   :  { %v1186_v32 = vpop.xlane.xlu0 %1185 }
 0xcb5   :  { %v1190_v33 = vsub.f32 %v1177_v59, %v1186_v32 }
 0xcb6   :  { %v1189_v34 = vpop.xlane.xlu1 %1188 }
 0xcb7   :  { %v1192_v35 = vmul.f32 1.442695, %v1190_v33  ;;  %v1191_v36 = vsub.f32 %v1180_v60, %v1189_v34 }
 0xcb9   :  { %6255 = vpow2.f32 %v1192_v35  ;;  %v1194_v37 = vmul.f32 1.442695, %v1191_v36 }
 0xcbb   :  { %6257 = vpow2.f32 %v1194_v37 }
 0xcbc   :  { %v1310_v38 = vpop.xlane.xlu0 %1309 }
 0xcbd   :  { %v1314_v39 = vsub.f32 %v1301_v0, %v1310_v38 }
 0xcbf   :  { %v1316_v40 = vmul.f32 1.442695, %v1314_v39 }
 0xcc0   :  { %v1313_v42 = vpop.xlane.xlu0 %1312 }
 0xcc1   :  { %6259 = vpow2.f32 %v1316_v40  ;;  %v1315_v43 = vsub.f32 %v1304_v13, %v1313_v42 }
 0xcc3   :  { %v6256_v44 = vpop.eup %6255  ;;  %v1318_v46 = vmul.f32 1.442695, %v1315_v43 }
 0xcc4   :  { %v1448_v47 = vpop.xlane.xlu1 %1447  ;;  %v1196_v48 = vsel %vm209_vm3, %v6256_v44, 0.0 }
 0xcc5   :  { %v6258_v50 = vpop.eup %6257  ;;  %6261 = vpow2.f32 %v1318_v46  ;;  %v1452_v52 = vsub.f32 %v1439_v17, %v1448_v47  ;;  %1197 = vadd.xlane.f32.xlu1 %v1196_v48 }
 0xcc6   :  { %v1451_v53 = vpop.xlane.xlu0 %1450  ;;  %v1199_v54 = vsel %vm213_vm4, %v6258_v50, 0.0 }
 0xcc7   :  { %v1454_v55 = vmul.f32 1.442695, %v1452_v52  ;;  %v1453_v56 = vsub.f32 %v1442_v20, %v1451_v53  ;;  %1200 = vadd.xlane.f32.xlu0 %v1199_v54 }
 0xcc9   :  { %6263 = vpow2.f32 %v1454_v55  ;;  %v1456_v57 = vmul.f32 1.442695, %v1453_v56 }
 0xccb   :  { %v6260_v58 = vpop.eup %6259  ;;  %6265 = vpow2.f32 %v1456_v57 }
 0xccc   :  { %v1571_v59 = vpop.xlane.xlu1 %1570  ;;  %v1320_v27 = vsel %vm209_vm3, %v6260_v58, 0.0 }
 0xccd   :  { %v1575_v22 = vsub.f32 %v1562_v24, %v1571_v59  ;;  %1321 = vadd.xlane.f32.xlu1 %v1320_v27 }
 0xcce   :  { %v1574_v60 = vpop.xlane.xlu0 %1573 }
 0xccf   :  { %v6262_v61 = vpop.eup %6261  ;;  %v1577_v62 = vmul.f32 1.442695, %v1575_v22  ;;  %v1576_v0 = vsub.f32 %v1565_v31, %v1574_v60 }
 0xcd0   :  { %v1208_v1 = vpop.permute.xlu1 %1207  ;;  %v1323_v5 = vsel %vm213_vm4, %v6262_v61, 0.0 }
 0xcd1   :  { %6267 = vpow2.f32 %v1577_v62  ;;  %v1579_v13 = vmul.f32 1.442695, %v1576_v0  ;;  %v1213_v15 = vsel %vm239_vm5, %v1208_v1, 0  ;;  %1324 = vadd.xlane.f32.xlu0 %v1323_v5 }
 0xcd2   :  { %5720 = vmatpush3.bf16.msra.mxu1 %v1213_v15 }
 0xcd3   :  { %v6264_v16 = vpop.eup %6263  ;;  %6269 = vpow2.f32 %v1579_v13  ;;  %5731 = vmatprep.subr.bf16.mxu1 %v6408_v11 }
 0xcd4   :  { %v1458_v17 = vsel %vm209_vm3, %v6264_v16, 0.0 }
 0xcd5   :  { %v6266_v18 = vpop.eup %6265  ;;  %1459 = vadd.xlane.f32.xlu1 %v1458_v17 }
 0xcd6   :  { %v1461_v19 = vsel %vm213_vm4, %v6266_v18, 0.0 }
 0xcd7   :  { %1462 = vadd.xlane.f32.xlu0 %v1461_v19  ;;  %v6169_v19 = vld [vmem:[%s7598_s3 + $0x10] sm:$0xff]  }
 0xcd8   :  { %5761 = vmatprep.subr.bf16.mxu0 %v6169_v19 }
 0xcd9   :  { %5762 = vmatpush3.bf16.msra.mxu0 %v6169_v19 }
 0xcdb   :  { %v6268_v20 = vpop.eup %6267 }
 0xcdc   :  { %v1581_v21 = vsel %vm209_vm3, %v6268_v20, 0.0 }
 0xcdd   :  { %v6270_v23 = vpop.eup %6269  ;;  %1582 = vadd.xlane.f32.xlu1 %v1581_v21 }
 0xcde   :  { %v1584_v24 = vsel %vm213_vm4, %v6270_v23, 0.0 }
 0xcdf   :  { %1585 = vadd.xlane.f32.xlu0 %v1584_v24  ;;  %v6170_v24 = vld [vmem:[%s7598_s3 + $0x18] sm:$0xff]  }
 0xce0   :  { %5763 = vmatprep.subr.bf16.mxu0 %v6170_v24 }
 0xce1   :  { %5764 = vmatpush3.bf16.msra.mxu0 %v6170_v24  ;;  %v6172_v24 = vld [vmem:[%s7599_s4 + $0x18] sm:$0xff]  }
 0xcee   :  { %1469 = vrot.lane.b32.xlu1 %v6754_v45, %s6413_s2 }
 0xcf2   :  { %1592 = vrot.lane.b32.xlu1 %v6754_v45, %s6414_s19 }
 0xcf5   :  { %1331 = vrot.lane.b32.xlu0 %v6748_v41, %s6414_s19 }
 0xd52   :  { %v1198_v25 = vpop.xlane.xlu1 %1197 }
 0xd53   :  { %6271 = vrcp.f32 %v1198_v25 }
 0xd54   :  { %v1201_v29 = vpop.xlane.xlu0 %1200 }
 0xd55   :  { %6273 = vrcp.f32 %v1201_v29 }
 0xd5a   :  { %v1322_v34 = vpop.xlane.xlu1 %1321 }
 0xd5d   :  { %v6272_v31 = vpop.eup %6271 }
 0xd5e   :  { %v1325_v4 = vpop.xlane.xlu0 %1324  ;;  %v1204_v32 = vmul.f32 %v6272_v31, %v6256_v44 }
 0xd5f   :  { %v6274_v3 = vpop.eup %6273  ;;  %6275 = vrcp.f32 %v1325_v4 }
 0xd60   :  { %v1205_v33 = vmul.f32 %v6274_v3, %v6258_v50  ;;  %6277 = vrcp.f32 %v1322_v34 }
 0xd62   :  { %v1206_v35 = vpack.c.bf16 %v1205_v33, %v1204_v32  ;;  %v1460_v41 = vpop.xlane.xlu1 %1459 }
 0xd64   :  { %5722 = vmatmul.mubr.msk.bf16.vlgmr.msra.gmra.mrb[24].mxu1 %vm209_vm3, %v1206_v35  ;;  %v1463_v45 = vpop.xlane.xlu0 %1462 }
 0xd65   :  { %5733 = vmatprep.mubr.msk.bf16.mxu1 %vm6409_vm1, %v6408_v11  ;;  %6279 = vrcp.f32 %v1463_v45 }
 0xd66   :  { %6281 = vrcp.f32 %v1460_v41 }
 0xd69   :  { %v6276_v36 = vpop.eup %6275 }
 0xd6a   :  { %v1583_v37 = vpop.xlane.xlu1 %1582  ;;  %v6278_v39 = vpop.eup %6277  ;;  %v1329_v40 = vmul.f32 %v6276_v36, %v6262_v61 }
 0xd6b   :  { %v1328_v43 = vmul.f32 %v6278_v39, %v6260_v58 }
 0xd6c   :  { %v1586_v38 = vpop.xlane.xlu0 %1585 }
 0xd6d   :  { %6283 = vrcp.f32 %v1586_v38  ;;  %v1330_v47 = vpack.c.bf16 %v1329_v40, %v1328_v43 }
 0xd6e   :  { %v1470_v46 = vpop.permute.xlu1 %1469  ;;  %6285 = vrcp.f32 %v1583_v37 }
 0xd6f   :  { %v6280_v48 = vpop.eup %6279  ;;  %v1475_v50 = vsel %vm239_vm5, %v1470_v46, 0 }
 0xd70   :  { %v1332_v42 = vpop.permute.xlu0 %1331  ;;  %v6282_v52 = vpop.eup %6281  ;;  %v1467_v53 = vmul.f32 %v6280_v48, %v6266_v18  ;;  %v1664_v48 = vrot.slane %v6744_v10, %v6646_v63 }
 0xd71   :  { %v1337_v44 = vsel %vm239_vm5, %v1332_v42, 0  ;;  %v1466_v54 = vmul.f32 %v6282_v52, %v6264_v16 }
 0xd72   :  { %5732 = vmatpush3.bf16.msra.mxu1 %v1337_v44  ;;  %v1593_v55 = vpop.permute.xlu1 %1592 }
 0xd73   :  { %5743 = vmatprep.subr.bf16.mxu1 %v6408_v11  ;;  %v1468_v56 = vpack.c.bf16 %v1467_v53, %v1466_v54  ;;  %v1598_v58 = vsel %vm239_vm5, %v1593_v55, 0 }
 0xd75   :  { %5734 = vmatmul.mubr.msk.bf16.vlgmr.msra.gmra.mrb[28].mxu1 %vm209_vm3, %v1330_v47 }
 0xd76   :  { %5744 = vmatpush3.bf16.msra.mxu1 %v1475_v50  ;;  %5745 = vmatprep.mubr.msk.bf16.mxu1 %vm6409_vm1, %v6408_v11 }
 0xd77   :  { %5755 = vmatprep.subr.bf16.mxu1 %v6408_v11  ;;  %v6284_v57 = vpop.eup %6283 }
 0xd78   :  { %v6286_v59 = vpop.eup %6285  ;;  %v1590_v27 = vmul.f32 %v6284_v57, %v6270_v23 }
 0xd79   :  { %v1589_v22 = vmul.f32 %v6286_v59, %v6268_v20 }
 0xd7b   :  { %v1591_v60 = vpack.c.bf16 %v1590_v27, %v1589_v22 }
 0xd7d   :  { %5746 = vmatmul.mubr.msk.bf16.vlgmr.msra.gmra.mrb[32].mxu1 %vm209_vm3, %v1468_v56 }
 0xd7e   :  { %5756 = vmatpush3.bf16.msra.mxu1 %v1598_v58  ;;  %5757 = vmatprep.mubr.msk.bf16.mxu1 %vm6409_vm1, %v6408_v11 }
 0xd85   :  { %5758 = vmatmul.mubr.msk.bf16.vlgmr.msra.gmra.mrb[36].mxu1 %vm209_vm3, %v1591_v60 }
 0xe37   :  { %v1249_v61 = vpop.f32.mrb[24].mxu1 }
 0xe38   :  { %v5723_v62 = vpop.f32.mrb[25].mxu1 }
 0xe39   :  { %v1252_v0 = vpop.f32.mrb[26].mxu1 }
 0xe3a   :  { %v5724_v1 = vpop.f32.mrb[27].mxu1 }
 0xe48   :  { %v1373_v5 = vpop.f32.mrb[28].mxu1 }
 0xe49   :  { %v5735_v13 = vpop.f32.mrb[29].mxu1 }
 0xe4a   :  { %v1376_v15 = vpop.f32.mrb[30].mxu1 }
 0xe4b   :  { %v6132_v16 = vpack.i.bf16 %v1373_v5, %v1376_v15  ;;  %v5736_v17 = vpop.f32.mrb[31].mxu1 }
 0xe4d   :  { %6133 = vrot.lane.b32.xlu1 %v6132_v16, %s7625_s23 }
 0xe50   :  { %v1511_v18 = vpop.f32.mrb[32].mxu1 }
 0xe51   :  { %v5747_v20 = vpop.f32.mrb[33].mxu1 }
 0xe52   :  { %v1514_v21 = vpop.f32.mrb[34].mxu1 }
 0xe53   :  { %v5748_v23 = vpop.f32.mrb[35].mxu1 }
 0xe54   :  { %v6171_v23 = vld [vmem:[%s7599_s4 + $0x10] sm:$0xff]  }
 0xe55   :  { %5769 = vmatprep.subr.bf16.mxu1 %v6171_v23 }
 0xe56   :  { %5770 = vmatpush3.bf16.msra.mxu1 %v6171_v23 }
 0xe57   :  { %5771 = vmatprep.subr.bf16.mxu1 %v6172_v24 }
 0xe58   :  { %v1634_v25 = vpop.f32.mrb[36].mxu1 }
 0xe59   :  { %v5759_v29 = vpop.f32.mrb[37].mxu1 }
 0xe5a   :  { %v1637_v31 = vpop.f32.mrb[38].mxu1  ;;  %5772 = vmatpush3.bf16.msra.mxu1 %v6172_v24  ;;  %v6176_v29 = vld [vmem:[%s7600_s5 + $0x28] sm:$0xff]  }
 0xe5b   :  { %v6127_v3 = vpack.i.bf16 %v1637_v31, %v1634_v25  ;;  %v5760_v4 = vpop.f32.mrb[39].mxu1  ;;  %5789 = vmatprep.subr.bf16.mxu1 %v6408_v11  ;;  %v6175_v25 = vld [vmem:[%s7600_s5 + $0x20] sm:$0xff]  }
 0xe5c   :  { %5777 = vmatprep.subr.bf16.mxu0 %v6175_v25 }
 0xe5d   :  { %6128 = vrot.lane.b32.xlu0 %v6127_v3, %s7625_s23 }
 0xebf   :  { %v6134_v32 = vpop.permute.xlu1 %6133 }
 0xec0   :  { %v6135_v34 = vunpack.i.l.bf16 %v6134_v32  ;;  %v6136_v41 = vunpack.i.h.bf16 %v6134_v32 }
 0xec2   :  { %v1389_v40 = vsel %vm161_vm2, %v1252_v0, %v6135_v34  ;;  %v1388_v42 = vsel %vm161_vm2, %v1249_v61, %v6136_v41 }
 0xecf   :  { %v6129_v33 = vpop.permute.xlu0 %6128 }
 0xed0   :  { %v6131_v35 = vunpack.i.h.bf16 %v6129_v33  ;;  %v6130_v45 = vunpack.i.l.bf16 %v6129_v33 }
 0xed2   :  { %v1650_v36 = vsel %vm161_vm2, %v1514_v21, %v6131_v35  ;;  %v1649_v37 = vsel %vm161_vm2, %v1511_v18, %v6130_v45 }
 0xed3   :  { %v1654_v38 = vrot.slane %v1650_v36, 6  ;;  %v1653_v39 = vrot.slane %v1649_v37, 6  ;;  %v1776_v36 = vrot.slane %v6744_v10, %v6672_v49 }
 0xed5   :  { %v1658_v43 = vsel %vm681_vm6, %v1389_v40, %v1653_v39  ;;  %v1655_v44 = vsel %vm681_vm6, %v1653_v39, %v1654_v38 }
 0xed6   :  { %v1659_v46 = vpack.c.bf16 %v1658_v43, %v1388_v42  ;;  %v1660_v47 = vpack.c.bf16 %v1655_v44, %v1655_v44  ;;  %v1783_v43 = vrot.slane %v6744_v10, %v6677_v51 }
 0xed8   :  { %5765 = vmatprep.mubr.msk.bf16.mxu0 %vm99_vm0, %v1659_v46 }
 0xed9   :  { %5766 = vmatmul.mubr.msk.bf16.vlgmr.msra.gmra.mrb[44].mxu0 %vm99_vm0, %v1660_v47 }
 0xeda   :  { %5778 = vmatpush3.bf16.msra.mxu0 %v6175_v25 }
 0xedb   :  { %5779 = vmatprep.subr.bf16.mxu0 %v6176_v29 }
 0xede   :  { %5780 = vmatpush3.bf16.msra.mxu0 %v6176_v29 }
 0xfac   :  { %v5767_v50 = vpop.f32.mrb[44].mxu0 }
 0xfad   :  { %v1717_v52 = vpop.f32.mrb[45].mxu0  ;;  %v1726_v53 = vadd.f32 %v5767_v50, %v1664_v48 }
 0xfae   :  { %v1718_v54 = vadd.f32 %v1717_v52, %v1664_v48  ;;  %v5768_v55 = vpop.f32.mrb[46].mxu0 }
 0xfaf   :  { %v1720_v56 = vpop.f32.mrb[47].mxu0  ;;  %v1733_v22 = vadd.f32 %v1726_v53, %v6733_v30  ;;  %v6173_v55 = vld [vmem:[%s7601_s7] sm:$0xff]  }
 0xfb0   :  { %v1721_v57 = vadd.f32 %v1720_v56, %v1664_v48  ;;  %v1731_v58 = vadd.f32 %v1718_v54, %v6727_v26 }
 0xfb1   :  { %v1740_v61 = vsel %vm769_vm7, %v1733_v22, 0.0 }
 0xfb2   :  { %v1734_v59 = vsel %vm99_vm0, %v1731_v58, 0.0  ;;  %v1732_v27 = vadd.f32 %v1721_v57, %v6729_v2  ;;  %v6174_v57 = vld [vmem:[%s7601_s7 + $0x8] sm:$0xff]  }
 0xfb3   :  { %1735 = vadd.xlane.f32.xlu0 %v1734_v59  ;;  %v6892_v59 = vld [vmem:[%s7602_s1 + $0x8] sm:$0xff] }
 0xfb4   :  { %v1737_v60 = vsel %vm99_vm0, %v1732_v27, 0.0 }
 0xfb5   :  { %1738 = vadd.xlane.f32.xlu1 %v1737_v60  ;;  %v6178_v60 = vld [vmem:[%s7600_s5 + $0x38] sm:$0xff]  }
 0xfb7   :  { %1741 = vadd.xlane.f32.xlu0 %v1740_v61  ;;  %v1806_v61 = vrot.slane %v6744_v10, %v6691_v12 }
0x1040   :  { %v1736_v62 = vpop.xlane.xlu0 %1735 }
0x1041   :  { %v1743_v0 = vmul.f32 0.03125, %v1736_v62 }
0x1042   :  { %v1739_v1 = vpop.xlane.xlu1 %1738 }
0x1043   :  { %v1746_v5 = vsub.f32 %v1731_v58, %v1743_v0  ;;  %v1744_v13 = vmul.f32 0.03125, %v1739_v1  ;;  %v6887_v58 = vld [vmem:[%s7602_s1] sm:$0xff] }
0x1044   :  { %v1742_v15 = vpop.xlane.xlu0 %1741 }
0x1045   :  { %v1747_v26 = vsub.f32 %v1732_v27, %v1744_v13  ;;  %v1745_v16 = vmul.f32 0.03125, %v1742_v15  ;;  %v1749_v17 = vmul.f32 %v1746_v5, %v1746_v5  ;;  %v2079_v27 = vpack.c.bf16 %v6892_v59, %v6887_v58  ;;  %v6913_v15 = vld [vmem:[%s7603_s14] sm:$0xff] }
0x1047   :  { %v1748_v18 = vsub.f32 %v1733_v22, %v1745_v16  ;;  %v1752_v2 = vsel %vm99_vm0, %v1749_v17, 0.0  ;;  %v1750_v30 = vmul.f32 %v1747_v26, %v1747_v26  ;;  %v6177_v22 = vld [vmem:[%s7600_s5 + $0x30] sm:$0xff]  }
0x1048   :  { %1753 = vadd.xlane.f32.xlu0 %v1752_v2  ;;  %5781 = vmatprep.subr.bf16.mxu0 %v6177_v22 }
0x1049   :  { %v1755_v19 = vsel %vm99_vm0, %v1750_v30, 0.0  ;;  %v1751_v20 = vmul.f32 %v1748_v18, %v1748_v18  ;;  %5782 = vmatpush3.bf16.msra.mxu0 %v6177_v22 }
0x104a   :  { %1756 = vadd.xlane.f32.xlu1 %v1755_v19  ;;  %5783 = vmatprep.subr.bf16.mxu0 %v6178_v60 }
0x104b   :  { %v1758_v21 = vsel %vm769_vm7, %v1751_v20, 0.0 }
0x104c   :  { %1759 = vadd.xlane.f32.xlu0 %v1758_v21 }
0x104d   :  { %5784 = vmatpush3.bf16.msra.mxu0 %v6178_v60 }
0x104e   :  { %5803 = vmatprep.subr.bf16.mxu0 %v6408_v11 }
0x10d5   :  { %v1754_v31 = vpop.xlane.xlu0 %1753 }
0x10d6   :  { %v1761_v3 = vmul.f32 0.03125, %v1754_v31 }
0x10d7   :  { %v1757_v4 = vpop.xlane.xlu1 %1756 }
0x10d8   :  { %v1764_v32 = vadd.f32 1e-05, %v1761_v3  ;;  %v1762_v33 = vmul.f32 0.03125, %v1757_v4 }
0x10d9   :  { %v1760_v34 = vpop.xlane.xlu0 %1759 }
0x10da   :  { %6287 = vrsqrt.f32 %v1764_v32  ;;  %v1765_v35 = vadd.f32 1e-05, %v1762_v33  ;;  %v1763_v45 = vmul.f32 0.03125, %v1760_v34 }
0x10dc   :  { %6289 = vrsqrt.f32 %v1765_v35  ;;  %v1766_v41 = vadd.f32 1e-05, %v1763_v45 }
0x10de   :  { %6291 = vrsqrt.f32 %v1766_v41 }
0x10e4   :  { %v6288_v37 = vpop.eup %6287 }
0x10e5   :  { %v1770_v38 = vmul.f32 %v6288_v37, %v1746_v5 }
0x10e6   :  { %v6290_v39 = vpop.eup %6289 }
0x10e7   :  { %v1771_v40 = vmul.f32 %v6290_v39, %v1747_v26  ;;  %v1777_v42 = vmul.f32 %v1776_v36, %v1770_v38 }
0x10e8   :  { %v6292_v44 = vpop.eup %6291 }
0x10e9   :  { %v1772_v46 = vmul.f32 %v6292_v44, %v1748_v18  ;;  %v1778_v47 = vmul.f32 %v1776_v36, %v1771_v40  ;;  %v6864_v50 = vadd.f32 %v1783_v43, %v1777_v42  ;;  %v2083_v18 = vrot.slane %v6913_v15, %v6542_v9 }
0x10eb   :  { %v1779_v48 = vmul.f32 %v1776_v36, %v1772_v46  ;;  %v6866_v52 = vadd.f32 %v1783_v43, %v1778_v47  ;;  %v6957_v46 = vrot.slane %v6744_v10, %v6700_v28 }
0x10ed   :  { %v1801_v53 = vpack.c.bf16 %v6866_v52, %v6864_v50  ;;  %v6870_v54 = vadd.f32 %v1783_v43, %v1779_v48 }
0x10ef   :  { %5773 = vmatprep.mubr.msk.bf16.mxu1 %vm99_vm0, %v1801_v53  ;;  %v1802_v56 = vpack.c.bf16 %v6870_v54, %v6870_v54 }
0x10f1   :  { %5774 = vmatmul.mubr.msk.bf16.vlgmr.msra.gmra.mrb[40].mxu1 %vm99_vm0, %v1802_v56 }
0x10f2   :  { %5790 = vmatpush3.bf16.msra.mxu1 %v6173_v55  ;;  %5793 = vmatprep.mubr.msk.bf16.mxu1 %vm6409_vm1, %v6408_v11 }
0x10f3   :  { %5791 = vmatprep.subr.bf16.mxu1 %v6408_v11 }
0x10f6   :  { %5792 = vmatpush3.bf16.msra.mxu1 %v6174_v57 }
0x10f7   :  { %5797 = vmatprep.subr.bf16.mxu1 %v6408_v11 }
0x10f9   :  { %5794 = vmatmul.mubr.msk.bf16.vlgmr.msra.gmra.mrb[44].mxu1 %vm99_vm0, %v2079_v27  ;;  %v69_v27 = vand.u32 127, %v66_v7 }
0x10fa   :  { %5799 = vmatprep.mubr.msk.bf16.mxu1 %vm6409_vm1, %v6408_v11 }
0x10fb   :  { %vm70_vm9 = vcmp.gt.s32.totalorder %v69_v27, %v6539_v8 }
0x10fc   :  { %v6970_v22 = vsel %vm70_vm9, -1e+09, %v6408_v11 }
0x11c4   :  { %v5775_v62 = vpop.f32.mrb[40].mxu1 }
0x11c5   :  { %v1868_v0 = vadd.f32 %v5775_v62, %v1806_v61  ;;  %v1859_v1 = vpop.f32.mrb[41].mxu1 }
0x11c6   :  { %v1860_v5 = vadd.f32 %v1859_v1, %v1806_v61  ;;  %v5776_v13 = vpop.f32.mrb[42].mxu1 }
0x11c7   :  { %v1862_v26 = vpop.f32.mrb[43].mxu1  ;;  %v1875_v17 = vmax.f32 %v1868_v0, 0.0 }
0x11c8   :  { %v1863_v16 = vadd.f32 %v1862_v26, %v1806_v61  ;;  %v1873_v2 = vmax.f32 %v1860_v5, 0.0 }
0x11c9   :  { %v1877_v21 = vpack.c.bf16 %v1875_v17, %v1875_v17 }
0x11ca   :  { %v1874_v30 = vmax.f32 %v1863_v16, 0.0 }
0x11cc   :  { %v1876_v19 = vpack.c.bf16 %v1874_v30, %v1873_v2  ;;  %v2133_v20 = vpop.f32.mrb[44].mxu1 }
0x11cd   :  { %v2134_v23 = vadd.f32 %v2133_v20, %v2083_v18  ;;  %v5795_v24 = vpop.f32.mrb[45].mxu1 }
0x11ce   :  { %5785 = vmatprep.mubr.msk.bf16.mxu0 %vm935_vm8, %v1876_v19  ;;  %v2136_v25 = vpop.f32.mrb[46].mxu1 }
0x11cf   :  { %v2140_v29 = vmul.f32 0.25, %v2134_v23  ;;  %v6918_v31 = vpack.c.bf16 %v2134_v23, %v2134_v23  ;;  %v2137_v3 = vadd.f32 %v2136_v25, %v2083_v18  ;;  %5786 = vmatmul.mubr.msk.bf16.vlgmr.msra.gmra.mrb[48].mxu0 %vm935_vm8, %v1877_v21  ;;  %v5796_v4 = vpop.f32.mrb[47].mxu1 }
0x11d0   :  { %5805 = vmatprep.mubr.msk.bf16.mxu0 %vm6409_vm1, %v6408_v11 }
0x11d1   :  { %2257 = vrot.lane.b32.xlu0 %v6918_v31, %s6412_s30  ;;  %2144 = vrot.lane.b32.xlu1 %v6918_v31, %s6410_s27  ;;  %v2141_v32 = vpack.c.bf16 %v2140_v29, %v2140_v29  ;;  %v6927_v33 = vpack.c.bf16 %v2137_v3, %v2137_v3  ;;  %v2370_v34 = vmul.f32 0.25, %v2137_v3 }
0x11d3   :  { %v2371_v35 = vpack.c.bf16 %v2370_v34, %v2370_v34 }
0x11d5   :  { %2255 = vrot.lane.b32.xlu1 %v2141_v32, %s6411_s28  ;;  %2485 = vrot.lane.b32.xlu0 %v6927_v33, %s6412_s30 }
0x11d9   :  { %2374 = vrot.lane.b32.xlu1 %v6927_v33, %s6410_s27 }
0x11dd   :  { %2483 = vrot.lane.b32.xlu1 %v2371_v35, %s6411_s28 }
0x1243   :  { %v2145_v45 = vpop.permute.xlu1 %2144  ;;  %v2258_v36 = vpop.permute.xlu0 %2257 }
0x1244   :  { %v2150_v41 = vsel %vm161_vm2, %v2145_v45, 0  ;;  %v2263_v38 = vsel %vm161_vm2, %v2258_v36, 0 }
0x1245   :  { %5798 = vmatpush3.bf16.xpose.msra.mxu1 %v2150_v41 }
0x1246   :  { %5809 = vmatprep.subr.bf16.mxu1 %v6408_v11 }
0x1247   :  { %v2256_v37 = vpop.permute.xlu1 %2255  ;;  %v2486_v42 = vpop.permute.xlu0 %2485 }
0x1248   :  { %v2491_v43 = vsel %vm161_vm2, %v2486_v42, 0 }
0x124b   :  { %v2375_v39 = vpop.permute.xlu1 %2374 }
0x124c   :  { %5800 = vmatmul.mubr.msk.bf16.vlgmr.msra.gmra.mrb[48].mxu1 %vm161_vm2, %v2141_v32  ;;  %v2380_v40 = vsel %vm161_vm2, %v2375_v39, 0 }
0x124d   :  { %5810 = vmatpush3.bf16.xpose.msra.mxu1 %v2263_v38  ;;  %5811 = vmatprep.mubr.msk.bf16.mxu1 %vm6409_vm1, %v6408_v11 }
0x124e   :  { %5821 = vmatprep.subr.bf16.mxu1 %v6408_v11 }
0x124f   :  { %v2484_v44 = vpop.permute.xlu1 %2483 }
0x1254   :  { %5812 = vmatmul.mubr.msk.bf16.vlgmr.msra.gmra.mrb[52].mxu1 %vm161_vm2, %v2256_v37 }
0x1255   :  { %5822 = vmatpush3.bf16.xpose.msra.mxu1 %v2380_v40  ;;  %5823 = vmatprep.mubr.msk.bf16.mxu1 %vm6409_vm1, %v6408_v11 }
0x1256   :  { %5833 = vmatprep.subr.bf16.mxu1 %v6408_v11 }
0x125c   :  { %5824 = vmatmul.mubr.msk.bf16.vlgmr.msra.gmra.mrb[56].mxu1 %vm161_vm2, %v2371_v35 }
0x125d   :  { %5834 = vmatpush3.bf16.xpose.msra.mxu1 %v2491_v43  ;;  %5835 = vmatprep.mubr.msk.bf16.mxu1 %vm6409_vm1, %v6408_v11 }
0x125e   :  { %5845 = vmatprep.subr.bf16.mxu1 %v6408_v11 }
0x1264   :  { %5836 = vmatmul.mubr.msk.bf16.vlgmr.msra.gmra.mrb[60].mxu1 %vm161_vm2, %v2484_v44 }
0x1265   :  { %5849 = vmatprep.mubr.msk.bf16.mxu1 %vm6409_vm1, %v6408_v11 }
0x12a2   :  { %v5787_v47 = vpop.f32.mrb[48].mxu0 }
0x12a3   :  { %v6960_v48 = vadd.f32 %v5787_v47, %v6957_v46  ;;  %v6962_v53 = vpop.f32.mrb[49].mxu0 }
0x12a4   :  { %v5788_v55 = vpop.f32.mrb[50].mxu0 }
0x12a5   :  { %v1949_v56 = vpop.f32.mrb[51].mxu0 }
0x12a6   :  { %v6965_v57 = vadd.f32 %v1949_v56, %v6957_v46 }
0x131f   :  { %v2186_v10 = vpop.f32.mrb[48].mxu1 }
0x1320   :  { %v2187_v60 = vadd.f32 %v2186_v10, %v6970_v22  ;;  %v5801_v61 = vpop.f32.mrb[49].mxu1 }
0x1321   :  { %v2189_v62 = vpop.f32.mrb[50].mxu1  ;;  %v1947_v61 = vadd.f32 %v6962_v53, %v6957_v46 }
0x1322   :  { %v5802_v0 = vpop.f32.mrb[51].mxu1  ;;  %v2193_v1 = vsel %vm2192_vm10, %v2187_v60, -inf }
0x1323   :  { %2194 = vmax.xlane.f32.xlu0 %v2193_v1  ;;  %v1960_v62 = vadd.f32 %v1947_v61, %v6864_v50 }
0x1325   :  { %v1963_v0 = vsel %vm99_vm0, %v1960_v62, 0.0 }
0x1327   :  { %v2299_v5 = vpop.f32.mrb[52].mxu1 }
0x1328   :  { %v2300_v13 = vadd.f32 %v2299_v5, %v6970_v22  ;;  %v5813_v26 = vpop.f32.mrb[53].mxu1 }
0x1329   :  { %v2302_v7 = vpop.f32.mrb[54].mxu1 }
0x132a   :  { %v5814_v16 = vpop.f32.mrb[55].mxu1  ;;  %v2305_v8 = vsel %vm2192_vm10, %v2300_v13, -inf }
0x132b   :  { %2306 = vmax.xlane.f32.xlu1 %v2305_v8 }
0x132f   :  { %v2416_v17 = vpop.f32.mrb[56].mxu1 }
0x1330   :  { %v2417_v18 = vadd.f32 %v2416_v17, %v6970_v22  ;;  %v5825_v2 = vpop.f32.mrb[57].mxu1 }
0x1331   :  { %v2419_v30 = vpop.f32.mrb[58].mxu1 }
0x1332   :  { %v5826_v19 = vpop.f32.mrb[59].mxu1  ;;  %v2422_v20 = vsel %vm2192_vm10, %v2417_v18, -inf }
0x1333   :  { %2423 = vmax.xlane.f32.xlu0 %v2422_v20 }
0x1337   :  { %v2527_v21 = vpop.f32.mrb[60].mxu1 }
0x1338   :  { %v2528_v23 = vadd.f32 %v2527_v21, %v6970_v22  ;;  %v5837_v24 = vpop.f32.mrb[61].mxu1 }
0x1339   :  { %v2530_v25 = vpop.f32.mrb[62].mxu1 }
0x133a   :  { %v5838_v29 = vpop.f32.mrb[63].mxu1  ;;  %v2533_v3 = vsel %vm2192_vm10, %v2528_v23, -inf }
0x133b   :  { %2534 = vmax.xlane.f32.xlu0 %v2533_v3 }
0x13b0   :  { %v2195_v4 = vpop.xlane.xlu0 %2194 }
0x13b1   :  { %v2196_v32 = vsub.f32 %v2187_v60, %v2195_v4 }
0x13b3   :  { %v2197_v34 = vmul.f32 1.442695, %v2196_v32 }
0x13b5   :  { %6293 = vpow2.f32 %v2197_v34 }
0x13b8   :  { %v2307_v35 = vpop.xlane.xlu1 %2306 }
0x13b9   :  { %v2308_v45 = vsub.f32 %v2300_v13, %v2307_v35 }
0x13bb   :  { %v2309_v41 = vmul.f32 1.442695, %v2308_v45 }
0x13bd   :  { %6295 = vpow2.f32 %v2309_v41  ;;  %v6179_v41 = vld [vmem:[%s7604_s8] sm:$0xff]  }
0x13be   :  { %5846 = vmatpush3.bf16.msra.mxu1 %v6179_v41 }
0x13bf   :  { %v6294_v36 = vpop.eup %6293  ;;  %5847 = vmatprep.subr.bf16.mxu1 %v6408_v11 }
0x13c0   :  { %v2199_v37 = vsel %vm2192_vm10, %v6294_v36, 0.0  ;;  %v2424_v38 = vpop.xlane.xlu0 %2423 }
0x13c1   :  { %2200 = vadd.xlane.f32.xlu1 %v2199_v37  ;;  %v2425_v56 = vsub.f32 %v2417_v18, %v2424_v38 }
0x13c3   :  { %v2426_v27 = vmul.f32 1.442695, %v2425_v56 }
0x13c7   :  { %v6296_v39 = vpop.eup %6295 }
0x13c8   :  { %v2535_v40 = vpop.xlane.xlu0 %2534  ;;  %v2311_v42 = vsel %vm2192_vm10, %v6296_v39, 0.0 }
0x13c9   :  { %v2536_v43 = vsub.f32 %v2528_v23, %v2535_v40  ;;  %2312 = vadd.xlane.f32.xlu0 %v2311_v42 }
0x13cb   :  { %v2537_v44 = vmul.f32 1.442695, %v2536_v43 }
0x13cd   :  { %6297 = vpow2.f32 %v2537_v44 }
0x13ce   :  { %6299 = vpow2.f32 %v2426_v27 }
0x13d2   :  { %2205 = vrot.lane.b32.xlu1 %v6918_v31, %s6413_s2 }
0x13d7   :  { %v6298_v47 = vpop.eup %6297 }
0x13d8   :  { %v2539_v55 = vsel %vm2192_vm10, %v6298_v47, 0.0  ;;  %v6300_v10 = vpop.eup %6299 }
0x13d9   :  { %2540 = vadd.xlane.f32.xlu0 %v2539_v55  ;;  %v2428_v60 = vsel %vm2192_vm10, %v6300_v10, 0.0 }
0x13ef   :  { %2317 = vrot.lane.b32.xlu0 %v6918_v31, %s6414_s19 }
0x13f6   :  { %2429 = vadd.xlane.f32.xlu1 %v2428_v60 }
0x1407   :  { %2434 = vrot.lane.b32.xlu1 %v6927_v33, %s6413_s2 }
0x140b   :  { %2545 = vrot.lane.b32.xlu1 %v6927_v33, %s6414_s19 }
0x142f   :  { %1964 = vadd.xlane.f32.xlu1 %v1963_v0 }
0x144e   :  { %v2201_v1 = vpop.xlane.xlu1 %2200 }
0x144f   :  { %6301 = vrcp.f32 %v2201_v1 }
0x1452   :  { %v2206_v31 = vpop.permute.xlu1 %2205 }
0x1453   :  { %v2212_v5 = vsel %vm2210_vm11, %v2206_v31, 0  ;;  %v1961_v31 = vadd.f32 %v6965_v57, %v6866_v52 }
0x1454   :  { %5804 = vmatpush3.bf16.msra.mxu0 %v2212_v5 }
0x1455   :  { %5815 = vmatprep.subr.bf16.mxu0 %v6408_v11  ;;  %v1966_v5 = vsel %vm99_vm0, %v1961_v31, 0.0 }
0x1456   :  { %v2313_v26 = vpop.xlane.xlu0 %2312 }
0x1457   :  { %6303 = vrcp.f32 %v2313_v26 }
0x1459   :  { %v6302_v13 = vpop.eup %6301 }
0x145a   :  { %v2203_v33 = vmul.f32 %v6302_v13, %v6294_v36  ;;  %v1962_v13 = vadd.f32 %v6960_v48, %v6870_v54  ;;  %v6405_v48 = vld [vmem:[%s7624_s26 + $0x8] sm:$0xff] }
0x145c   :  { %v2204_v7 = vpack.c.bf16 %v2203_v33, %v2203_v33  ;;  %v1969_v26 = vsel %vm769_vm7, %v1962_v13, 0.0 }
0x145e   :  { %5806 = vmatmul.mubr.msk.bf16.vlgmr.msra.gmra.mrb[52].mxu0 %vm2192_vm10, %v2204_v7 }
0x145f   :  { %5817 = vmatprep.mubr.msk.bf16.mxu0 %vm6409_vm1, %v6408_v11 }
0x1461   :  { %v6304_v50 = vpop.eup %6303 }
0x1462   :  { %v2315_v53 = vmul.f32 %v6304_v50, %v6296_v39 }
0x1464   :  { %v2316_v17 = vpack.c.bf16 %v2315_v53, %v2315_v53 }
0x1466   :  { %v2541_v46 = vpop.xlane.xlu0 %2540 }
0x146a   :  { %v2318_v16 = vpop.permute.xlu0 %2317 }
0x146b   :  { %v2323_v8 = vsel %vm2210_vm11, %v2318_v16, 0 }
0x146c   :  { %5816 = vmatpush3.bf16.msra.mxu0 %v2323_v8 }
0x146d   :  { %5827 = vmatprep.subr.bf16.mxu0 %v6408_v11 }
0x146f   :  { %5818 = vmatmul.mubr.msk.bf16.vlgmr.msra.gmra.mrb[56].mxu0 %vm2192_vm10, %v2316_v17 }
0x1470   :  { %5829 = vmatprep.mubr.msk.bf16.mxu0 %vm6409_vm1, %v6408_v11 }
0x1483   :  { %v2430_v18 = vpop.xlane.xlu1 %2429 }
0x1484   :  { %6305 = vrcp.f32 %v2430_v18  ;;  %v2005_v18 = vrot.slane %v6405_v48, %v6718_v6 }
0x1485   :  { %6307 = vrcp.f32 %v2541_v46 }
0x1487   :  { %v2435_v2 = vpop.permute.xlu1 %2434 }
0x1488   :  { %v2440_v30 = vsel %vm2210_vm11, %v2435_v2, 0 }
0x1489   :  { %5828 = vmatpush3.bf16.msra.mxu0 %v2440_v30 }
0x148a   :  { %5839 = vmatprep.subr.bf16.mxu0 %v6408_v11 }
0x148b   :  { %v2546_v21 = vpop.permute.xlu1 %2545 }
0x148c   :  { %v2551_v25 = vsel %vm2210_vm11, %v2546_v21, 0  ;;  %v2012_v21 = vrot.slane %v6405_v48, %v6723_v14 }
0x148e   :  { %v6306_v19 = vpop.eup %6305 }
0x148f   :  { %v2432_v20 = vmul.f32 %v6306_v19, %v6300_v10  ;;  %v6308_v24 = vpop.eup %6307 }
0x1490   :  { %v2543_v29 = vmul.f32 %v6308_v24, %v6298_v47  ;;  %v6180_v47 = vld [vmem:[%s7604_s8 + $0x8] sm:$0xff]  }
0x1491   :  { %v2433_v23 = vpack.c.bf16 %v2432_v20, %v2432_v20  ;;  %5848 = vmatpush3.bf16.msra.mxu1 %v6180_v47 }
0x1492   :  { %v2544_v3 = vpack.c.bf16 %v2543_v29, %v2543_v29 }
0x1493   :  { %5830 = vmatmul.mubr.msk.bf16.vlgmr.msra.gmra.mrb[60].mxu0 %vm2192_vm10, %v2433_v23 }
0x1494   :  { %5840 = vmatpush3.bf16.msra.mxu0 %v2551_v25  ;;  %5841 = vmatprep.mubr.msk.bf16.mxu0 %vm6409_vm1, %v6408_v11 }
0x1495   :  { %5853 = vmatprep.subr.bf16.mxu0 %v6408_v11 }
0x149b   :  { %5842 = vmatmul.mubr.msk.bf16.vlgmr.msra.gmra.mrb[64].mxu0 %vm2192_vm10, %v2544_v3 }
0x149c   :  { %5857 = vmatprep.mubr.msk.bf16.mxu0 %vm6409_vm1, %v6408_v11 }
0x14bc   :  { %v1965_v4 = vpop.xlane.xlu1 %1964 }
0x14bd   :  { %v1972_v32 = vmul.f32 0.03125, %v1965_v4 }
0x14bf   :  { %v1975_v34 = vsub.f32 %v1960_v62, %v1972_v32 }
0x14c1   :  { %v1978_v35 = vmul.f32 %v1975_v34, %v1975_v34 }
0x14c3   :  { %v1981_v45 = vsel %vm99_vm0, %v1978_v35, 0.0 }
0x14c4   :  { %1982 = vadd.xlane.f32.xlu1 %v1981_v45 }
0x1531   :  { %v2248_v36 = vpop.f32.mrb[52].mxu0 }
0x1532   :  { %v5807_v37 = vpop.f32.mrb[53].mxu0 }
0x1533   :  { %v2251_v38 = vpop.f32.mrb[54].mxu0 }
0x1534   :  { %v5808_v39 = vpop.f32.mrb[55].mxu0 }
0x1542   :  { %v2359_v40 = vpop.f32.mrb[56].mxu0 }
0x1543   :  { %v5819_v42 = vpop.f32.mrb[57].mxu0 }
0x1544   :  { %v2362_v43 = vpop.f32.mrb[58].mxu0 }
0x1545   :  { %v5820_v44 = vpop.f32.mrb[59].mxu0 }
0x1551   :  { %v1983_v52 = vpop.xlane.xlu1 %1982 }
0x1552   :  { %v1990_v57 = vmul.f32 0.03125, %v1983_v52 }
0x1554   :  { %v1993_v8 = vadd.f32 1e-05, %v1990_v57 }
0x1556   :  { %6309 = vrsqrt.f32 %v1993_v8 }
0x1560   :  { %v6310_v17 = vpop.eup %6309 }
0x1561   :  { %v1999_v54 = vmul.f32 %v6310_v17, %v1975_v34 }
0x1563   :  { %v2006_v20 = vmul.f32 %v2005_v18, %v1999_v54 }
0x1565   :  { %v2013_v4 = vadd.f32 %v2012_v21, %v2006_v20 }
0x1566   :  { %v2476_v55 = vpop.f32.mrb[60].mxu0 }
0x1567   :  { %v5831_v56 = vpop.f32.mrb[61].mxu0  ;;  %v2016_v35 = vsel %vm99_vm0, %v2013_v4, 0.0 }
0x1568   :  { %v2479_v27 = vpop.f32.mrb[62].mxu0 }
0x1569   :  { %v5832_v10 = vpop.f32.mrb[63].mxu0 }
0x156e   :  { %v2587_v60 = vpop.f32.mrb[64].mxu0 }
0x156f   :  { %v6137_v61 = vpack.i.bf16 %v2587_v60, %v2359_v40  ;;  %v5843_v62 = vpop.f32.mrb[65].mxu0 }
0x1570   :  { %v2590_v0 = vpop.f32.mrb[66].mxu0 }
0x1571   :  { %6138 = vrot.lane.b32.xlu0 %v6137_v61, %s7625_s23  ;;  %v5844_v1 = vpop.f32.mrb[67].mxu0 }
0x1590   :  { %1967 = vadd.xlane.f32.xlu0 %v1966_v5 }
0x1594   :  { %1970 = vadd.xlane.f32.xlu0 %v1969_v26 }
0x15e3   :  { %v6139_v33 = vpop.permute.xlu0 %6138 }
0x15e4   :  { %v6141_v7 = vunpack.i.h.bf16 %v6139_v33  ;;  %v6140_v50 = vunpack.i.l.bf16 %v6139_v33 }
0x15e6   :  { %v2597_v46 = vsel %vm161_vm2, %v2476_v55, %v6141_v7  ;;  %v2369_v53 = vsel %vm161_vm2, %v2248_v36, %v6140_v50  ;;  %v2602_v55 = vrot.slane %v6913_v15, %v6646_v63 }
0x15e7   :  { %v2598_v16 = vpack.c.bf16 %v2597_v46, %v2369_v53 }
0x15e9   :  { %5850 = vmatmul.mubr.msk.bf16.vlgmr.msra.gmra.mrb[64].mxu1 %vm99_vm0, %v2598_v16 }
0x161d   :  { %v1968_v2 = vpop.xlane.xlu0 %1967 }
0x161e   :  { %v1973_v30 = vmul.f32 0.03125, %v1968_v2 }
0x1620   :  { %v1976_v19 = vsub.f32 %v1961_v31, %v1973_v30 }
0x1621   :  { %v1971_v23 = vpop.xlane.xlu0 %1970 }
0x1622   :  { %v1974_v24 = vmul.f32 0.03125, %v1971_v23  ;;  %v1979_v25 = vmul.f32 %v1976_v19, %v1976_v19 }
0x1624   :  { %v1977_v29 = vsub.f32 %v1962_v13, %v1974_v24  ;;  %v1984_v3 = vsel %vm99_vm0, %v1979_v25, 0.0 }
0x1625   :  { %1985 = vadd.xlane.f32.xlu0 %v1984_v3 }
0x1626   :  { %v1980_v32 = vmul.f32 %v1977_v29, %v1977_v29 }
0x1628   :  { %v1987_v34 = vsel %vm769_vm7, %v1980_v32, 0.0 }
0x1629   :  { %1988 = vadd.xlane.f32.xlu1 %v1987_v34  ;;  %2017 = vadd.xlane.f32.xlu0 %v2016_v35  ;;  %v6181_v35 = vld [vmem:[%s7605_s10] sm:$0xff]  }
0x162a   :  { %5861 = vmatprep.subr.bf16.mxu1 %v6181_v35 }
0x162b   :  { %5862 = vmatpush3.bf16.msra.mxu1 %v6181_v35 }
0x16b2   :  { %v1986_v45 = vpop.xlane.xlu0 %1985 }
0x16b3   :  { %v1991_v41 = vmul.f32 0.03125, %v1986_v45  ;;  %v6182_v45 = vld [vmem:[%s7605_s10 + $0x8] sm:$0xff]  }
0x16b4   :  { %5863 = vmatprep.subr.bf16.mxu1 %v6182_v45 }
0x16b5   :  { %v1994_v36 = vadd.f32 1e-05, %v1991_v41  ;;  %v6183_v41 = vld [vmem:[%s7606_s9] sm:$0xff]   ;;  %5864 = vmatpush3.bf16.msra.mxu1 %v6182_v45 }
0x16b6   :  { %v1989_v37 = vpop.xlane.xlu1 %1988  ;;  %v2018_v47 = vpop.xlane.xlu0 %2017  ;;  %5854 = vmatpush3.bf16.msra.mxu0 %v6183_v41  ;;  %5875 = vmatprep.subr.bf16.mxu1 %v6408_v11 }
0x16b7   :  { %6311 = vrsqrt.f32 %v1994_v36  ;;  %v1992_v38 = vmul.f32 0.03125, %v1989_v37  ;;  %v2025_v10 = vmul.f32 0.03125, %v2018_v47  ;;  %5855 = vmatprep.subr.bf16.mxu0 %v6408_v11  ;;  %v6184_v36 = vld [vmem:[%s7606_s9 + $0x8] sm:$0xff]  }
0x16b9   :  { %v1995_v39 = vadd.f32 1e-05, %v1992_v38  ;;  %v7044_v31 = vsub.f32 %v2013_v4, %v2025_v10 }
0x16ba   :  { %5856 = vmatpush3.bf16.msra.mxu0 %v6184_v36 }
0x16bb   :  { %6313 = vrsqrt.f32 %v1995_v39  ;;  %v2031_v16 = vmul.f32 %v7044_v31, %v7044_v31  ;;  %5869 = vmatprep.subr.bf16.mxu0 %v6408_v11 }
0x16bc   :  { %v2652_v40 = vpop.f32.mrb[64].mxu1 }
0x16bd   :  { %v5851_v42 = vpop.f32.mrb[65].mxu1  ;;  %v2653_v60 = vadd.f32 %v2652_v40, %v2602_v55  ;;  %v2034_v52 = vsel %vm99_vm0, %v2031_v16, 0.0 }
0x16be   :  { %v2655_v43 = vpop.f32.mrb[66].mxu1 }
0x16bf   :  { %v5852_v44 = vpop.f32.mrb[67].mxu1  ;;  %v2659_v5 = vadd.f32 %v2653_v60, %v6887_v58  ;;  %v2656_v13 = vadd.f32 %v2655_v43, %v2602_v55 }
0x16c1   :  { %v6312_v56 = vpop.eup %6311  ;;  %v2660_v50 = vadd.f32 %v2656_v13, %v6892_v59  ;;  %v2661_v46 = vsel %vm99_vm0, %v2659_v5, 0.0 }
0x16c2   :  { %v2000_v27 = vmul.f32 %v6312_v56, %v1976_v19 }
0x16c3   :  { %v2664_v58 = vsel %vm99_vm0, %v2660_v50, 0.0 }
0x16c4   :  { %v2007_v61 = vmul.f32 %v2005_v18, %v2000_v27 }
0x16c5   :  { %v6314_v62 = vpop.eup %6313 }
0x16c6   :  { %v2014_v0 = vadd.f32 %v2012_v21, %v2007_v61  ;;  %v2001_v1 = vmul.f32 %v6314_v62, %v1977_v29 }
0x16c8   :  { %v2019_v26 = vsel %vm99_vm0, %v2014_v0, 0.0  ;;  %v2008_v33 = vmul.f32 %v2005_v18, %v2001_v1 }
0x16c9   :  { %2020 = vadd.xlane.f32.xlu1 %v2019_v26 }
0x16ca   :  { %v2015_v7 = vadd.f32 %v2012_v21, %v2008_v33 }
0x16cc   :  { %v2022_v53 = vsel %vm769_vm7, %v2015_v7, 0.0 }
0x16cd   :  { %2662 = vadd.xlane.f32.xlu1 %v2661_v46  ;;  %2023 = vadd.xlane.f32.xlu0 %v2022_v53 }
0x16d1   :  { %2035 = vadd.xlane.f32.xlu1 %v2034_v52  ;;  %2665 = vadd.xlane.f32.xlu0 %v2664_v58  ;;  %v2690_v52 = vrot.slane %v6913_v15, %v6672_v49 }
0x1756   :  { %v2021_v57 = vpop.xlane.xlu1 %2020 }
0x1757   :  { %v2026_v8 = vmul.f32 0.03125, %v2021_v57 }
0x1759   :  { %v7055_v17 = vsub.f32 %v2014_v0, %v2026_v8  ;;  %v65_v0 = vld [vmem:[%s7607_s15] sm:$0xf] }
0x175a   :  { %v2024_v59 = vpop.xlane.xlu0 %2023  ;;  %v2663_v54 = vpop.xlane.xlu1 %2662  ;;  %v2058_v13 = vrot.slane %v65_v0, %v6542_v9 }
0x175b   :  { %v2027_v48 = vmul.f32 0.03125, %v2024_v59  ;;  %v2667_v18 = vmul.f32 0.03125, %v2663_v54  ;;  %v2032_v2 = vmul.f32 %v7055_v17, %v7055_v17 }
0x175d   :  { %v7059_v30 = vsub.f32 %v2015_v7, %v2027_v48  ;;  %v7061_v19 = vsub.f32 %v2659_v5, %v2667_v18  ;;  %v2037_v20 = vsel %vm99_vm0, %v2032_v2, 0.0  ;;  %v2696_v2 = vrot.slane %v6913_v15, %v6677_v51 }
0x175e   :  { %v2666_v21 = vpop.xlane.xlu0 %2665  ;;  %2038 = vadd.xlane.f32.xlu0 %v2037_v20  ;;  %v2036_v37 = vpop.xlane.xlu1 %2035 }
0x175f   :  { %v2668_v23 = vmul.f32 0.03125, %v2666_v21  ;;  %v2033_v24 = vmul.f32 %v7059_v30, %v7059_v30  ;;  %v2671_v25 = vmul.f32 %v7061_v19, %v7061_v19  ;;  %v2043_v38 = vmul.f32 0.03125, %v2036_v37 }
0x1761   :  { %v7068_v29 = vsub.f32 %v2660_v50, %v2668_v23  ;;  %v2040_v3 = vsel %vm769_vm7, %v2033_v24, 0.0  ;;  %v2673_v4 = vsel %vm99_vm0, %v2671_v25, 0.0  ;;  %v2046_v39 = vadd.f32 1e-05, %v2043_v38 }
0x1762   :  { %2041 = vadd.xlane.f32.xlu1 %v2040_v3  ;;  %2674 = vadd.xlane.f32.xlu0 %v2673_v4  ;;  %v2065_v50 = vrot.slane %v65_v0, %v6646_v63  ;;  %v2777_v25 = vrot.slane %v6913_v15, %v6700_v28  ;;  %v2715_v3 = vrot.slane %v6913_v15, %v6691_v12 }
0x1763   :  { %v2672_v32 = vmul.f32 %v7068_v29, %v7068_v29  ;;  %6315 = vrsqrt.f32 %v2046_v39 }
0x1765   :  { %v2676_v34 = vsel %vm99_vm0, %v2672_v32, 0.0 }
0x1766   :  { %2677 = vadd.xlane.f32.xlu1 %v2676_v34 }
0x176d   :  { %v6316_v61 = vpop.eup %6315 }
0x176e   :  { %v2052_v5 = vmul.f32 %v6316_v61, %v7044_v31 }
0x1770   :  { %v2059_v7 = vmul.f32 %v2058_v13, %v2052_v5 }
0x1772   :  { %v2066_v57 = vadd.f32 %v2065_v50, %v2059_v7 }
0x17eb   :  { %v2039_v40 = vpop.xlane.xlu0 %2038 }
0x17ec   :  { %v2044_v42 = vmul.f32 0.03125, %v2039_v40 }
0x17ee   :  { %v2047_v43 = vadd.f32 1e-05, %v2044_v42 }
0x17ef   :  { %v2675_v44 = vpop.xlane.xlu0 %2674  ;;  %v2042_v47 = vpop.xlane.xlu1 %2041 }
0x17f0   :  { %6317 = vrsqrt.f32 %v2047_v43  ;;  %v2679_v55 = vmul.f32 0.03125, %v2675_v44  ;;  %v2045_v56 = vmul.f32 0.03125, %v2042_v47 }
0x17f2   :  { %v2681_v27 = vadd.f32 1e-05, %v2679_v55  ;;  %v2048_v10 = vadd.f32 1e-05, %v2045_v56 }
0x17f3   :  { %v2678_v60 = vpop.xlane.xlu1 %2677 }
0x17f4   :  { %6319 = vrsqrt.f32 %v2681_v27  ;;  %v2680_v62 = vmul.f32 0.03125, %v2678_v60 }
0x17f5   :  { %6321 = vrsqrt.f32 %v2048_v10 }
0x17f6   :  { %v2682_v1 = vadd.f32 1e-05, %v2680_v62 }
0x17f8   :  { %6323 = vrsqrt.f32 %v2682_v1 }
0x17fa   :  { %v6318_v26 = vpop.eup %6317 }
0x17fb   :  { %v2053_v33 = vmul.f32 %v6318_v26, %v7055_v17 }
0x17fd   :  { %v2060_v46 = vmul.f32 %v2058_v13, %v2053_v33 }
0x17fe   :  { %v6320_v53 = vpop.eup %6319 }
0x17ff   :  { %v6322_v16 = vpop.eup %6321  ;;  %v2685_v58 = vmul.f32 %v6320_v53, %v7061_v19  ;;  %v2067_v8 = vadd.f32 %v2065_v50, %v2060_v46 }
0x1800   :  { %v2054_v31 = vmul.f32 %v6322_v16, %v7059_v30 }
0x1801   :  { %v7101_v59 = vpack.c.bf16 %v2067_v8, %v2066_v57  ;;  %v2691_v17 = vmul.f32 %v2690_v52, %v2685_v58 }
0x1802   :  { %v6324_v54 = vpop.eup %6323  ;;  %v2061_v48 = vmul.f32 %v2058_v13, %v2054_v31 }
0x1803   :  { %v2686_v18 = vmul.f32 %v6324_v54, %v7068_v29  ;;  %5865 = vmatprep.mubr.msk.bf16.mxu1 %vm99_vm0, %v7101_v59  ;;  %v7110_v23 = vadd.f32 %v2696_v2, %v2691_v17 }
0x1804   :  { %v2068_v20 = vadd.f32 %v2065_v50, %v2061_v48 }
0x1805   :  { %v2692_v21 = vmul.f32 %v2690_v52, %v2686_v18 }
0x1806   :  { %v7108_v19 = vpack.c.bf16 %v2068_v20, %v2068_v20 }
0x1807   :  { %v7112_v30 = vadd.f32 %v2696_v2, %v2692_v21 }
0x1808   :  { %5866 = vmatmul.mubr.msk.bf16.vlgmr.msra.gmra.mrb[68].mxu1 %vm99_vm0, %v7108_v19 }
0x1809   :  { %v2711_v24 = vpack.c.bf16 %v7112_v30, %v7110_v23  ;;  %5877 = vmatprep.mubr.msk.bf16.mxu1 %vm6409_vm1, %v6408_v11 }
0x180b   :  { %5858 = vmatmul.mubr.msk.bf16.vlgmr.msra.gmra.mrb[68].mxu0 %vm99_vm0, %v2711_v24 }
0x180c   :  { %5871 = vmatprep.mubr.msk.bf16.mxu0 %vm6409_vm1, %v6408_v11 }
0x18db   :  { %v5867_v29 = vpop.f32.mrb[68].mxu1 }
0x18dc   :  { %v2830_v4 = vpop.f32.mrb[69].mxu1  ;;  %v2839_v45 = vadd.f32 %v5867_v29, %v2777_v25 }
0x18dd   :  { %v5868_v32 = vpop.f32.mrb[70].mxu1  ;;  %v2831_v41 = vadd.f32 %v2830_v4, %v2777_v25 }
0x18de   :  { %v2833_v34 = vpop.f32.mrb[71].mxu1  ;;  %v2765_v35 = vpop.f32.mrb[68].mxu0 }
0x18df   :  { %v2834_v36 = vadd.f32 %v2833_v34, %v2777_v25  ;;  %v2766_v37 = vadd.f32 %v2765_v35, %v2715_v3  ;;  %v5859_v38 = vpop.f32.mrb[69].mxu0 }
0x18e0   :  { %v2768_v39 = vpop.f32.mrb[70].mxu0 }
0x18e1   :  { %v7127_v40 = vpack.c.bf16 %v2834_v36, %v2831_v41  ;;  %v3072_v42 = vpack.c.bf16 %v2839_v45, %v2834_v36  ;;  %v2844_v43 = vmul.f32 0.25, %v2766_v37  ;;  %v2769_v44 = vadd.f32 %v2768_v39, %v2715_v3  ;;  %v5860_v47 = vpop.f32.mrb[71].mxu0 }
0x18e3   :  { %v2845_v55 = vpack.c.bf16 %v2844_v43, %v2844_v43  ;;  %v3070_v56 = vmul.f32 0.25, %v2769_v44  ;;  %2957 = vrot.lane.b32.xlu0 %v7127_v40, %s6411_s28  ;;  %v2851_v15 = vsel %vm161_vm2, %v7127_v40, 0  ;;  %v7135_v10 = vrot.slane %v3072_v42, 1 }
0x18e4   :  { %5870 = vmatpush3.bf16.xpose.msra.mxu0 %v2851_v15 }
0x18e5   :  { %v3071_v27 = vpack.c.bf16 %v3070_v56, %v3070_v56  ;;  %2955 = vrot.lane.b32.xlu1 %v2845_v55, %s6411_s28  ;;  %5881 = vmatprep.subr.bf16.mxu0 %v6408_v11  ;;  %v3079_v0 = vsel %vm161_vm2, %v7135_v10, 0 }
0x18e7   :  { %3182 = vrot.lane.b32.xlu0 %v3071_v27, %s6411_s28 }
0x18e9   :  { %3184 = vrot.lane.b32.xlu1 %v7135_v10, %s6411_s28 }
0x18eb   :  { %5872 = vmatmul.mubr.msk.bf16.vlgmr.msra.gmra.mrb[72].mxu0 %vm161_vm2, %v2845_v55 }
0x18ec   :  { %5883 = vmatprep.mubr.msk.bf16.mxu0 %vm6409_vm1, %v6408_v11 }
0x1955   :  { %v2958_v60 = vpop.permute.xlu0 %2957 }
0x1956   :  { %v2963_v61 = vsel %vm161_vm2, %v2958_v60, 0 }
0x1957   :  { %5882 = vmatpush3.bf16.xpose.msra.mxu0 %v2963_v61  ;;  %v2956_v62 = vpop.permute.xlu1 %2955 }
0x1958   :  { %5893 = vmatprep.subr.bf16.mxu0 %v6408_v11 }
0x1959   :  { %v3183_v13 = vpop.permute.xlu0 %3182 }
0x195b   :  { %v3185_v1 = vpop.permute.xlu1 %3184 }
0x195c   :  { %v3190_v5 = vsel %vm161_vm2, %v3185_v1, 0 }
0x195e   :  { %5884 = vmatmul.mubr.msk.bf16.vlgmr.msra.gmra.mrb[76].mxu0 %vm161_vm2, %v2956_v62 }
0x195f   :  { %5894 = vmatpush3.bf16.xpose.msra.mxu0 %v3079_v0  ;;  %5895 = vmatprep.mubr.msk.bf16.mxu0 %vm6409_vm1, %v6408_v11 }
0x1960   :  { %5905 = vmatprep.subr.bf16.mxu0 %v6408_v11 }
0x1966   :  { %5896 = vmatmul.mubr.msk.bf16.vlgmr.msra.gmra.mrb[80].mxu0 %vm161_vm2, %v3071_v27 }
0x1967   :  { %5906 = vmatpush3.bf16.xpose.msra.mxu0 %v3190_v5  ;;  %5907 = vmatprep.mubr.msk.bf16.mxu0 %vm6409_vm1, %v6408_v11 }
0x1968   :  { %5917 = vmatprep.subr.bf16.mxu0 %v6408_v11 }
0x196e   :  { %5908 = vmatmul.mubr.msk.bf16.vlgmr.msra.gmra.mrb[84].mxu0 %vm161_vm2, %v3183_v13 }
0x196f   :  { %5921 = vmatprep.mubr.msk.bf16.mxu0 %vm6409_vm1, %v6408_v11 }
0x19be   :  { %v2887_v26 = vpop.f32.mrb[72].mxu0 }
0x19bf   :  { %v5873_v33 = vpop.f32.mrb[73].mxu0  ;;  %v2893_v7 = vsel %vm209_vm3, %v2887_v26, -inf }
0x19c0   :  { %2894 = vmax.xlane.f32.xlu1 %v2893_v7  ;;  %v2890_v50 = vpop.f32.mrb[74].mxu0 }
0x19c1   :  { %v5874_v46 = vpop.f32.mrb[75].mxu0 }
0x1a31   :  { %v2999_v53 = vpop.f32.mrb[76].mxu0 }
0x1a32   :  { %v5885_v16 = vpop.f32.mrb[77].mxu0  ;;  %v3005_v52 = vsel %vm209_vm3, %v2999_v53, -inf }
0x1a33   :  { %3006 = vmax.xlane.f32.xlu0 %v3005_v52  ;;  %v3002_v58 = vpop.f32.mrb[78].mxu0 }
0x1a34   :  { %v5886_v57 = vpop.f32.mrb[79].mxu0 }
0x1a39   :  { %v3115_v8 = vpop.f32.mrb[80].mxu0 }
0x1a3a   :  { %v5897_v31 = vpop.f32.mrb[81].mxu0  ;;  %v3121_v54 = vsel %vm209_vm3, %v3115_v8, -inf }
0x1a3b   :  { %3122 = vmax.xlane.f32.xlu0 %v3121_v54  ;;  %v3118_v48 = vpop.f32.mrb[82].mxu0 }
0x1a3c   :  { %v5898_v17 = vpop.f32.mrb[83].mxu0 }
0x1a3d   :  { %v6185_v17 = vld [vmem:[%s7608_s11] sm:$0xff]  }
0x1a3e   :  { %5918 = vmatpush3.bf16.msra.mxu0 %v6185_v17 }
0x1a3f   :  { %5919 = vmatprep.subr.bf16.mxu0 %v6408_v11 }
0x1a41   :  { %v3226_v18 = vpop.f32.mrb[84].mxu0 }
0x1a42   :  { %v5909_v2 = vpop.f32.mrb[85].mxu0  ;;  %v3232_v20 = vsel %vm209_vm3, %v3226_v18, -inf }
0x1a43   :  { %3233 = vmax.xlane.f32.xlu1 %v3232_v20  ;;  %v3229_v21 = vpop.f32.mrb[86].mxu0 }
0x1a44   :  { %v5910_v24 = vpop.f32.mrb[87].mxu0 }
0x1a4d   :  { %v2895_v25 = vpop.xlane.xlu1 %2894 }
0x1a4e   :  { %v2896_v29 = vsub.f32 %v2887_v26, %v2895_v25 }
0x1a50   :  { %v2897_v3 = vmul.f32 1.442695, %v2896_v29 }
0x1a52   :  { %6325 = vpow2.f32 %v2897_v3 }
0x1a5c   :  { %v6326_v4 = vpop.eup %6325 }
0x1a5d   :  { %v2899_v32 = vsel %vm209_vm3, %v6326_v4, 0.0 }
0x1a5e   :  { %2900 = vadd.xlane.f32.xlu0 %v2899_v32 }
0x1ac0   :  { %v3007_v34 = vpop.xlane.xlu0 %3006 }
0x1ac1   :  { %v3008_v35 = vsub.f32 %v2999_v53, %v3007_v34 }
0x1ac3   :  { %v3009_v45 = vmul.f32 1.442695, %v3008_v35 }
0x1ac5   :  { %6327 = vpow2.f32 %v3009_v45 }
0x1ac8   :  { %v3123_v41 = vpop.xlane.xlu0 %3122 }
0x1ac9   :  { %v3124_v36 = vsub.f32 %v3115_v8, %v3123_v41 }
0x1acb   :  { %v3125_v37 = vmul.f32 1.442695, %v3124_v36 }
0x1acd   :  { %6329 = vpow2.f32 %v3125_v37 }
0x1acf   :  { %v6328_v38 = vpop.eup %6327 }
0x1ad0   :  { %v3011_v39 = vsel %vm209_vm3, %v6328_v38, 0.0  ;;  %v3234_v44 = vpop.xlane.xlu1 %3233 }
0x1ad1   :  { %3012 = vadd.xlane.f32.xlu1 %v3011_v39  ;;  %v3235_v47 = vsub.f32 %v3226_v18, %v3234_v44 }
0x1ad3   :  { %v3236_v55 = vmul.f32 1.442695, %v3235_v47 }
0x1ad5   :  { %6331 = vpow2.f32 %v3236_v55 }
0x1ad7   :  { %v6330_v42 = vpop.eup %6329 }
0x1ad8   :  { %v3127_v43 = vsel %vm209_vm3, %v6330_v42, 0.0 }
0x1ad9   :  { %3128 = vadd.xlane.f32.xlu0 %v3127_v43 }
0x1adf   :  { %v6332_v56 = vpop.eup %6331 }
0x1ae0   :  { %v3238_v15 = vsel %vm209_vm3, %v6332_v56, 0.0 }
0x1ae2   :  { %3017 = vrot.lane.b32.xlu1 %v7127_v40, %s6412_s30 }
0x1aeb   :  { %v2901_v27 = vpop.xlane.xlu0 %2900 }
0x1aec   :  { %6333 = vrcp.f32 %v2901_v27 }
0x1aef   :  { %2906 = vrot.lane.b32.xlu0 %v7127_v40, %s6410_s27 }
0x1af3   :  { %3244 = vrot.lane.b32.xlu0 %v7135_v10, %s6412_s30 }
0x1af6   :  { %v6334_v61 = vpop.eup %6333 }
0x1af7   :  { %v2903_v40 = vmul.f32 %v6334_v61, %v6326_v4  ;;  %v6186_v4 = vld [vmem:[%s7608_s11 + $0x8] sm:$0xff]  }
0x1af8   :  { %5920 = vmatpush3.bf16.msra.mxu0 %v6186_v4 }
0x1af9   :  { %v2904_v13 = vpack.c.bf16 %v2903_v40, %v2903_v40  ;;  %5933 = vmatprep.subr.bf16.mxu0 %v6408_v11 }
0x1b06   :  { %3239 = vadd.xlane.f32.xlu1 %v3238_v15  ;;  %v6406_v15 = vld [vmem:[%s7603_s14] sm:$0xff] }
0x1b07   :  { %v3301_v27 = vrot.slane %v6406_v15, %v6718_v6 }
0x1b17   :  { %3133 = vrot.lane.b32.xlu1 %v7135_v10, %s6410_s27 }
0x1b5e   :  { %v3013_v60 = vpop.xlane.xlu1 %3012 }
0x1b5f   :  { %6335 = vrcp.f32 %v3013_v60 }
0x1b62   :  { %v3018_v5 = vpop.permute.xlu1 %3017 }
0x1b63   :  { %v3023_v33 = vsel %vm239_vm5, %v3018_v5, 0 }
0x1b66   :  { %v3129_v62 = vpop.xlane.xlu0 %3128 }
0x1b67   :  { %6337 = vrcp.f32 %v3129_v62 }
0x1b69   :  { %v6336_v26 = vpop.eup %6335 }
0x1b6a   :  { %v2907_v0 = vpop.permute.xlu0 %2906  ;;  %v3015_v10 = vmul.f32 %v6336_v26, %v6328_v38 }
0x1b6b   :  { %v2912_v1 = vsel %vm239_vm5, %v2907_v0, 0 }
0x1b6c   :  { %5876 = vmatpush3.bf16.msra.mxu1 %v2912_v1  ;;  %v3016_v7 = vpack.c.bf16 %v3015_v10, %v3015_v10 }
0x1b6d   :  { %5887 = vmatprep.subr.bf16.mxu1 %v6408_v11 }
0x1b6e   :  { %v3245_v58 = vpop.permute.xlu0 %3244 }
0x1b6f   :  { %5878 = vmatmul.mubr.msk.bf16.vlgmr.msra.gmra.mrb[72].mxu1 %vm209_vm3, %v2904_v13  ;;  %v3250_v8 = vsel %vm239_vm5, %v3245_v58, 0 }
0x1b70   :  { %5888 = vmatpush3.bf16.msra.mxu1 %v3023_v33  ;;  %5889 = vmatprep.mubr.msk.bf16.mxu1 %vm6409_vm1, %v6408_v11 }
0x1b71   :  { %5899 = vmatprep.subr.bf16.mxu1 %v6408_v11  ;;  %v6338_v50 = vpop.eup %6337 }
0x1b72   :  { %v3131_v53 = vmul.f32 %v6338_v50, %v6330_v42 }
0x1b74   :  { %v3132_v57 = vpack.c.bf16 %v3131_v53, %v3131_v53 }
0x1b77   :  { %5890 = vmatmul.mubr.msk.bf16.vlgmr.msra.gmra.mrb[76].mxu1 %vm209_vm3, %v3016_v7 }
0x1b78   :  { %5901 = vmatprep.mubr.msk.bf16.mxu1 %vm6409_vm1, %v6408_v11 }
0x1b93   :  { %v3240_v46 = vpop.xlane.xlu1 %3239 }
0x1b94   :  { %6339 = vrcp.f32 %v3240_v46 }
0x1b97   :  { %v3134_v16 = vpop.permute.xlu1 %3133 }
0x1b98   :  { %v3139_v52 = vsel %vm239_vm5, %v3134_v16, 0 }
0x1b99   :  { %5900 = vmatpush3.bf16.msra.mxu1 %v3139_v52 }
0x1b9a   :  { %5911 = vmatprep.subr.bf16.mxu1 %v6408_v11 }
0x1b9c   :  { %5902 = vmatmul.mubr.msk.bf16.vlgmr.msra.gmra.mrb[80].mxu1 %vm209_vm3, %v3132_v57 }
0x1b9d   :  { %5912 = vmatpush3.bf16.msra.mxu1 %v3250_v8  ;;  %5913 = vmatprep.mubr.msk.bf16.mxu1 %vm6409_vm1, %v6408_v11  ;;  %v6188_v8 = vld [vmem:[%s7609_s12 + $0x8] sm:$0xff]  }
0x1b9e   :  { %v6340_v31 = vpop.eup %6339  ;;  %5925 = vmatprep.subr.bf16.mxu1 %v6408_v11 }
0x1b9f   :  { %v3242_v54 = vmul.f32 %v6340_v31, %v6332_v56  ;;  %v6189_v31 = vld [vmem:[%s7610_s13] sm:$0xff]  }
0x1ba1   :  { %v3243_v48 = vpack.c.bf16 %v3242_v54, %v3242_v54  ;;  %v6190_v54 = vld [vmem:[%s7610_s13 + $0x8] sm:$0xff]  }
0x1ba4   :  { %5914 = vmatmul.mubr.msk.bf16.vlgmr.msra.gmra.mrb[84].mxu1 %vm209_vm3, %v3243_v48 }
0x1ba5   :  { %5929 = vmatprep.mubr.msk.bf16.mxu1 %vm6409_vm1, %v6408_v11 }
0x1c42   :  { %v2948_v18 = vpop.f32.mrb[72].mxu1 }
0x1c43   :  { %v5879_v2 = vpop.f32.mrb[73].mxu1 }
0x1c44   :  { %v2951_v20 = vpop.f32.mrb[74].mxu1 }
0x1c45   :  { %v5880_v21 = vpop.f32.mrb[75].mxu1 }
0x1c4a   :  { %v3059_v24 = vpop.f32.mrb[76].mxu1 }
0x1c4b   :  { %v5891_v25 = vpop.f32.mrb[77].mxu1 }
0x1c4c   :  { %v3062_v29 = vpop.f32.mrb[78].mxu1  ;;  %v3389_v25 = vrot.slane %v6406_v15, %v6723_v14 }
0x1c4d   :  { %v5892_v3 = vpop.f32.mrb[79].mxu1 }
0x1c4e   :  { %v7239_v3 = vld [vmem:[%s7603_s14 + $0x8] sm:$0x1f] }
0x1c6f   :  { %v3175_v32 = vpop.f32.mrb[80].mxu1 }
0x1c70   :  { %v5903_v34 = vpop.f32.mrb[81].mxu1 }
0x1c71   :  { %v3178_v35 = vpop.f32.mrb[82].mxu1 }
0x1c72   :  { %v5904_v45 = vpop.f32.mrb[83].mxu1  ;;  %v3395_v35 = vrot.slane %v7239_v3, %v6542_v9 }
0x1c77   :  { %v3286_v41 = vpop.f32.mrb[84].mxu1 }
0x1c78   :  { %v6142_v36 = vpack.i.bf16 %v3286_v41, %v3059_v24  ;;  %v5915_v37 = vpop.f32.mrb[85].mxu1 }
0x1c79   :  { %v3289_v38 = vpop.f32.mrb[86].mxu1 }
0x1c7a   :  { %6143 = vrot.lane.b32.xlu1 %v6142_v36, %s7625_s23  ;;  %v5916_v39 = vpop.f32.mrb[87].mxu1  ;;  %v6191_v38 = vld [vmem:[%s7610_s13 + $0x10] sm:$0xff]  }
0x1c7b   :  { %v6192_v39 = vld [vmem:[%s7610_s13 + $0x18] sm:$0xff]  }
0x1cec   :  { %v6144_v42 = vpop.permute.xlu1 %6143 }
0x1ced   :  { %v6146_v43 = vunpack.i.h.bf16 %v6144_v42  ;;  %v6145_v44 = vunpack.i.l.bf16 %v6144_v42  ;;  %v3414_v42 = vrot.slane %v7239_v3, %v6646_v63 }
0x1cef   :  { %v3296_v47 = vsel %vm161_vm2, %v3175_v32, %v6146_v43  ;;  %v3069_v55 = vsel %vm161_vm2, %v2948_v18, %v6145_v44 }
0x1cf0   :  { %v3297_v56 = vpack.c.bf16 %v3296_v47, %v3069_v55 }
0x1cf2   :  { %5922 = vmatmul.mubr.msk.bf16.vlgmr.msra.gmra.mrb[88].mxu0 %vm99_vm0, %v3297_v56 }
0x1cf3   :  { %5941 = vmatprep.mubr.msk.bf16.mxu0 %vm6409_vm1, %v6408_v11  ;;  %5934 = vmatpush3.bf16.msra.mxu0 %v6189_v31 }
0x1cf4   :  { %5935 = vmatprep.subr.bf16.mxu0 %v6408_v11 }
0x1cf7   :  { %5936 = vmatpush3.bf16.msra.mxu0 %v6190_v54  ;;  %v6193_v54 = vld [vmem:[%s7601_s7 + $0x10] sm:$0xff]  }
0x1cf8   :  { %5937 = vmatprep.subr.bf16.mxu0 %v6408_v11 }
0x1cfb   :  { %5938 = vmatpush3.bf16.msra.mxu0 %v6191_v38 }
0x1cfc   :  { %5939 = vmatprep.subr.bf16.mxu0 %v6408_v11 }
0x1cff   :  { %5940 = vmatpush3.bf16.msra.mxu0 %v6192_v39  ;;  %v7289_v39 = vld [vmem:[%s7603_s14 + $0x10] sm:$0xff] }
0x1d00   :  { %5959 = vmatprep.subr.bf16.mxu0 %v6408_v11 }
0x1dc5   :  { %v3351_v60 = vpop.f32.mrb[88].mxu0 }
0x1dc6   :  { %v3352_v61 = vadd.f32 %v3351_v60, %v3301_v27  ;;  %v5923_v62 = vpop.f32.mrb[89].mxu0 }
0x1dc7   :  { %v3354_v40 = vpop.f32.mrb[90].mxu0  ;;  %v3477_v62 = vrot.slane %v7239_v3, %v6672_v49 }
0x1dc8   :  { %v3358_v0 = vadd.f32 %v3352_v61, %v7110_v23  ;;  %v3355_v1 = vadd.f32 %v3354_v40, %v3301_v27  ;;  %v5924_v5 = vpop.f32.mrb[91].mxu0 }
0x1dca   :  { %v3359_v13 = vadd.f32 %v3355_v1, %v7112_v30  ;;  %v3360_v26 = vsel %vm99_vm0, %v3358_v0, 0.0  ;;  %v6187_v30 = vld [vmem:[%s7609_s12] sm:$0xff]  }
0x1dcb   :  { %3361 = vadd.xlane.f32.xlu0 %v3360_v26  ;;  %5926 = vmatpush3.bf16.msra.mxu1 %v6187_v30 }
0x1dcc   :  { %v3363_v33 = vsel %vm99_vm0, %v3359_v13, 0.0  ;;  %5927 = vmatprep.subr.bf16.mxu1 %v6408_v11 }
0x1dcd   :  { %3364 = vadd.xlane.f32.xlu1 %v3363_v33 }
0x1dcf   :  { %5928 = vmatpush3.bf16.msra.mxu1 %v6188_v8 }
0x1dd0   :  { %5945 = vmatprep.subr.bf16.mxu1 %v6408_v11 }
0x1e58   :  { %v3362_v10 = vpop.xlane.xlu0 %3361 }
0x1e59   :  { %v3366_v7 = vmul.f32 0.03125, %v3362_v10 }
0x1e5a   :  { %v3365_v50 = vpop.xlane.xlu1 %3364 }
0x1e5b   :  { %v3368_v46 = vsub.f32 %v3358_v0, %v3366_v7  ;;  %v3367_v53 = vmul.f32 0.03125, %v3365_v50 }
0x1e5d   :  { %v3369_v16 = vsub.f32 %v3359_v13, %v3367_v53  ;;  %v3370_v52 = vmul.f32 %v3368_v46, %v3368_v46 }
0x1e5f   :  { %v3372_v58 = vsel %vm99_vm0, %v3370_v52, 0.0  ;;  %v3371_v23 = vmul.f32 %v3369_v16, %v3369_v16 }
0x1e60   :  { %3373 = vadd.xlane.f32.xlu0 %v3372_v58 }
0x1e61   :  { %v3375_v57 = vsel %vm99_vm0, %v3371_v23, 0.0 }
0x1e64   :  { %3376 = vadd.xlane.f32.xlu0 %v3375_v57 }
0x1eed   :  { %v3374_v48 = vpop.xlane.xlu0 %3373 }
0x1eee   :  { %v3378_v17 = vmul.f32 0.03125, %v3374_v48  ;;  %v6194_v48 = vld [vmem:[%s7601_s7 + $0x18] sm:$0xff]  }
0x1ef0   :  { %v3380_v18 = vadd.f32 1e-05, %v3378_v17 }
0x1ef1   :  { %v3377_v2 = vpop.xlane.xlu0 %3376 }
0x1ef2   :  { %6341 = vrsqrt.f32 %v3380_v18  ;;  %v3379_v20 = vmul.f32 0.03125, %v3377_v2 }
0x1ef4   :  { %v3381_v21 = vadd.f32 1e-05, %v3379_v20 }
0x1ef6   :  { %6343 = vrsqrt.f32 %v3381_v21 }
0x1efc   :  { %v6342_v24 = vpop.eup %6341 }
0x1efd   :  { %v3384_v29 = vmul.f32 %v6342_v24, %v3368_v46 }
0x1eff   :  { %v3390_v32 = vmul.f32 %v3389_v25, %v3384_v29 }
0x1f00   :  { %v6344_v4 = vpop.eup %6343 }
0x1f01   :  { %v3385_v34 = vmul.f32 %v6344_v4, %v3369_v16  ;;  %v3396_v41 = vadd.f32 %v3395_v35, %v3390_v32 }
0x1f03   :  { %v3391_v45 = vmul.f32 %v3389_v25, %v3385_v34  ;;  %v3577_v25 = vrot.slane %v7239_v3, %v6677_v51 }
0x1f05   :  { %v3397_v36 = vadd.f32 %v3395_v35, %v3391_v45  ;;  %v3583_v45 = vrot.slane %v7239_v3, %v6691_v12  ;;  %v3603_v3 = vrot.slane %v7289_v39, %v6542_v9 }
0x1f07   :  { %v3410_v37 = vpack.c.bf16 %v3397_v36, %v3396_v41 }
0x1f09   :  { %5930 = vmatmul.mubr.msk.bf16.vlgmr.msra.gmra.mrb[88].mxu1 %vm99_vm0, %v3410_v37 }
0x1f0a   :  { %5949 = vmatprep.mubr.msk.bf16.mxu1 %vm6409_vm1, %v6408_v11  ;;  %5946 = vmatpush3.bf16.msra.mxu1 %v6193_v54 }
0x1f0b   :  { %5947 = vmatprep.subr.bf16.mxu1 %v6408_v11 }
0x1f0e   :  { %5948 = vmatpush3.bf16.msra.mxu1 %v6194_v48 }
0x1f0f   :  { %5953 = vmatprep.subr.bf16.mxu1 %v6408_v11 }
0x1fdc   :  { %v3464_v43 = vpop.f32.mrb[88].mxu1 }
0x1fdd   :  { %v3465_v44 = vadd.f32 %v3464_v43, %v3414_v42  ;;  %v5931_v47 = vpop.f32.mrb[89].mxu1 }
0x1fde   :  { %v3467_v55 = vpop.f32.mrb[90].mxu1 }
0x1fdf   :  { %v3468_v56 = vadd.f32 %v3467_v55, %v3414_v42  ;;  %v5932_v15 = vpop.f32.mrb[91].mxu1  ;;  %v3471_v27 = vmax.f32 %v3465_v44, 0.0 }
0x1fe1   :  { %v3472_v60 = vmax.f32 %v3468_v56, 0.0 }
0x1fe3   :  { %v3473_v61 = vpack.c.bf16 %v3472_v60, %v3471_v27 }
0x1fe5   :  { %5942 = vmatmul.mubr.msk.bf16.vlgmr.msra.gmra.mrb[92].mxu0 %vm935_vm8, %v3473_v61 }
0x1fe6   :  { %5961 = vmatprep.mubr.msk.bf16.mxu0 %vm6409_vm1, %v6408_v11 }
0x20b8   :  { %v3539_v40 = vpop.f32.mrb[92].mxu0 }
0x20b9   :  { %v3540_v0 = vadd.f32 %v3539_v40, %v3477_v62  ;;  %v5943_v1 = vpop.f32.mrb[93].mxu0 }
0x20ba   :  { %v3542_v5 = vpop.f32.mrb[94].mxu0 }
0x20bb   :  { %v3546_v13 = vadd.f32 %v3540_v0, %v3396_v41  ;;  %v3543_v26 = vadd.f32 %v3542_v5, %v3477_v62  ;;  %v5944_v33 = vpop.f32.mrb[95].mxu0 }
0x20bd   :  { %v3547_v10 = vadd.f32 %v3543_v26, %v3397_v36  ;;  %v3548_v7 = vsel %vm99_vm0, %v3546_v13, 0.0 }
0x20be   :  { %3549 = vadd.xlane.f32.xlu1 %v3548_v7 }
0x20bf   :  { %v3551_v50 = vsel %vm99_vm0, %v3547_v10, 0.0 }
0x20c0   :  { %3552 = vadd.xlane.f32.xlu0 %v3551_v50 }
0x214b   :  { %v3550_v46 = vpop.xlane.xlu1 %3549 }
0x214c   :  { %v3554_v53 = vmul.f32 0.03125, %v3550_v46 }
0x214d   :  { %v3553_v16 = vpop.xlane.xlu0 %3552 }
0x214e   :  { %v3556_v52 = vsub.f32 %v3546_v13, %v3554_v53  ;;  %v3555_v58 = vmul.f32 0.03125, %v3553_v16 }
0x2150   :  { %v3557_v23 = vsub.f32 %v3547_v10, %v3555_v58  ;;  %v3558_v57 = vmul.f32 %v3556_v52, %v3556_v52 }
0x2152   :  { %v3560_v30 = vsel %vm99_vm0, %v3558_v57, 0.0  ;;  %v3559_v8 = vmul.f32 %v3557_v23, %v3557_v23 }
0x2153   :  { %3561 = vadd.xlane.f32.xlu1 %v3560_v30 }
0x2154   :  { %v3563_v31 = vsel %vm99_vm0, %v3559_v8, 0.0 }
0x2155   :  { %3564 = vadd.xlane.f32.xlu0 %v3563_v31 }
0x21e0   :  { %v3562_v17 = vpop.xlane.xlu1 %3561 }
0x21e1   :  { %v3566_v18 = vmul.f32 0.03125, %v3562_v17 }
0x21e2   :  { %v3565_v2 = vpop.xlane.xlu0 %3564 }
0x21e3   :  { %v3568_v20 = vadd.f32 1e-05, %v3566_v18  ;;  %v3567_v21 = vmul.f32 0.03125, %v3565_v2 }
0x21e5   :  { %6345 = vrsqrt.f32 %v3568_v20  ;;  %v3569_v24 = vadd.f32 1e-05, %v3567_v21 }
0x21e7   :  { %6347 = vrsqrt.f32 %v3569_v24 }
0x21ef   :  { %v6346_v29 = vpop.eup %6345 }
0x21f0   :  { %v3572_v4 = vmul.f32 %v6346_v29, %v3556_v52 }
0x21f1   :  { %v6348_v32 = vpop.eup %6347 }
0x21f2   :  { %v3578_v34 = vmul.f32 %v3577_v25, %v3572_v4  ;;  %v3573_v35 = vmul.f32 %v6348_v32, %v3557_v23 }
0x21f4   :  { %v3579_v41 = vmul.f32 %v3577_v25, %v3573_v35  ;;  %v7277_v36 = vadd.f32 %v3583_v45, %v3578_v34 }
0x21f6   :  { %v7279_v37 = vadd.f32 %v3583_v45, %v3579_v41 }
0x21f8   :  { %v3599_v38 = vpack.c.bf16 %v7279_v37, %v7277_v36 }
0x21fa   :  { %5950 = vmatmul.mubr.msk.bf16.vlgmr.msra.gmra.mrb[92].mxu1 %vm99_vm0, %v3599_v38 }
0x21fb   :  { %5955 = vmatprep.mubr.msk.bf16.mxu1 %vm6409_vm1, %v6408_v11 }
0x22cd   :  { %v3653_v42 = vpop.f32.mrb[92].mxu1 }
0x22ce   :  { %v3654_v43 = vadd.f32 %v3653_v42, %v3603_v3  ;;  %v5951_v44 = vpop.f32.mrb[93].mxu1 }
0x22cf   :  { %v3656_v47 = vpop.f32.mrb[94].mxu1 }
0x22d0   :  { %v3660_v55 = vmul.f32 0.25, %v3654_v43  ;;  %v7293_v56 = vpack.c.bf16 %v3654_v43, %v3654_v43  ;;  %v3657_v15 = vadd.f32 %v3656_v47, %v3603_v3  ;;  %v5952_v27 = vpop.f32.mrb[95].mxu1 }
0x22d2   :  { %3775 = vrot.lane.b32.xlu0 %v7293_v56, %s6412_s30  ;;  %3664 = vrot.lane.b32.xlu1 %v7293_v56, %s6410_s27  ;;  %v3661_v60 = vpack.c.bf16 %v3660_v55, %v3660_v55  ;;  %v7299_v61 = vpack.c.bf16 %v3657_v15, %v3657_v15  ;;  %v3888_v62 = vmul.f32 0.25, %v3657_v15 }
0x22d4   :  { %v3889_v40 = vpack.c.bf16 %v3888_v62, %v3888_v62 }
0x22d6   :  { %3773 = vrot.lane.b32.xlu1 %v3661_v60, %s6411_s28  ;;  %4003 = vrot.lane.b32.xlu0 %v7299_v61, %s6412_s30 }
0x22da   :  { %3892 = vrot.lane.b32.xlu1 %v7299_v61, %s6410_s27 }
0x22de   :  { %4001 = vrot.lane.b32.xlu1 %v3889_v40, %s6411_s28 }
0x2344   :  { %v3665_v0 = vpop.permute.xlu1 %3664  ;;  %v3776_v5 = vpop.permute.xlu0 %3775 }
0x2345   :  { %v3670_v1 = vsel %vm161_vm2, %v3665_v0, 0  ;;  %v3781_v26 = vsel %vm161_vm2, %v3776_v5, 0 }
0x2346   :  { %5954 = vmatpush3.bf16.xpose.msra.mxu1 %v3670_v1 }
0x2347   :  { %5965 = vmatprep.subr.bf16.mxu1 %v6408_v11 }
0x2348   :  { %v3774_v13 = vpop.permute.xlu1 %3773  ;;  %v4004_v7 = vpop.permute.xlu0 %4003 }
0x2349   :  { %v4009_v50 = vsel %vm161_vm2, %v4004_v7, 0 }
0x234c   :  { %v3893_v33 = vpop.permute.xlu1 %3892 }
0x234d   :  { %5956 = vmatmul.mubr.msk.bf16.vlgmr.msra.gmra.mrb[96].mxu1 %vm161_vm2, %v3661_v60  ;;  %v3898_v10 = vsel %vm161_vm2, %v3893_v33, 0 }
0x234e   :  { %5966 = vmatpush3.bf16.xpose.msra.mxu1 %v3781_v26  ;;  %5967 = vmatprep.mubr.msk.bf16.mxu1 %vm6409_vm1, %v6408_v11 }
0x234f   :  { %5977 = vmatprep.subr.bf16.mxu1 %v6408_v11 }
0x2350   :  { %v4002_v46 = vpop.permute.xlu1 %4001 }
0x2355   :  { %5968 = vmatmul.mubr.msk.bf16.vlgmr.msra.gmra.mrb[100].mxu1 %vm161_vm2, %v3774_v13 }
0x2356   :  { %5978 = vmatpush3.bf16.xpose.msra.mxu1 %v3898_v10  ;;  %5979 = vmatprep.mubr.msk.bf16.mxu1 %vm6409_vm1, %v6408_v11 }
0x2357   :  { %5989 = vmatprep.subr.bf16.mxu1 %v6408_v11 }
0x235d   :  { %5980 = vmatmul.mubr.msk.bf16.vlgmr.msra.gmra.mrb[104].mxu1 %vm161_vm2, %v3889_v40 }
0x235e   :  { %5990 = vmatpush3.bf16.xpose.msra.mxu1 %v4009_v50  ;;  %5991 = vmatprep.mubr.msk.bf16.mxu1 %vm6409_vm1, %v6408_v11 }
0x235f   :  { %6001 = vmatprep.subr.bf16.mxu1 %v6408_v11 }
0x2365   :  { %5992 = vmatmul.mubr.msk.bf16.vlgmr.msra.gmra.mrb[108].mxu1 %vm161_vm2, %v4002_v46 }
0x2366   :  { %6005 = vmatprep.mubr.msk.bf16.mxu1 %vm6409_vm1, %v6408_v11 }
0x2420   :  { %v3706_v53 = vpop.f32.mrb[96].mxu1 }
0x2421   :  { %v3707_v16 = vadd.f32 %v3706_v53, %v6970_v22  ;;  %v5957_v52 = vpop.f32.mrb[97].mxu1 }
0x2422   :  { %v3709_v58 = vpop.f32.mrb[98].mxu1 }
0x2423   :  { %v5958_v23 = vpop.f32.mrb[99].mxu1  ;;  %v3712_v57 = vsel %vm2192_vm10, %v3707_v16, -inf }
0x2424   :  { %3713 = vmax.xlane.f32.xlu0 %v3712_v57 }
0x2428   :  { %v3817_v30 = vpop.f32.mrb[100].mxu1 }
0x2429   :  { %v3818_v8 = vadd.f32 %v3817_v30, %v6970_v22  ;;  %v5969_v31 = vpop.f32.mrb[101].mxu1 }
0x242a   :  { %v3820_v54 = vpop.f32.mrb[102].mxu1 }
0x242b   :  { %v5970_v48 = vpop.f32.mrb[103].mxu1  ;;  %v3823_v17 = vsel %vm2192_vm10, %v3818_v8, -inf }
0x242c   :  { %3824 = vmax.xlane.f32.xlu1 %v3823_v17 }
0x2430   :  { %v3934_v18 = vpop.f32.mrb[104].mxu1 }
0x2431   :  { %v3935_v2 = vadd.f32 %v3934_v18, %v6970_v22  ;;  %v5981_v20 = vpop.f32.mrb[105].mxu1 }
0x2432   :  { %v3937_v21 = vpop.f32.mrb[106].mxu1 }
0x2433   :  { %v5982_v24 = vpop.f32.mrb[107].mxu1  ;;  %v3940_v25 = vsel %vm2192_vm10, %v3935_v2, -inf }
0x2434   :  { %3941 = vmax.xlane.f32.xlu0 %v3940_v25 }
0x2438   :  { %v4045_v29 = vpop.f32.mrb[108].mxu1 }
0x2439   :  { %v4046_v4 = vadd.f32 %v4045_v29, %v6970_v22  ;;  %v5993_v32 = vpop.f32.mrb[109].mxu1  ;;  %v6195_v29 = vld [vmem:[%s7604_s8 + $0x10] sm:$0xff]  }
0x243a   :  { %v4048_v34 = vpop.f32.mrb[110].mxu1  ;;  %6002 = vmatpush3.bf16.msra.mxu1 %v6195_v29 }
0x243b   :  { %v5994_v35 = vpop.f32.mrb[111].mxu1  ;;  %v4051_v45 = vsel %vm2192_vm10, %v4046_v4, -inf  ;;  %6003 = vmatprep.subr.bf16.mxu1 %v6408_v11 }
0x243c   :  { %4052 = vmax.xlane.f32.xlu0 %v4051_v45 }
0x24b1   :  { %v3714_v41 = vpop.xlane.xlu0 %3713 }
0x24b2   :  { %v3715_v38 = vsub.f32 %v3707_v16, %v3714_v41 }
0x24b4   :  { %v3716_v3 = vmul.f32 1.442695, %v3715_v38 }
0x24b6   :  { %6349 = vpow2.f32 %v3716_v3 }
0x24b9   :  { %v3825_v42 = vpop.xlane.xlu1 %3824 }
0x24ba   :  { %v3826_v43 = vsub.f32 %v3818_v8, %v3825_v42  ;;  %v6196_v42 = vld [vmem:[%s7604_s8 + $0x18] sm:$0xff]  }
0x24bb   :  { %6004 = vmatpush3.bf16.msra.mxu1 %v6196_v42 }
0x24bc   :  { %v3827_v44 = vmul.f32 1.442695, %v3826_v43 }
0x24be   :  { %6351 = vpow2.f32 %v3827_v44 }
0x24c0   :  { %v6350_v47 = vpop.eup %6349 }
0x24c1   :  { %v3718_v55 = vsel %vm2192_vm10, %v6350_v47, 0.0  ;;  %v3942_v15 = vpop.xlane.xlu0 %3941 }
0x24c2   :  { %3719 = vadd.xlane.f32.xlu1 %v3718_v55  ;;  %v3943_v5 = vsub.f32 %v3935_v2, %v3942_v15  ;;  %v6197_v55 = vld [vmem:[%s7605_s10 + $0x10] sm:$0xff]  }
0x24c3   :  { %6017 = vmatprep.subr.bf16.mxu1 %v6197_v55 }
0x24c4   :  { %v3944_v13 = vmul.f32 1.442695, %v3943_v5 }
0x24c8   :  { %v6352_v22 = vpop.eup %6351 }
0x24c9   :  { %v4053_v27 = vpop.xlane.xlu0 %4052  ;;  %v3829_v60 = vsel %vm2192_vm10, %v6352_v22, 0.0 }
0x24ca   :  { %v4054_v62 = vsub.f32 %v4046_v4, %v4053_v27  ;;  %3830 = vadd.xlane.f32.xlu0 %v3829_v60 }
0x24cc   :  { %v4055_v40 = vmul.f32 1.442695, %v4054_v62 }
0x24ce   :  { %6353 = vpow2.f32 %v4055_v40 }
0x24cf   :  { %6355 = vpow2.f32 %v3944_v13 }
0x24d3   :  { %3724 = vrot.lane.b32.xlu1 %v7293_v56, %s6413_s2 }
0x24d8   :  { %v6354_v0 = vpop.eup %6353 }
0x24d9   :  { %v4057_v1 = vsel %vm2192_vm10, %v6354_v0, 0.0  ;;  %v6356_v26 = vpop.eup %6355 }
0x24da   :  { %4058 = vadd.xlane.f32.xlu0 %v4057_v1  ;;  %v3946_v33 = vsel %vm2192_vm10, %v6356_v26, 0.0 }
0x24f0   :  { %3835 = vrot.lane.b32.xlu0 %v7293_v56, %s6414_s19 }
0x24f7   :  { %3947 = vadd.xlane.f32.xlu1 %v3946_v33 }
0x2508   :  { %3952 = vrot.lane.b32.xlu1 %v7299_v61, %s6413_s2 }
0x250c   :  { %4063 = vrot.lane.b32.xlu1 %v7299_v61, %s6414_s19 }
0x254f   :  { %v3720_v10 = vpop.xlane.xlu1 %3719 }
0x2550   :  { %6357 = vrcp.f32 %v3720_v10  ;;  %v6198_v10 = vld [vmem:[%s7605_s10 + $0x18] sm:$0xff]  }
0x2553   :  { %v3725_v7 = vpop.permute.xlu1 %3724 }
0x2554   :  { %v3730_v50 = vsel %vm2210_vm11, %v3725_v7, 0  ;;  %v4120_v7 = vrot.slane %v7289_v39, %v6646_v63 }
0x2555   :  { %5960 = vmatpush3.bf16.msra.mxu0 %v3730_v50 }
0x2556   :  { %5971 = vmatprep.subr.bf16.mxu0 %v6408_v11 }
0x2557   :  { %v3831_v56 = vpop.xlane.xlu0 %3830 }
0x2558   :  { %6359 = vrcp.f32 %v3831_v56 }
0x255a   :  { %v6358_v46 = vpop.eup %6357 }
0x255b   :  { %v3722_v53 = vmul.f32 %v6358_v46, %v6350_v47 }
0x255d   :  { %v3723_v16 = vpack.c.bf16 %v3722_v53, %v3722_v53 }
0x255f   :  { %5962 = vmatmul.mubr.msk.bf16.vlgmr.msra.gmra.mrb[96].mxu0 %vm2192_vm10, %v3723_v16 }
0x2560   :  { %5973 = vmatprep.mubr.msk.bf16.mxu0 %vm6409_vm1, %v6408_v11 }
0x2562   :  { %v6360_v52 = vpop.eup %6359 }
0x2563   :  { %v3833_v58 = vmul.f32 %v6360_v52, %v6352_v22 }
0x2565   :  { %v3834_v30 = vpack.c.bf16 %v3833_v58, %v3833_v58 }
0x2567   :  { %v4059_v61 = vpop.xlane.xlu0 %4058 }
0x256b   :  { %v3836_v23 = vpop.permute.xlu0 %3835 }
0x256c   :  { %v3841_v57 = vsel %vm2210_vm11, %v3836_v23, 0 }
0x256d   :  { %5972 = vmatpush3.bf16.msra.mxu0 %v3841_v57 }
0x256e   :  { %5983 = vmatprep.subr.bf16.mxu0 %v6408_v11 }
0x2570   :  { %5974 = vmatmul.mubr.msk.bf16.vlgmr.msra.gmra.mrb[100].mxu0 %vm2192_vm10, %v3834_v30 }
0x2571   :  { %5985 = vmatprep.mubr.msk.bf16.mxu0 %vm6409_vm1, %v6408_v11 }
0x2584   :  { %v3948_v8 = vpop.xlane.xlu1 %3947 }
0x2585   :  { %6361 = vrcp.f32 %v3948_v8 }
0x2586   :  { %6363 = vrcp.f32 %v4059_v61 }
0x2588   :  { %v3953_v31 = vpop.permute.xlu1 %3952 }
0x2589   :  { %v3958_v54 = vsel %vm2210_vm11, %v3953_v31, 0 }
0x258a   :  { %5984 = vmatpush3.bf16.msra.mxu0 %v3958_v54 }
0x258b   :  { %5995 = vmatprep.subr.bf16.mxu0 %v6408_v11 }
0x258c   :  { %v4064_v18 = vpop.permute.xlu1 %4063 }
0x258d   :  { %v4069_v21 = vsel %vm2210_vm11, %v4064_v18, 0 }
0x258f   :  { %v6362_v48 = vpop.eup %6361 }
0x2590   :  { %v3950_v17 = vmul.f32 %v6362_v48, %v6356_v26  ;;  %v6364_v20 = vpop.eup %6363 }
0x2591   :  { %v4061_v24 = vmul.f32 %v6364_v20, %v6354_v0 }
0x2592   :  { %v3951_v2 = vpack.c.bf16 %v3950_v17, %v3950_v17 }
0x2593   :  { %v4062_v25 = vpack.c.bf16 %v4061_v24, %v4061_v24 }
0x2594   :  { %5986 = vmatmul.mubr.msk.bf16.vlgmr.msra.gmra.mrb[104].mxu0 %vm2192_vm10, %v3951_v2 }
0x2595   :  { %5996 = vmatpush3.bf16.msra.mxu0 %v4069_v21  ;;  %5997 = vmatprep.mubr.msk.bf16.mxu0 %vm6409_vm1, %v6408_v11 }
0x2596   :  { %6009 = vmatprep.subr.bf16.mxu0 %v6408_v11 }
0x259c   :  { %5998 = vmatmul.mubr.msk.bf16.vlgmr.msra.gmra.mrb[108].mxu0 %vm2192_vm10, %v4062_v25 }
0x259d   :  { %6013 = vmatprep.mubr.msk.bf16.mxu0 %vm6409_vm1, %v6408_v11 }
0x2632   :  { %v3766_v4 = vpop.f32.mrb[96].mxu0 }
0x2633   :  { %v5963_v32 = vpop.f32.mrb[97].mxu0 }
0x2634   :  { %v3769_v34 = vpop.f32.mrb[98].mxu0 }
0x2635   :  { %v5964_v35 = vpop.f32.mrb[99].mxu0  ;;  %v6199_v34 = vld [vmem:[%s7606_s9 + $0x10] sm:$0xff]  }
0x2636   :  { %6010 = vmatpush3.bf16.msra.mxu0 %v6199_v34  ;;  %v6200_v35 = vld [vmem:[%s7606_s9 + $0x18] sm:$0xff]  }
0x2637   :  { %6011 = vmatprep.subr.bf16.mxu0 %v6408_v11 }
0x263a   :  { %6012 = vmatpush3.bf16.msra.mxu0 %v6200_v35 }
0x263b   :  { %6025 = vmatprep.subr.bf16.mxu0 %v6408_v11 }
0x2643   :  { %v3877_v45 = vpop.f32.mrb[100].mxu0 }
0x2644   :  { %v5975_v41 = vpop.f32.mrb[101].mxu0 }
0x2645   :  { %v3880_v38 = vpop.f32.mrb[102].mxu0 }
0x2646   :  { %v5976_v3 = vpop.f32.mrb[103].mxu0 }
0x2667   :  { %v3994_v43 = vpop.f32.mrb[104].mxu0 }
0x2668   :  { %v5987_v44 = vpop.f32.mrb[105].mxu0 }
0x2669   :  { %v3997_v47 = vpop.f32.mrb[106].mxu0  ;;  %v4208_v44 = vrot.slane %v7289_v39, %v6672_v49 }
0x266a   :  { %v5988_v15 = vpop.f32.mrb[107].mxu0 }
0x266f   :  { %v4105_v22 = vpop.f32.mrb[108].mxu0 }
0x2670   :  { %v6147_v27 = vpack.i.bf16 %v4105_v22, %v3877_v45  ;;  %v5999_v60 = vpop.f32.mrb[109].mxu0 }
0x2671   :  { %v4108_v62 = vpop.f32.mrb[110].mxu0  ;;  %v4214_v60 = vrot.slane %v7289_v39, %v6677_v51 }
0x2672   :  { %6148 = vrot.lane.b32.xlu0 %v6147_v27, %s7625_s23  ;;  %v6000_v40 = vpop.f32.mrb[111].mxu0 }
0x26e4   :  { %v6149_v0 = vpop.permute.xlu0 %6148 }
0x26e5   :  { %v6151_v1 = vunpack.i.h.bf16 %v6149_v0  ;;  %v6150_v5 = vunpack.i.l.bf16 %v6149_v0 }
0x26e7   :  { %v4115_v13 = vsel %vm161_vm2, %v3994_v43, %v6151_v1  ;;  %v3887_v26 = vsel %vm161_vm2, %v3766_v4, %v6150_v5 }
0x26e8   :  { %v4116_v33 = vpack.c.bf16 %v4115_v13, %v3887_v26  ;;  %v4236_v13 = vrot.slane %v7289_v39, %v6691_v12 }
0x26ea   :  { %6006 = vmatmul.mubr.msk.bf16.vlgmr.msra.gmra.mrb[112].mxu1 %vm99_vm0, %v4116_v33 }
0x26eb   :  { %6018 = vmatpush3.bf16.msra.mxu1 %v6197_v55  ;;  %6021 = vmatprep.mubr.msk.bf16.mxu1 %vm99_vm0, %v7101_v59 }
0x26ec   :  { %6019 = vmatprep.subr.bf16.mxu1 %v6198_v10 }
0x26ef   :  { %6020 = vmatpush3.bf16.msra.mxu1 %v6198_v10 }
0x26f0   :  { %6031 = vmatprep.subr.bf16.mxu1 %v6408_v11 }
0x26f2   :  { %6022 = vmatmul.mubr.msk.bf16.vlgmr.msra.gmra.mrb[116].mxu1 %vm99_vm0, %v7108_v19  ;;  %v4296_v19 = vrot.slane %v7289_v39, %v6700_v28 }
0x26f3   :  { %6033 = vmatprep.mubr.msk.bf16.mxu1 %vm6409_vm1, %v6408_v11 }
0x27bd   :  { %v4170_v50 = vpop.f32.mrb[112].mxu1 }
0x27be   :  { %v4171_v46 = vadd.f32 %v4170_v50, %v4120_v7  ;;  %v6007_v56 = vpop.f32.mrb[113].mxu1 }
0x27bf   :  { %v4173_v53 = vpop.f32.mrb[114].mxu1 }
0x27c0   :  { %v4177_v16 = vadd.f32 %v4171_v46, %v7277_v36  ;;  %v4174_v59 = vadd.f32 %v4173_v53, %v4120_v7  ;;  %v6008_v52 = vpop.f32.mrb[115].mxu1 }
0x27c2   :  { %v4178_v61 = vadd.f32 %v4174_v59, %v7279_v37  ;;  %v4179_v58 = vsel %vm99_vm0, %v4177_v16, 0.0 }
0x27c3   :  { %4180 = vadd.xlane.f32.xlu1 %v4179_v58 }
0x27c4   :  { %v4182_v23 = vsel %vm99_vm0, %v4178_v61, 0.0 }
0x27c5   :  { %4183 = vadd.xlane.f32.xlu0 %v4182_v23  ;;  %v6023_v57 = vpop.f32.mrb[116].mxu1 }
0x27c6   :  { %v7399_v30 = vadd.f32 %v6023_v57, %v4296_v19  ;;  %v4343_v8 = vpop.f32.mrb[117].mxu1 }
0x27c7   :  { %v6024_v31 = vpop.f32.mrb[118].mxu1  ;;  %v4344_v36 = vadd.f32 %v4343_v8, %v4296_v19 }
0x27c8   :  { %v4346_v54 = vpop.f32.mrb[119].mxu1 }
0x27c9   :  { %v7401_v48 = vadd.f32 %v4346_v54, %v4296_v19 }
0x27cb   :  { %v7404_v37 = vpack.c.bf16 %v7401_v48, %v4344_v36  ;;  %v4585_v17 = vpack.c.bf16 %v7399_v30, %v7401_v48 }
0x27cd   :  { %v4364_v5 = vsel %vm161_vm2, %v7404_v37, 0  ;;  %v7443_v58 = vrot.slane %v4585_v17, 1 }
0x27cf   :  { %v4592_v23 = vsel %vm161_vm2, %v7443_v58, 0 }
0x2850   :  { %v4181_v28 = vpop.xlane.xlu1 %4180 }
0x2851   :  { %v4185_v18 = vmul.f32 0.03125, %v4181_v28 }
0x2852   :  { %v4184_v2 = vpop.xlane.xlu0 %4183 }
0x2853   :  { %v4187_v20 = vsub.f32 %v4177_v16, %v4185_v18  ;;  %v4186_v21 = vmul.f32 0.03125, %v4184_v2 }
0x2855   :  { %v4188_v24 = vsub.f32 %v4178_v61, %v4186_v21  ;;  %v4189_v25 = vmul.f32 %v4187_v20, %v4187_v20 }
0x2857   :  { %v4191_v29 = vsel %vm99_vm0, %v4189_v25, 0.0  ;;  %v4190_v4 = vmul.f32 %v4188_v24, %v4188_v24 }
0x2858   :  { %4192 = vadd.xlane.f32.xlu0 %v4191_v29 }
0x2859   :  { %v4194_v32 = vsel %vm99_vm0, %v4190_v4, 0.0 }
0x285a   :  { %4195 = vadd.xlane.f32.xlu1 %v4194_v32 }
0x286e   :  { %4470 = vrot.lane.b32.xlu0 %v7404_v37, %s6411_s28 }
0x28e5   :  { %v4193_v45 = vpop.xlane.xlu0 %4192 }
0x28e6   :  { %v4197_v41 = vmul.f32 0.03125, %v4193_v45 }
0x28e7   :  { %v4196_v38 = vpop.xlane.xlu1 %4195 }
0x28e8   :  { %v4199_v3 = vadd.f32 1e-05, %v4197_v41  ;;  %v4198_v42 = vmul.f32 0.03125, %v4196_v38 }
0x28e9   :  { %v4471_v53 = vpop.permute.xlu0 %4470 }
0x28ea   :  { %6365 = vrsqrt.f32 %v4199_v3  ;;  %v4200_v43 = vadd.f32 1e-05, %v4198_v42  ;;  %v4476_v52 = vsel %vm161_vm2, %v4471_v53, 0 }
0x28ec   :  { %6367 = vrsqrt.f32 %v4200_v43 }
0x28f4   :  { %v6366_v47 = vpop.eup %6365 }
0x28f5   :  { %v4203_v55 = vmul.f32 %v6366_v47, %v4187_v20 }
0x28f6   :  { %v6368_v15 = vpop.eup %6367 }
0x28f7   :  { %v4209_v22 = vmul.f32 %v4208_v44, %v4203_v55  ;;  %v4204_v27 = vmul.f32 %v6368_v15, %v4188_v24 }
0x28f9   :  { %v4210_v62 = vmul.f32 %v4208_v44, %v4204_v27  ;;  %v7424_v40 = vadd.f32 %v4214_v60, %v4209_v22 }
0x28fb   :  { %v7426_v0 = vadd.f32 %v4214_v60, %v4210_v62 }
0x28fd   :  { %v4232_v1 = vpack.c.bf16 %v7426_v0, %v7424_v40 }
0x28ff   :  { %6014 = vmatmul.mubr.msk.bf16.vlgmr.msra.gmra.mrb[112].mxu0 %vm99_vm0, %v4232_v1 }
0x2900   :  { %6026 = vmatpush3.bf16.xpose.msra.mxu0 %v4364_v5  ;;  %6027 = vmatprep.mubr.msk.bf16.mxu0 %vm6409_vm1, %v6408_v11 }
0x2901   :  { %6037 = vmatprep.subr.bf16.mxu0 %v6408_v11 }
0x29d2   :  { %v4286_v26 = vpop.f32.mrb[112].mxu0 }
0x29d3   :  { %v4287_v33 = vadd.f32 %v4286_v26, %v4236_v13  ;;  %v6015_v10 = vpop.f32.mrb[113].mxu0 }
0x29d4   :  { %v4289_v7 = vpop.f32.mrb[114].mxu0 }
0x29d5   :  { %v4357_v50 = vmul.f32 0.25, %v4287_v33  ;;  %v4290_v46 = vadd.f32 %v4289_v7, %v4236_v13  ;;  %v6016_v56 = vpop.f32.mrb[115].mxu0 }
0x29d7   :  { %v4358_v16 = vpack.c.bf16 %v4357_v50, %v4357_v50  ;;  %v4583_v59 = vmul.f32 0.25, %v4290_v46 }
0x29d9   :  { %v4584_v61 = vpack.c.bf16 %v4583_v59, %v4583_v59  ;;  %4468 = vrot.lane.b32.xlu1 %v4358_v16, %s6411_s28  ;;  %6028 = vmatmul.mubr.msk.bf16.vlgmr.msra.gmra.mrb[116].mxu0 %vm161_vm2, %v4358_v16 }
0x29da   :  { %6038 = vmatpush3.bf16.xpose.msra.mxu0 %v4476_v52  ;;  %6039 = vmatprep.mubr.msk.bf16.mxu0 %vm6409_vm1, %v6408_v11 }
0x29db   :  { %4695 = vrot.lane.b32.xlu0 %v4584_v61, %s6411_s28  ;;  %6049 = vmatprep.subr.bf16.mxu0 %v6408_v11 }
0x29dd   :  { %4697 = vrot.lane.b32.xlu1 %v7443_v58, %s6411_s28 }
0x2a4b   :  { %v4469_v19 = vpop.permute.xlu1 %4468 }
0x2a4c   :  { %6040 = vmatmul.mubr.msk.bf16.vlgmr.msra.gmra.mrb[120].mxu0 %vm161_vm2, %v4469_v19 }
0x2a4d   :  { %6050 = vmatpush3.bf16.xpose.msra.mxu0 %v4592_v23  ;;  %6051 = vmatprep.mubr.msk.bf16.mxu0 %vm6409_vm1, %v6408_v11  ;;  %v4696_v8 = vpop.permute.xlu0 %4695 }
0x2a4e   :  { %6061 = vmatprep.subr.bf16.mxu0 %v6408_v11 }
0x2a4f   :  { %v4698_v57 = vpop.permute.xlu1 %4697 }
0x2a50   :  { %v4703_v30 = vsel %vm161_vm2, %v4698_v57, 0 }
0x2a54   :  { %6052 = vmatmul.mubr.msk.bf16.vlgmr.msra.gmra.mrb[124].mxu0 %vm161_vm2, %v4584_v61 }
0x2a55   :  { %6062 = vmatpush3.bf16.xpose.msra.mxu0 %v4703_v30  ;;  %6063 = vmatprep.mubr.msk.bf16.mxu0 %vm6409_vm1, %v6408_v11 }
0x2a56   :  { %6073 = vmatprep.subr.bf16.mxu0 %v6408_v11 }
0x2a5c   :  { %6064 = vmatmul.mubr.msk.bf16.vlgmr.msra.gmra.mrb[128].mxu0 %vm161_vm2, %v4696_v8 }
0x2a5d   :  { %6077 = vmatprep.mubr.msk.bf16.mxu0 %vm6409_vm1, %v6408_v11 }
0x2aac   :  { %v4400_v31 = vpop.f32.mrb[116].mxu0 }
0x2aad   :  { %v6029_v54 = vpop.f32.mrb[117].mxu0  ;;  %v4406_v36 = vsel %vm209_vm3, %v4400_v31, -inf }
0x2aae   :  { %4407 = vmax.xlane.f32.xlu1 %v4406_v36  ;;  %v4403_v48 = vpop.f32.mrb[118].mxu0 }
0x2aaf   :  { %v6030_v17 = vpop.f32.mrb[119].mxu0 }
0x2b1f   :  { %v4512_v28 = vpop.f32.mrb[120].mxu0 }
0x2b20   :  { %v6041_v18 = vpop.f32.mrb[121].mxu0  ;;  %v4518_v2 = vsel %vm209_vm3, %v4512_v28, -inf }
0x2b21   :  { %4519 = vmax.xlane.f32.xlu0 %v4518_v2  ;;  %v4515_v20 = vpop.f32.mrb[122].mxu0 }
0x2b22   :  { %v6042_v21 = vpop.f32.mrb[123].mxu0 }
0x2b27   :  { %v4628_v24 = vpop.f32.mrb[124].mxu0 }
0x2b28   :  { %v6053_v25 = vpop.f32.mrb[125].mxu0  ;;  %v4634_v29 = vsel %vm209_vm3, %v4628_v24, -inf }
0x2b29   :  { %4635 = vmax.xlane.f32.xlu0 %v4634_v29  ;;  %v4631_v4 = vpop.f32.mrb[126].mxu0  ;;  %v6201_v25 = vld [vmem:[%s7608_s11 + $0x10] sm:$0xff]  }
0x2b2a   :  { %v6054_v32 = vpop.f32.mrb[127].mxu0  ;;  %6074 = vmatpush3.bf16.msra.mxu0 %v6201_v25 }
0x2b2b   :  { %6075 = vmatprep.subr.bf16.mxu0 %v6408_v11 }
0x2b2f   :  { %v4739_v34 = vpop.f32.mrb[128].mxu0 }
0x2b30   :  { %v6065_v35 = vpop.f32.mrb[129].mxu0  ;;  %v4745_v45 = vsel %vm209_vm3, %v4739_v34, -inf }
0x2b31   :  { %4746 = vmax.xlane.f32.xlu1 %v4745_v45  ;;  %v4742_v41 = vpop.f32.mrb[130].mxu0 }
0x2b32   :  { %v6066_v38 = vpop.f32.mrb[131].mxu0 }
0x2b3b   :  { %v4408_v3 = vpop.xlane.xlu1 %4407 }
0x2b3c   :  { %v4409_v42 = vsub.f32 %v4400_v31, %v4408_v3  ;;  %v6202_v3 = vld [vmem:[%s7608_s11 + $0x18] sm:$0xff]  }
0x2b3d   :  { %6076 = vmatpush3.bf16.msra.mxu0 %v6202_v3 }
0x2b3e   :  { %v4410_v43 = vmul.f32 1.442695, %v4409_v42  ;;  %6089 = vmatprep.subr.bf16.mxu0 %v6408_v11 }
0x2b40   :  { %6369 = vpow2.f32 %v4410_v43 }
0x2b4a   :  { %v6370_v44 = vpop.eup %6369 }
0x2b4b   :  { %v4412_v47 = vsel %vm209_vm3, %v6370_v44, 0.0 }
0x2b4c   :  { %4413 = vadd.xlane.f32.xlu0 %v4412_v47 }
0x2bae   :  { %v4520_v55 = vpop.xlane.xlu0 %4519 }
0x2baf   :  { %v4521_v15 = vsub.f32 %v4512_v28, %v4520_v55 }
0x2bb1   :  { %v4522_v22 = vmul.f32 1.442695, %v4521_v15 }
0x2bb3   :  { %6371 = vpow2.f32 %v4522_v22 }
0x2bb6   :  { %v4636_v27 = vpop.xlane.xlu0 %4635 }
0x2bb7   :  { %v4637_v60 = vsub.f32 %v4628_v24, %v4636_v27 }
0x2bb9   :  { %v4638_v62 = vmul.f32 1.442695, %v4637_v60 }
0x2bbb   :  { %6373 = vpow2.f32 %v4638_v62 }
0x2bbd   :  { %v6372_v1 = vpop.eup %6371 }
0x2bbe   :  { %v4524_v5 = vsel %vm209_vm3, %v6372_v1, 0.0  ;;  %v4747_v33 = vpop.xlane.xlu1 %4746 }
0x2bbf   :  { %4525 = vadd.xlane.f32.xlu1 %v4524_v5  ;;  %v4748_v10 = vsub.f32 %v4739_v34, %v4747_v33 }
0x2bc1   :  { %v4749_v7 = vmul.f32 1.442695, %v4748_v10  ;;  %v4814_v10 = vrot.slane %v7289_v39, %v6718_v6 }
0x2bc3   :  { %6375 = vpow2.f32 %v4749_v7 }
0x2bc5   :  { %v6374_v13 = vpop.eup %6373 }
0x2bc6   :  { %v4640_v26 = vsel %vm209_vm3, %v6374_v13, 0.0 }
0x2bc7   :  { %4641 = vadd.xlane.f32.xlu0 %v4640_v26 }
0x2bcd   :  { %v6376_v50 = vpop.eup %6375 }
0x2bce   :  { %v4751_v46 = vsel %vm209_vm3, %v6376_v50, 0.0 }
0x2bd0   :  { %4530 = vrot.lane.b32.xlu1 %v7404_v37, %s6412_s30 }
0x2bd9   :  { %v4414_v56 = vpop.xlane.xlu0 %4413 }
0x2bda   :  { %6377 = vrcp.f32 %v4414_v56 }
0x2bdd   :  { %4419 = vrot.lane.b32.xlu0 %v7404_v37, %s6410_s27 }
0x2be1   :  { %4757 = vrot.lane.b32.xlu0 %v7443_v58, %s6412_s30 }
0x2be4   :  { %v6378_v16 = vpop.eup %6377 }
0x2be5   :  { %v4416_v37 = vmul.f32 %v6378_v16, %v6370_v44 }
0x2be7   :  { %v4417_v23 = vpack.c.bf16 %v4416_v37, %v4416_v37 }
0x2bf4   :  { %4752 = vadd.xlane.f32.xlu1 %v4751_v46 }
0x2c05   :  { %4646 = vrot.lane.b32.xlu1 %v7443_v58, %s6410_s27 }
0x2c4c   :  { %v4526_v53 = vpop.xlane.xlu1 %4525 }
0x2c4d   :  { %6379 = vrcp.f32 %v4526_v53 }
0x2c50   :  { %v4531_v19 = vpop.permute.xlu1 %4530 }
0x2c51   :  { %v4536_v30 = vsel %vm239_vm5, %v4531_v19, 0 }
0x2c54   :  { %v4642_v59 = vpop.xlane.xlu0 %4641 }
0x2c55   :  { %6381 = vrcp.f32 %v4642_v59 }
0x2c57   :  { %v6380_v57 = vpop.eup %6379 }
0x2c58   :  { %v4420_v52 = vpop.permute.xlu0 %4419  ;;  %v4528_v58 = vmul.f32 %v6380_v57, %v6372_v1 }
0x2c59   :  { %v4425_v61 = vsel %vm239_vm5, %v4420_v52, 0 }
0x2c5a   :  { %6032 = vmatpush3.bf16.msra.mxu1 %v4425_v61  ;;  %v4529_v8 = vpack.c.bf16 %v4528_v58, %v4528_v58 }
0x2c5b   :  { %6043 = vmatprep.subr.bf16.mxu1 %v6408_v11 }
0x2c5c   :  { %v4758_v28 = vpop.permute.xlu0 %4757 }
0x2c5d   :  { %6034 = vmatmul.mubr.msk.bf16.vlgmr.msra.gmra.mrb[120].mxu1 %vm209_vm3, %v4417_v23  ;;  %v4763_v2 = vsel %vm239_vm5, %v4758_v28, 0 }
0x2c5e   :  { %6044 = vmatpush3.bf16.msra.mxu1 %v4536_v30  ;;  %6045 = vmatprep.mubr.msk.bf16.mxu1 %vm6409_vm1, %v6408_v11 }
0x2c5f   :  { %6055 = vmatprep.subr.bf16.mxu1 %v6408_v11  ;;  %v6382_v31 = vpop.eup %6381 }
0x2c60   :  { %v4644_v36 = vmul.f32 %v6382_v31, %v6374_v13 }
0x2c62   :  { %v4645_v18 = vpack.c.bf16 %v4644_v36, %v4644_v36  ;;  %v6204_v36 = vld [vmem:[%s7609_s12 + $0x18] sm:$0xff]  }
0x2c65   :  { %6046 = vmatmul.mubr.msk.bf16.vlgmr.msra.gmra.mrb[124].mxu1 %vm209_vm3, %v4529_v8 }
0x2c66   :  { %6057 = vmatprep.mubr.msk.bf16.mxu1 %vm6409_vm1, %v6408_v11 }
0x2c81   :  { %v4753_v54 = vpop.xlane.xlu1 %4752 }
0x2c82   :  { %6383 = vrcp.f32 %v4753_v54 }
0x2c85   :  { %v4647_v48 = vpop.permute.xlu1 %4646 }
0x2c86   :  { %v4652_v17 = vsel %vm239_vm5, %v4647_v48, 0  ;;  %v6205_v48 = vld [vmem:[%s7610_s13 + $0x20] sm:$0xff]  }
0x2c87   :  { %6056 = vmatpush3.bf16.msra.mxu1 %v4652_v17  ;;  %v6206_v17 = vld [vmem:[%s7610_s13 + $0x28] sm:$0xff]  }
0x2c88   :  { %6067 = vmatprep.subr.bf16.mxu1 %v6408_v11 }
0x2c8a   :  { %6058 = vmatmul.mubr.msk.bf16.vlgmr.msra.gmra.mrb[128].mxu1 %vm209_vm3, %v4645_v18 }
0x2c8b   :  { %6068 = vmatpush3.bf16.msra.mxu1 %v4763_v2  ;;  %6069 = vmatprep.mubr.msk.bf16.mxu1 %vm6409_vm1, %v6408_v11 }
0x2c8c   :  { %v6384_v20 = vpop.eup %6383  ;;  %6081 = vmatprep.subr.bf16.mxu1 %v6408_v11 }
0x2c8d   :  { %v4755_v21 = vmul.f32 %v6384_v20, %v6376_v50 }
0x2c8f   :  { %v4756_v24 = vpack.c.bf16 %v4755_v21, %v4755_v21 }
0x2c92   :  { %6070 = vmatmul.mubr.msk.bf16.vlgmr.msra.gmra.mrb[132].mxu1 %vm209_vm3, %v4756_v24 }
0x2c93   :  { %6085 = vmatprep.mubr.msk.bf16.mxu1 %vm6409_vm1, %v6408_v11 }
0x2d30   :  { %v4461_v29 = vpop.f32.mrb[120].mxu1 }
0x2d31   :  { %v6035_v4 = vpop.f32.mrb[121].mxu1 }
0x2d32   :  { %v4464_v32 = vpop.f32.mrb[122].mxu1 }
0x2d33   :  { %v6036_v34 = vpop.f32.mrb[123].mxu1  ;;  %v7542_v32 = vld [vmem:[%s7603_s14 + $0x18] sm:$0x1f] }
0x2d38   :  { %v4572_v35 = vpop.f32.mrb[124].mxu1 }
0x2d39   :  { %v6047_v45 = vpop.f32.mrb[125].mxu1 }
0x2d3a   :  { %v4575_v41 = vpop.f32.mrb[126].mxu1 }
0x2d3b   :  { %v6048_v38 = vpop.f32.mrb[127].mxu1  ;;  %v4908_v41 = vrot.slane %v7542_v32, %v6542_v9  ;;  %v6208_v9 = vld [vmem:[%s7610_s13 + $0x38] sm:$0xff]  }
0x2d5d   :  { %v4688_v42 = vpop.f32.mrb[128].mxu1 }
0x2d5e   :  { %v6059_v43 = vpop.f32.mrb[129].mxu1 }
0x2d5f   :  { %v4691_v44 = vpop.f32.mrb[130].mxu1 }
0x2d60   :  { %v6060_v47 = vpop.f32.mrb[131].mxu1 }
0x2d65   :  { %v4799_v55 = vpop.f32.mrb[132].mxu1 }
0x2d66   :  { %v6152_v15 = vpack.i.bf16 %v4799_v55, %v4572_v35  ;;  %v6071_v22 = vpop.f32.mrb[133].mxu1 }
0x2d67   :  { %v4802_v27 = vpop.f32.mrb[134].mxu1 }
0x2d68   :  { %6153 = vrot.lane.b32.xlu1 %v6152_v15, %s7625_s23  ;;  %v6072_v60 = vpop.f32.mrb[135].mxu1 }
0x2dda   :  { %v6154_v62 = vpop.permute.xlu1 %6153 }
0x2ddb   :  { %v6156_v1 = vunpack.i.h.bf16 %v6154_v62  ;;  %v6155_v5 = vunpack.i.l.bf16 %v6154_v62 }
0x2ddd   :  { %v4809_v13 = vsel %vm161_vm2, %v4688_v42, %v6156_v1  ;;  %v4582_v26 = vsel %vm161_vm2, %v4461_v29, %v6155_v5  ;;  %v4902_v29 = vrot.slane %v7289_v39, %v6723_v14  ;;  %v6207_v14 = vld [vmem:[%s7610_s13 + $0x30] sm:$0xff]   ;;  %v4929_v39 = vrot.slane %v7542_v32, %v6646_v63 }
0x2dde   :  { %v4810_v33 = vpack.c.bf16 %v4809_v13, %v4582_v26  ;;  %v4992_v5 = vrot.slane %v7542_v32, %v6672_v49 }
0x2de0   :  { %6078 = vmatmul.mubr.msk.bf16.vlgmr.msra.gmra.mrb[132].mxu0 %vm99_vm0, %v4810_v33 }
0x2de1   :  { %6097 = vmatprep.mubr.msk.bf16.mxu0 %vm6409_vm1, %v6408_v11  ;;  %6090 = vmatpush3.bf16.msra.mxu0 %v6205_v48 }
0x2de2   :  { %6091 = vmatprep.subr.bf16.mxu0 %v6408_v11 }
0x2de5   :  { %6092 = vmatpush3.bf16.msra.mxu0 %v6206_v17 }
0x2de6   :  { %6093 = vmatprep.subr.bf16.mxu0 %v6408_v11 }
0x2de9   :  { %6094 = vmatpush3.bf16.msra.mxu0 %v6207_v14  ;;  %v6209_v14 = vld [vmem:[%s7611_s16] sm:$0xff]  }
0x2dea   :  { %6095 = vmatprep.subr.bf16.mxu0 %v6408_v11 }
0x2ded   :  { %6096 = vmatpush3.bf16.msra.mxu0 %v6208_v9  ;;  %v6210_v9 = vld [vmem:[%s7611_s16 + $0x8] sm:$0xff]  }
0x2eb3   :  { %v4864_v7 = vpop.f32.mrb[132].mxu0 }
0x2eb4   :  { %v4865_v50 = vadd.f32 %v4864_v7, %v4814_v10  ;;  %v6079_v46 = vpop.f32.mrb[133].mxu0 }
0x2eb5   :  { %v4867_v56 = vpop.f32.mrb[134].mxu0 }
0x2eb6   :  { %v4871_v53 = vadd.f32 %v4865_v50, %v7424_v40  ;;  %v4868_v16 = vadd.f32 %v4867_v56, %v4814_v10  ;;  %v6080_v59 = vpop.f32.mrb[135].mxu0 }
0x2eb8   :  { %v4872_v37 = vadd.f32 %v4868_v16, %v7426_v0  ;;  %v4873_v52 = vsel %vm99_vm0, %v4871_v53, 0.0  ;;  %v6203_v0 = vld [vmem:[%s7609_s12 + $0x10] sm:$0xff]  }
0x2eb9   :  { %4874 = vadd.xlane.f32.xlu0 %v4873_v52  ;;  %6082 = vmatpush3.bf16.msra.mxu1 %v6203_v0 }
0x2eba   :  { %v4876_v61 = vsel %vm99_vm0, %v4872_v37, 0.0  ;;  %6083 = vmatprep.subr.bf16.mxu1 %v6408_v11 }
0x2ebb   :  { %4877 = vadd.xlane.f32.xlu1 %v4876_v61 }
0x2ebd   :  { %6084 = vmatpush3.bf16.msra.mxu1 %v6204_v36  ;;  %v5092_v36 = vrot.slane %v7542_v32, %v6677_v51 }
0x2ebe   :  { %6101 = vmatprep.subr.bf16.mxu1 %v6408_v11 }
0x2f46   :  { %v4875_v19 = vpop.xlane.xlu0 %4874 }
0x2f47   :  { %v4879_v23 = vmul.f32 0.03125, %v4875_v19 }
0x2f48   :  { %v4878_v57 = vpop.xlane.xlu1 %4877 }
0x2f49   :  { %v4881_v6 = vsub.f32 %v4871_v53, %v4879_v23  ;;  %v4880_v30 = vmul.f32 0.03125, %v4878_v57 }
0x2f4b   :  { %v4882_v58 = vsub.f32 %v4872_v37, %v4880_v30  ;;  %v4883_v8 = vmul.f32 %v4881_v6, %v4881_v6 }
0x2f4d   :  { %v4885_v31 = vsel %vm99_vm0, %v4883_v8, 0.0  ;;  %v4884_v40 = vmul.f32 %v4882_v58, %v4882_v58 }
0x2f4e   :  { %4886 = vadd.xlane.f32.xlu0 %v4885_v31 }
0x2f4f   :  { %v4888_v54 = vsel %vm99_vm0, %v4884_v40, 0.0 }
0x2f52   :  { %4889 = vadd.xlane.f32.xlu0 %v4888_v54 }
0x2fdb   :  { %v4887_v28 = vpop.xlane.xlu0 %4886 }
0x2fdc   :  { %v4891_v18 = vmul.f32 0.03125, %v4887_v28  ;;  %v5098_v28 = vrot.slane %v7542_v32, %v6691_v12 }
0x2fde   :  { %v4893_v2 = vadd.f32 1e-05, %v4891_v18 }
0x2fdf   :  { %v4890_v20 = vpop.xlane.xlu0 %4889 }
0x2fe0   :  { %6385 = vrsqrt.f32 %v4893_v2  ;;  %v4892_v21 = vmul.f32 0.03125, %v4890_v20 }
0x2fe2   :  { %v4894_v24 = vadd.f32 1e-05, %v4892_v21 }
0x2fe4   :  { %6387 = vrsqrt.f32 %v4894_v24 }
0x2fea   :  { %v6386_v25 = vpop.eup %6385 }
0x2feb   :  { %v4897_v4 = vmul.f32 %v6386_v25, %v4881_v6 }
0x2fed   :  { %v4903_v35 = vmul.f32 %v4902_v29, %v4897_v4 }
0x2fee   :  { %v6388_v34 = vpop.eup %6387 }
0x2fef   :  { %v4898_v45 = vmul.f32 %v6388_v34, %v4882_v58  ;;  %v4909_v3 = vadd.f32 %v4908_v41, %v4903_v35 }
0x2ff1   :  { %v4904_v38 = vmul.f32 %v4902_v29, %v4898_v45 }
0x2ff3   :  { %v4910_v42 = vadd.f32 %v4908_v41, %v4904_v38 }
0x2ff5   :  { %v4925_v43 = vpack.c.bf16 %v4910_v42, %v4909_v3 }
0x2ff7   :  { %6086 = vmatmul.mubr.msk.bf16.vlgmr.msra.gmra.mrb[136].mxu1 %vm99_vm0, %v4925_v43 }
0x2ff8   :  { %6105 = vmatprep.mubr.msk.bf16.mxu1 %vm6409_vm1, %v6408_v11  ;;  %6102 = vmatpush3.bf16.msra.mxu1 %v6209_v14 }
0x2ff9   :  { %6103 = vmatprep.subr.bf16.mxu1 %v6408_v11 }
0x2ffc   :  { %6104 = vmatpush3.bf16.msra.mxu1 %v6210_v9 }
0x30ca   :  { %v4979_v44 = vpop.f32.mrb[136].mxu1 }
0x30cb   :  { %v4980_v47 = vadd.f32 %v4979_v44, %v4929_v39  ;;  %v6087_v55 = vpop.f32.mrb[137].mxu1 }
0x30cc   :  { %v4982_v15 = vpop.f32.mrb[138].mxu1 }
0x30cd   :  { %v4983_v22 = vadd.f32 %v4982_v15, %v4929_v39  ;;  %v6088_v27 = vpop.f32.mrb[139].mxu1  ;;  %v4986_v60 = vmax.f32 %v4980_v47, 0.0 }
0x30ce   :  { %v6407_v27 = vld [vmem:[%s7607_s15] sm:$0xf] }
0x30cf   :  { %v4987_v62 = vmax.f32 %v4983_v22, 0.0 }
0x30d1   :  { %v4988_v1 = vpack.c.bf16 %v4987_v62, %v4986_v60  ;;  %v5130_v60 = vrot.slane %v6407_v27, %v6672_v49 }
0x30d3   :  { %6098 = vmatmul.mubr.msk.bf16.vlgmr.msra.gmra.mrb[136].mxu0 %vm935_vm8, %v4988_v1 }
0x31a6   :  { %v5054_v13 = vpop.f32.mrb[136].mxu0 }
0x31a7   :  { %v5055_v26 = vadd.f32 %v5054_v13, %v4992_v5  ;;  %v6099_v33 = vpop.f32.mrb[137].mxu0 }
0x31a8   :  { %v5057_v10 = vpop.f32.mrb[138].mxu0 }
0x31a9   :  { %v5061_v7 = vadd.f32 %v5055_v26, %v4909_v3  ;;  %v5058_v63 = vadd.f32 %v5057_v10, %v4992_v5  ;;  %v6100_v50 = vpop.f32.mrb[139].mxu0  ;;  %v5136_v26 = vrot.slane %v6407_v27, %v6677_v51 }
0x31aa   :  { %v5434_v50 = vld [vmem:[%s7612_s17] ss:$0 sm:$0xff] }
0x31ab   :  { %v5062_v46 = vadd.f32 %v5058_v63, %v4910_v42  ;;  %v5063_v56 = vsel %vm99_vm0, %v5061_v7, 0.0 }
0x31ac   :  { %5064 = vadd.xlane.f32.xlu1 %v5063_v56 }
0x31ad   :  { %v5066_v53 = vsel %vm99_vm0, %v5062_v46, 0.0 }
0x31ae   :  { %5067 = vadd.xlane.f32.xlu0 %v5066_v53 }
0x3239   :  { %v5065_v16 = vpop.xlane.xlu1 %5064 }
0x323a   :  { %v5069_v59 = vmul.f32 0.03125, %v5065_v16 }
0x323b   :  { %v5068_v37 = vpop.xlane.xlu0 %5067 }
0x323c   :  { %v5071_v52 = vsub.f32 %v5061_v7, %v5069_v59  ;;  %v5070_v61 = vmul.f32 0.03125, %v5068_v37 }
0x323e   :  { %v5072_v19 = vsub.f32 %v5062_v46, %v5070_v61  ;;  %v5073_v23 = vmul.f32 %v5071_v52, %v5071_v52 }
0x3240   :  { %v5075_v57 = vsel %vm99_vm0, %v5073_v23, 0.0  ;;  %v5074_v6 = vmul.f32 %v5072_v19, %v5072_v19 }
0x3241   :  { %5076 = vadd.xlane.f32.xlu1 %v5075_v57 }
0x3242   :  { %v5078_v30 = vsel %vm99_vm0, %v5074_v6, 0.0 }
0x3243   :  { %5079 = vadd.xlane.f32.xlu0 %v5078_v30 }
0x32ce   :  { %v5077_v58 = vpop.xlane.xlu1 %5076 }
0x32cf   :  { %v5081_v8 = vmul.f32 0.03125, %v5077_v58 }
0x32d0   :  { %v5080_v31 = vpop.xlane.xlu0 %5079 }
0x32d1   :  { %v5083_v40 = vadd.f32 1e-05, %v5081_v8  ;;  %v5082_v54 = vmul.f32 0.03125, %v5080_v31 }
0x32d3   :  { %6389 = vrsqrt.f32 %v5083_v40  ;;  %v5084_v0 = vadd.f32 1e-05, %v5082_v54 }
0x32d5   :  { %6391 = vrsqrt.f32 %v5084_v0 }
0x32dd   :  { %v6390_v48 = vpop.eup %6389 }
0x32de   :  { %v5087_v17 = vmul.f32 %v6390_v48, %v5071_v52 }
0x32df   :  { %v6392_v18 = vpop.eup %6391 }
0x32e0   :  { %v5093_v2 = vmul.f32 %v5092_v36, %v5087_v17  ;;  %v5088_v20 = vmul.f32 %v6392_v18, %v5072_v19 }
0x32e2   :  { %v5099_v21 = vadd.f32 %v5098_v28, %v5093_v2  ;;  %v5094_v24 = vmul.f32 %v5092_v36, %v5088_v20 }
0x32e4   :  { %v5101_v25 = vsel %vm99_vm0, %v5099_v21, 0.0  ;;  %v5100_v29 = vadd.f32 %v5098_v28, %v5094_v24 }
0x32e5   :  { %5102 = vadd.xlane.f32.xlu1 %v5101_v25 }
0x32e6   :  { %v5104_v4 = vsel %vm99_vm0, %v5100_v29, 0.0 }
0x32e7   :  { %5105 = vadd.xlane.f32.xlu0 %v5104_v4 }
0x3372   :  { %v5103_v34 = vpop.xlane.xlu1 %5102 }
0x3373   :  { %v5107_v35 = vmul.f32 0.03125, %v5103_v34 }
0x3374   :  { %v5106_v45 = vpop.xlane.xlu0 %5105 }
0x3375   :  { %v5109_v41 = vsub.f32 %v5099_v21, %v5107_v35  ;;  %v5108_v38 = vmul.f32 0.03125, %v5106_v45 }
0x3377   :  { %v5110_v3 = vsub.f32 %v5100_v29, %v5108_v38  ;;  %v5111_v42 = vmul.f32 %v5109_v41, %v5109_v41 }
0x3379   :  { %v5113_v12 = vsel %vm99_vm0, %v5111_v42, 0.0  ;;  %v5112_v32 = vmul.f32 %v5110_v3, %v5110_v3 }
0x337a   :  { %5114 = vadd.xlane.f32.xlu1 %v5113_v12 }
0x337b   :  { %v5116_v43 = vsel %vm99_vm0, %v5112_v32, 0.0 }
0x337c   :  { %5117 = vadd.xlane.f32.xlu0 %v5116_v43 }
0x3407   :  { %v5115_v39 = vpop.xlane.xlu1 %5114 }
0x3408   :  { %v5119_v44 = vmul.f32 0.03125, %v5115_v39 }
0x3409   :  { %v5118_v47 = vpop.xlane.xlu0 %5117 }
0x340a   :  { %v5121_v55 = vadd.f32 1e-05, %v5119_v44  ;;  %v5120_v15 = vmul.f32 0.03125, %v5118_v47 }
0x340c   :  { %6393 = vrsqrt.f32 %v5121_v55  ;;  %v5122_v22 = vadd.f32 1e-05, %v5120_v15 }
0x340e   :  { %6395 = vrsqrt.f32 %v5122_v22 }
0x3416   :  { %v6394_v62 = vpop.eup %6393 }
0x3417   :  { %v5125_v1 = vmul.f32 %v6394_v62, %v5109_v41 }
0x3418   :  { %v6396_v5 = vpop.eup %6395 }
0x3419   :  { %v5131_v13 = vmul.f32 %v5130_v60, %v5125_v1  ;;  %v5126_v11 = vmul.f32 %v6396_v5, %v5110_v3 }
0x341b   :  { %v5132_v33 = vmul.f32 %v5130_v60, %v5126_v11  ;;  %v5137_v10 = vadd.f32 %v5136_v26, %v5131_v13 }
0x341d   :  { %v5138_v7 = vadd.f32 %v5136_v26, %v5132_v33 }
0x341f   :  { %v5143_v63 = vpack.c.bf16 %v5138_v7, %v5137_v10 }
0x3421   :  { %6106 = vmatmul.mubr.msk.bf16.vlgmr.msra.gmra.mrb[140].mxu1 %vm99_vm0, %v5143_v63 }
0x34f4   :  { %v5200_v46 = vpop.f32.mrb[140].mxu1 }
0x34f5   :  { %v5201_v56 = vadd.f32 %v5434_v50, %v5200_v46  ;;  %v6107_v49 = vpop.f32.mrb[141].mxu1 }
0x34f6   :  { %v5203_v53 = vpop.f32.mrb[142].mxu1 }
0x34f7   :  { %v5207_v16 = vrot.slane %v5201_v56, 4  ;;  %v5204_v59 = vadd.f32 %v5434_v50, %v5203_v53  ;;  %v6108_v37 = vpop.f32.mrb[143].mxu1 }
0x34f9   :  { %v5208_v52 = vmax.f32 %v5201_v56, %v5207_v16  ;;  %v5224_v61 = vrot.slane %v5204_v59, 4 }
0x34fb   :  { %v5209_v51 = vrot.slane %v5208_v52, 2  ;;  %v5225_v19 = vmax.f32 %v5204_v59, %v5224_v61 }
0x34fd   :  { %v5210_v23 = vmax.f32 %v5208_v52, %v5209_v51  ;;  %v5226_v57 = vrot.slane %v5225_v19, 2 }
0x34ff   :  { %v5211_v6 = vrot.slane %v5210_v23, 1  ;;  %v5227_v30 = vmax.f32 %v5225_v19, %v5226_v57 }
0x3501   :  { %v5212_v58 = vmax.f32 %v5210_v23, %v5211_v6  ;;  %v5228_v8 = vrot.slane %v5227_v30, 1 }
0x3503   :  { %v5213_v31 = vsub.f32 %v5201_v56, %v5212_v58  ;;  %v5229_v40 = vmax.f32 %v5227_v30, %v5228_v8 }
0x3505   :  { %v5214_v54 = vmul.f32 1.442695, %v5213_v31  ;;  %v5230_v0 = vsub.f32 %v5204_v59, %v5229_v40 }
0x3507   :  { %6397 = vpow2.f32 %v5214_v54  ;;  %v5231_v36 = vmul.f32 1.442695, %v5230_v0 }
0x3509   :  { %6399 = vpow2.f32 %v5231_v36 }
0x3511   :  { %v6398_v48 = vpop.eup %6397 }
0x3512   :  { %v5216_v17 = vrot.slane %v6398_v48, 4 }
0x3513   :  { %v6400_v28 = vpop.eup %6399 }
0x3514   :  { %v5217_v18 = vadd.f32 %v6398_v48, %v5216_v17  ;;  %v5233_v2 = vrot.slane %v6400_v28, 4 }
0x3516   :  { %v5218_v20 = vrot.slane %v5217_v18, 2  ;;  %v5234_v21 = vadd.f32 %v6400_v28, %v5233_v2 }
0x3518   :  { %v5219_v24 = vadd.f32 %v5218_v20, %v5217_v18  ;;  %v5235_v25 = vrot.slane %v5234_v21, 2 }
0x351a   :  { %v5220_v29 = vrot.slane %v5219_v24, 1  ;;  %v5236_v4 = vadd.f32 %v5235_v25, %v5234_v21 }
0x351c   :  { %v5221_v34 = vadd.f32 %v5220_v29, %v5219_v24  ;;  %v5237_v35 = vrot.slane %v5236_v4, 1 }
0x351e   :  { %6401 = vrcp.f32 %v5221_v34  ;;  %v5238_v45 = vadd.f32 %v5237_v35, %v5236_v4 }
0x3520   :  { %6403 = vrcp.f32 %v5238_v45 }
0x3528   :  { %v6402_v41 = vpop.eup %6401 }
0x3529   :  { %v5223_v38 = vmul.f32 %v6402_v41, %v6398_v48 }
0x352a   :  { %v6404_v3 = vpop.eup %6403 }
0x352b   :  { %5241 = vst [vmem:[%s7613_s18] sm:$0xff] %v5223_v38  ;;  %v5240_v42 = vmul.f32 %v6404_v3, %v6400_v28 }
0x352d   :  { %5242 = vst [vmem:[%s7613_s18 + $0x8] sm:$0xff] %v5240_v42 }

</bundles_post_ra>
